<compile_context>
chip_gen: v6e
topology: v6e:2x2x1
jax: 0.10.0
libtpu: 0.0.40
codegen_flags: <defaults>
</compile_context>

<pallas_src>
import numpy as np
import jax
import jax.numpy as jnp
from jax.experimental import pallas as pl
from jax.experimental.pallas import tpu as pltpu


# ---------------------------------------------------------------------------
# Fused Conv5x5(same) + folded-BN + ReLU + MaxPool2x2 kernel (TB images / step)
# ---------------------------------------------------------------------------
def _conv_bn_relu_pool_kernel(x_ref, w_ref, b_ref, o_ref, acc0_ref):
    """x_ref:    (TB, Hp, Wp*C)       padded input rows, (col, chan) flattened into lanes
       w_ref:    (2, 5, Wp*C, Wo*Co)  banded BN-folded weights (parity, vertical tap), bf16
       b_ref:    (1, Wo*Co)           BN-folded bias, tiled per output column
       o_ref:    (TB, Ho, Wo*Co)      pooled output (lane-dense, 256-wide)
       acc0_ref: (TB*H, Wo*Co) f32    VMEM scratch parking the parity-0 accumulator"""
    TB, Hp, WpC = x_ref.shape
    KY = w_ref.shape[1]
    H = Hp - (KY - 1)
    Ho = H // 2
    N = o_ref.shape[2]

    acc1 = None
    for p in range(2):                      # output-column parity -> horizontal 2x pool
        acc = jnp.zeros((TB * H, N), jnp.float32)
        for ky in range(KY):                # vertical taps: 5 matmuls, K = Wp*C each
            slab = x_ref[:, ky:ky + H, :].reshape(TB * H, WpC).astype(w_ref.dtype)
            acc = acc + jnp.dot(slab, w_ref[p, ky],
                                preferred_element_type=jnp.float32)
        if p == 0:
            acc0_ref[...] = acc             # park; keep a single live accumulator
        else:
            acc1 = acc

    y = jnp.maximum(acc0_ref[...], acc1)                 # horizontal 2x max-pool
    y = y.reshape(TB, Ho, 2, N)
    y = jnp.maximum(y[:, :, 0, :], y[:, :, 1, :])        # vertical 2x max-pool
    o_ref[...] = jnp.maximum(y + b_ref[...], 0.0)        # folded-BN bias + ReLU


def _pick_batch_block(B, H):
    """Largest divisor of B with TB*H <= 128 rows, preferring >=2 grid programs (v7x)."""
    cap = max(1, min(B, 128 // H))
    best = 1
    for t in range(1, cap + 1):
        if B % t == 0 and B // t >= 2:
            best = t
    return best


def conv_bn_relu_pool(x_nhwc, band, bias_lane):
    """(B,H,W,C) NHWC -> (B, H//2, (W//2)*Cout) pooled activations, lanes = (wo, cout)."""
    B, H, W, C = x_nhwc.shape
    K = 5
    Hp, Wp = H + K - 1, W + K - 1
    Ho = H // 2
    N = band.shape[-1]                                   # Wo*Cout = 256
    xp = jnp.pad(x_nhwc, ((0, 0), (2, 2), (2, 2), (0, 0))).reshape(B, Hp, Wp * C)
    TB = _pick_batch_block(B, H)
    return pl.pallas_call(
        _conv_bn_relu_pool_kernel,
        out_shape=jax.ShapeDtypeStruct((B, Ho, N), jnp.float32),
        grid=(B // TB,),
        in_specs=[
            pl.BlockSpec((TB, Hp, Wp * C), lambda b: (b, 0, 0)),
            pl.BlockSpec(band.shape, lambda b: (0, 0, 0, 0)),      # weights stay resident
            pl.BlockSpec(bias_lane.shape, lambda b: (0, 0)),
        ],
        out_specs=pl.BlockSpec((TB, Ho, N), lambda b: (b, 0, 0)),
        scratch_shapes=[pltpu.VMEM((TB * H, N), jnp.float32)],
        compiler_params=pltpu.CompilerParams(dimension_semantics=("parallel",)),
    )(xp, band, bias_lane)


# ---------------------------------------------------------------------------
# Fused FC head: fc1 + ReLU + fc2 + ReLU + fc3 in one kernel (weights in VMEM)
# ---------------------------------------------------------------------------
def _fc_head_kernel(x_ref, w1_ref, b1_ref, w2_ref, b2_ref, w3_ref, b3_ref, o_ref):
    cdt = w1_ref.dtype
    h = jnp.dot(x_ref[...].astype(cdt), w1_ref[...], preferred_element_type=jnp.float32)
    h = jnp.maximum(h + b1_ref[...], 0.0)
    h = jnp.dot(h.astype(cdt), w2_ref[...], preferred_element_type=jnp.float32)
    h = jnp.maximum(h + b2_ref[...], 0.0)
    o_ref[...] = (jnp.dot(h.astype(cdt), w3_ref[...], preferred_element_type=jnp.float32)
                  + b3_ref[...])


def fc_head(flat, params):
    B, D = flat.shape
    if B <= 16:
        TB = B                                            # one full block (tiny batch)
    else:
        TB = min(256, 8 * pl.cdiv(B, 16))                 # ~B/2 rounded to 8 -> >=2 programs
    Bp = TB * pl.cdiv(B, TB)
    x = flat if Bp == B else jnp.pad(flat, ((0, Bp - B), (0, 0)))
    full = lambda i: (0, 0)
    out = pl.pallas_call(
        _fc_head_kernel,
        out_shape=jax.ShapeDtypeStruct((Bp, 128), jnp.float32),
        grid=(Bp // TB,),
        in_specs=[
            pl.BlockSpec((TB, D), lambda i: (i, 0)),
            pl.BlockSpec(params["fc1_w"].shape, full),
            pl.BlockSpec(params["fc1_b"].shape, full),
            pl.BlockSpec(params["fc2_w"].shape, full),
            pl.BlockSpec(params["fc2_b"].shape, full),
            pl.BlockSpec(params["fc3_w"].shape, full),
            pl.BlockSpec(params["fc3_b"].shape, full),
        ],
        out_specs=pl.BlockSpec((TB, 128), lambda i: (i, 0)),
        compiler_params=pltpu.CompilerParams(dimension_semantics=("parallel",)),
    )(x, params["fc1_w"], params["fc1_b"], params["fc2_w"],
      params["fc2_b"], params["fc3_w"], params["fc3_b"])
    return out[:B, :10]                                   # drop the lane padding


# ---------------------------------------------------------------------------
# Parameter construction (BN folded, banded conv weights, padded/permuted FC)
# ---------------------------------------------------------------------------
def _fold_conv_bn(w_oihw, b, gamma, beta, mean, var, eps=1e-5):
    """torch conv (Cout,Cin,5,5) + bias + eval-mode BN -> (5,5,Cin,Cout) taps + bias."""
    scale = gamma / jnp.sqrt(var + eps)                              # (Cout,)
    w = jnp.transpose(w_oihw, (2, 3, 1, 0)) * scale                  # fold BN scale into W
    bias = scale * (b - mean) + beta                                 # folded bias
    return w, bias


def _banded_conv_params(w_kkco, bias, W, dtype=jnp.bfloat16):
    """Build banded matmul weights: (2 parities, 5 ky, Wp*Cin, Wo*Cout) + lane-tiled bias.
       band[p,ky, (2*wo+p+kx)*C + c, wo*Cout + co] = w[ky,kx,c,co]; zeros elsewhere."""
    Ky, Kx, C, Cout = w_kkco.shape
    Wp, Wo = W + Ky - 1, W // 2
    wnp = np.asarray(w_kkco, dtype=np.float32)
    band = np.zeros((2, Ky, Wp, C, Wo, Cout), np.float32)
    for par in range(2):
        for kx in range(Kx):
            for wo in range(Wo):
                band[par, :, 2 * wo + par + kx, :, wo, :] = wnp[:, kx]
    band = band.reshape(2, Ky, Wp * C, Wo * Cout)
    bias_lane = jnp.tile(bias.astype(jnp.float32), (Wo,)).reshape(1, Wo * Cout)
    return jnp.asarray(band).astype(dtype), bias_lane


def make_params(key):
    ks = jax.random.split(key, 16)
    p = {}
    # layer1: Conv2d(3, 16, 5, padding=2) + BatchNorm2d(16)   (BN in inference mode)
    w1 = 0.05 * jax.random.normal(ks[0], (16, 3, 5, 5), jnp.float32)
    b1 = 0.05 * jax.random.normal(ks[1], (16,), jnp.float32)
    g1 = 1.0 + 0.1 * jax.random.normal(ks[2], (16,), jnp.float32)
    be1 = 0.1 * jax.random.normal(ks[3], (16,), jnp.float32)
    m1 = 0.1 * jax.random.normal(ks[4], (16,), jnp.float32)
    v1 = 1.0 + 0.1 * jax.random.uniform(ks[5], (16,), jnp.float32)
    wt1, bf1 = _fold_conv_bn(w1, b1, g1, be1, m1, v1)
    p["band1"], p["bias1"] = _banded_conv_params(wt1, bf1, W=32)
    # layer2: Conv2d(16, 32, 5, padding=2) + BatchNorm2d(32)
    w2 = 0.05 * jax.random.normal(ks[6], (32, 16, 5, 5), jnp.float32)
    b2 = 0.05 * jax.random.normal(ks[7], (32,), jnp.float32)
    g2 = 1.0 + 0.1 * jax.random.normal(ks[8], (32,), jnp.float32)
    be2 = 0.1 * jax.random.normal(ks[9], (32,), jnp.float32)
    m2 = 0.1 * jax.random.normal(ks[10], (32,), jnp.float32)
    v2 = 1.0 + 0.1 * jax.random.uniform(ks[11], (32,), jnp.float32)
    wt2, bf2 = _fold_conv_bn(w2, b2, g2, be2, m2, v2)
    p["band2"], p["bias2"] = _banded_conv_params(wt2, bf2, W=16)
    # FC layers (torch layout (out, in)).  fc1 rows permuted CHW->HWC so the NHWC
    # flatten feeds it directly; all FC output dims zero-padded to 128 lanes.
    fc1_w = 0.05 * jax.random.normal(ks[12], (120, 32 * 8 * 8), jnp.float32)
    fc2_w = 0.05 * jax.random.normal(ks[13], (84, 120), jnp.float32)
    fc3_w = 0.05 * jax.random.normal(ks[14], (10, 84), jnp.float32)
    fc_b = 0.05 * jax.random.normal(ks[15], (120 + 84 + 10,), jnp.float32)
    w1t = fc1_w.T.reshape(32, 8, 8, 120)                             # rows = (c, h, w)
    fc1 = jnp.transpose(w1t, (1, 2, 0, 3)).reshape(8 * 8 * 32, 120)  # rows = (h, w, c)
    p["fc1_w"] = jnp.pad(fc1, ((0, 0), (0, 8))).astype(jnp.bfloat16)         # (2048,128)
    p["fc1_b"] = jnp.pad(fc_b[:120], (0, 8)).reshape(1, 128)
    p["fc2_w"] = jnp.pad(fc2_w.T, ((0, 8), (0, 44))).astype(jnp.bfloat16)    # (128,128)
    p["fc2_b"] = jnp.pad(fc_b[120:204], (0, 44)).reshape(1, 128)
    p["fc3_w"] = jnp.pad(fc3_w.T, ((0, 44), (0, 118))).astype(jnp.bfloat16)  # (128,128)
    p["fc3_b"] = jnp.pad(fc_b[204:], (0, 118)).reshape(1, 128)
    return p


# ---------------------------------------------------------------------------
# Forward pass (matches PyTorch Net.forward, BN in eval mode)
# ---------------------------------------------------------------------------
@jax.jit
def net_forward(x_nchw, params):
    B = x_nchw.shape[0]
    x = jnp.transpose(x_nchw, (0, 2, 3, 1)).astype(jnp.float32)        # NCHW -> NHWC
    q1 = conv_bn_relu_pool(x, params["band1"], params["bias1"])        # (B, 16, 16*16)
    q1 = q1.reshape(B, 16, 16, 16)                                     # NHWC view (free)
    q2 = conv_bn_relu_pool(q1, params["band2"], params["bias2"])       # (B, 8, 8*32)
    flat = q2.reshape(B, 8 * 8 * 32)                                   # HWC flatten (free)
    return fc_head(flat, params)                                       # (B, 10)


if __name__ == "__main__":
    # TODO(synk): BatchNorm is implemented in eval mode (running stats folded into conv).
    key = jax.random.PRNGKey(0)
    k_x, k_p = jax.random.split(key)
    x = jax.random.normal(k_x, (2, 3, 32, 32), jnp.float32)            # NCHW like PyTorch
    params = make_params(k_p)

    out = jax.block_until_ready(net_forward(x, params))
    assert out.shape == (2, 10) and out.dtype == jnp.float32
    print("KERNEL_OK")
</pallas_src>

<mosaic_0001>
module attributes {stable_mosaic.version = 11 : i64} {
  func.func @_conv_bn_relu_pool_kernel(%arg0: i32, %arg1: memref<1x36x108xf32, #tpu.memory_space<vmem>>, %arg2: memref<2x5x108x256xbf16, #tpu.memory_space<vmem>>, %arg3: memref<1x256xf32, #tpu.memory_space<vmem>>, %arg4: memref<1x16x256xf32, #tpu.memory_space<vmem>>, %arg5: memref<32x256xf32, #tpu.memory_space<vmem>>) attributes {dimension_semantics = [#tpu.dimension_semantics<parallel>], iteration_bounds = array<i64: 2>, scalar_prefetch = 0 : i64, scratch_operands = 1 : i64, tpu.core_type = #tpu.core_type<tc>, window_params = [{transform_indices = @transform_0, window_bounds = array<i64: 1, 36, 108>}, {pipeline_mode = #tpu.pipeline_mode<synchronous>, transform_indices = @transform_1, window_bounds = array<i64: 2, 5, 108, 256>}, {pipeline_mode = #tpu.pipeline_mode<synchronous>, transform_indices = @transform_2, window_bounds = array<i64: 1, 256>}, {transform_indices = @transform_3, window_bounds = array<i64: 1, 16, 256>}]} {
    %cst = arith.constant 0.000000e+00 : f32
    %0 = vector.broadcast %cst : f32 to vector<32x256xf32>
    %c0 = arith.constant 0 : index
    %c0_0 = arith.constant 0 : index
    %c0_1 = arith.constant 0 : index
    %1 = vector.load %arg1[%c0, %c0_0, %c0_1] : memref<1x36x108xf32, #tpu.memory_space<vmem>>, vector<1x32x108xf32>
    %2 = vector.shape_cast %1 : vector<1x32x108xf32> to vector<32x108xf32>
    %3 = arith.truncf %2 : vector<32x108xf32> to vector<32x108xbf16>
    %c0_2 = arith.constant 0 : index
    %c0_3 = arith.constant 0 : index
    %c0_4 = arith.constant 0 : index
    %c0_5 = arith.constant 0 : index
    %4 = vector.load %arg2[%c0_2, %c0_3, %c0_4, %c0_5] : memref<2x5x108x256xbf16, #tpu.memory_space<vmem>>, vector<1x1x108x256xbf16>
    %5 = vector.shape_cast %4 : vector<1x1x108x256xbf16> to vector<108x256xbf16>
    %cst_6 = arith.constant dense<0.000000e+00> : vector<32x256xf32>
    %6 = tpu.matmul %3, %5, %cst_6 {dimension_numbers = #tpu.dot_dimension_numbers<[1], [0], [0], [1], [0, 0, 1, 1], [], []>} : vector<32x108xbf16>, vector<108x256xbf16>, vector<32x256xf32> -> vector<32x256xf32>
    %7 = arith.addf %0, %6 : vector<32x256xf32>
    %c0_7 = arith.constant 0 : index
    %c1 = arith.constant 1 : index
    %c0_8 = arith.constant 0 : index
    %8 = vector.load %arg1[%c0_7, %c1, %c0_8] : memref<1x36x108xf32, #tpu.memory_space<vmem>>, vector<1x32x108xf32>
    %9 = vector.shape_cast %8 : vector<1x32x108xf32> to vector<32x108xf32>
    %10 = arith.truncf %9 : vector<32x108xf32> to vector<32x108xbf16>
    %c0_9 = arith.constant 0 : index
    %c1_10 = arith.constant 1 : index
    %c0_11 = arith.constant 0 : index
    %c0_12 = arith.constant 0 : index
    %11 = vector.load %arg2[%c0_9, %c1_10, %c0_11, %c0_12] : memref<2x5x108x256xbf16, #tpu.memory_space<vmem>>, vector<1x1x108x256xbf16>
    %12 = vector.shape_cast %11 : vector<1x1x108x256xbf16> to vector<108x256xbf16>
    %cst_13 = arith.constant dense<0.000000e+00> : vector<32x256xf32>
    %13 = tpu.matmul %10, %12, %cst_13 {dimension_numbers = #tpu.dot_dimension_numbers<[1], [0], [0], [1], [0, 0, 1, 1], [], []>} : vector<32x108xbf16>, vector<108x256xbf16>, vector<32x256xf32> -> vector<32x256xf32>
    %14 = arith.addf %7, %13 : vector<32x256xf32>
    %c0_14 = arith.constant 0 : index
    %c2 = arith.constant 2 : index
    %c0_15 = arith.constant 0 : index
    %15 = vector.load %arg1[%c0_14, %c2, %c0_15] : memref<1x36x108xf32, #tpu.memory_space<vmem>>, vector<1x32x108xf32>
    %16 = vector.shape_cast %15 : vector<1x32x108xf32> to vector<32x108xf32>
    %17 = arith.truncf %16 : vector<32x108xf32> to vector<32x108xbf16>
    %c0_16 = arith.constant 0 : index
    %c2_17 = arith.constant 2 : index
    %c0_18 = arith.constant 0 : index
    %c0_19 = arith.constant 0 : index
    %18 = vector.load %arg2[%c0_16, %c2_17, %c0_18, %c0_19] : memref<2x5x108x256xbf16, #tpu.memory_space<vmem>>, vector<1x1x108x256xbf16>
    %19 = vector.shape_cast %18 : vector<1x1x108x256xbf16> to vector<108x256xbf16>
    %cst_20 = arith.constant dense<0.000000e+00> : vector<32x256xf32>
    %20 = tpu.matmul %17, %19, %cst_20 {dimension_numbers = #tpu.dot_dimension_numbers<[1], [0], [0], [1], [0, 0, 1, 1], [], []>} : vector<32x108xbf16>, vector<108x256xbf16>, vector<32x256xf32> -> vector<32x256xf32>
    %21 = arith.addf %14, %20 : vector<32x256xf32>
    %c0_21 = arith.constant 0 : index
    %c3 = arith.constant 3 : index
    %c0_22 = arith.constant 0 : index
    %22 = vector.load %arg1[%c0_21, %c3, %c0_22] : memref<1x36x108xf32, #tpu.memory_space<vmem>>, vector<1x32x108xf32>
    %23 = vector.shape_cast %22 : vector<1x32x108xf32> to vector<32x108xf32>
    %24 = arith.truncf %23 : vector<32x108xf32> to vector<32x108xbf16>
    %c0_23 = arith.constant 0 : index
    %c3_24 = arith.constant 3 : index
    %c0_25 = arith.constant 0 : index
    %c0_26 = arith.constant 0 : index
    %25 = vector.load %arg2[%c0_23, %c3_24, %c0_25, %c0_26] : memref<2x5x108x256xbf16, #tpu.memory_space<vmem>>, vector<1x1x108x256xbf16>
    %26 = vector.shape_cast %25 : vector<1x1x108x256xbf16> to vector<108x256xbf16>
    %cst_27 = arith.constant dense<0.000000e+00> : vector<32x256xf32>
    %27 = tpu.matmul %24, %26, %cst_27 {dimension_numbers = #tpu.dot_dimension_numbers<[1], [0], [0], [1], [0, 0, 1, 1], [], []>} : vector<32x108xbf16>, vector<108x256xbf16>, vector<32x256xf32> -> vector<32x256xf32>
    %28 = arith.addf %21, %27 : vector<32x256xf32>
    %c0_28 = arith.constant 0 : index
    %c4 = arith.constant 4 : index
    %c0_29 = arith.constant 0 : index
    %29 = vector.load %arg1[%c0_28, %c4, %c0_29] : memref<1x36x108xf32, #tpu.memory_space<vmem>>, vector<1x32x108xf32>
    %30 = vector.shape_cast %29 : vector<1x32x108xf32> to vector<32x108xf32>
    %31 = arith.truncf %30 : vector<32x108xf32> to vector<32x108xbf16>
    %c0_30 = arith.constant 0 : index
    %c4_31 = arith.constant 4 : index
    %c0_32 = arith.constant 0 : index
    %c0_33 = arith.constant 0 : index
    %32 = vector.load %arg2[%c0_30, %c4_31, %c0_32, %c0_33] : memref<2x5x108x256xbf16, #tpu.memory_space<vmem>>, vector<1x1x108x256xbf16>
    %33 = vector.shape_cast %32 : vector<1x1x108x256xbf16> to vector<108x256xbf16>
    %cst_34 = arith.constant dense<0.000000e+00> : vector<32x256xf32>
    %34 = tpu.matmul %31, %33, %cst_34 {dimension_numbers = #tpu.dot_dimension_numbers<[1], [0], [0], [1], [0, 0, 1, 1], [], []>} : vector<32x108xbf16>, vector<108x256xbf16>, vector<32x256xf32> -> vector<32x256xf32>
    %35 = arith.addf %28, %34 : vector<32x256xf32>
    %c0_35 = arith.constant 0 : index
    %c0_36 = arith.constant 0 : index
    %36 = vector.load %arg5[%c0_35, %c0_36] : memref<32x256xf32, #tpu.memory_space<vmem>>, vector<32x256xf32>
    tpu.vector_store %arg5[%c0_35, %c0_36], %35 {strides = array<i32>} : memref<32x256xf32, #tpu.memory_space<vmem>>, vector<32x256xf32>,
    %cst_37 = arith.constant 0.000000e+00 : f32
    %37 = vector.broadcast %cst_37 : f32 to vector<32x256xf32>
    %c0_38 = arith.constant 0 : index
    %c0_39 = arith.constant 0 : index
    %c0_40 = arith.constant 0 : index
    %38 = vector.load %arg1[%c0_38, %c0_39, %c0_40] : memref<1x36x108xf32, #tpu.memory_space<vmem>>, vector<1x32x108xf32>
    %39 = vector.shape_cast %38 : vector<1x32x108xf32> to vector<32x108xf32>
    %40 = arith.truncf %39 : vector<32x108xf32> to vector<32x108xbf16>
    %c1_41 = arith.constant 1 : index
    %c0_42 = arith.constant 0 : index
    %c0_43 = arith.constant 0 : index
    %c0_44 = arith.constant 0 : index
    %41 = vector.load %arg2[%c1_41, %c0_42, %c0_43, %c0_44] : memref<2x5x108x256xbf16, #tpu.memory_space<vmem>>, vector<1x1x108x256xbf16>
    %42 = vector.shape_cast %41 : vector<1x1x108x256xbf16> to vector<108x256xbf16>
    %cst_45 = arith.constant dense<0.000000e+00> : vector<32x256xf32>
    %43 = tpu.matmul %40, %42, %cst_45 {dimension_numbers = #tpu.dot_dimension_numbers<[1], [0], [0], [1], [0, 0, 1, 1], [], []>} : vector<32x108xbf16>, vector<108x256xbf16>, vector<32x256xf32> -> vector<32x256xf32>
    %44 = arith.addf %37, %43 : vector<32x256xf32>
    %c0_46 = arith.constant 0 : index
    %c1_47 = arith.constant 1 : index
    %c0_48 = arith.constant 0 : index
    %45 = vector.load %arg1[%c0_46, %c1_47, %c0_48] : memref<1x36x108xf32, #tpu.memory_space<vmem>>, vector<1x32x108xf32>
    %46 = vector.shape_cast %45 : vector<1x32x108xf32> to vector<32x108xf32>
    %47 = arith.truncf %46 : vector<32x108xf32> to vector<32x108xbf16>
    %c1_49 = arith.constant 1 : index
    %c1_50 = arith.constant 1 : index
    %c0_51 = arith.constant 0 : index
    %c0_52 = arith.constant 0 : index
    %48 = vector.load %arg2[%c1_49, %c1_50, %c0_51, %c0_52] : memref<2x5x108x256xbf16, #tpu.memory_space<vmem>>, vector<1x1x108x256xbf16>
    %49 = vector.shape_cast %48 : vector<1x1x108x256xbf16> to vector<108x256xbf16>
    %cst_53 = arith.constant dense<0.000000e+00> : vector<32x256xf32>
    %50 = tpu.matmul %47, %49, %cst_53 {dimension_numbers = #tpu.dot_dimension_numbers<[1], [0], [0], [1], [0, 0, 1, 1], [], []>} : vector<32x108xbf16>, vector<108x256xbf16>, vector<32x256xf32> -> vector<32x256xf32>
    %51 = arith.addf %44, %50 : vector<32x256xf32>
    %c0_54 = arith.constant 0 : index
    %c2_55 = arith.constant 2 : index
    %c0_56 = arith.constant 0 : index
    %52 = vector.load %arg1[%c0_54, %c2_55, %c0_56] : memref<1x36x108xf32, #tpu.memory_space<vmem>>, vector<1x32x108xf32>
    %53 = vector.shape_cast %52 : vector<1x32x108xf32> to vector<32x108xf32>
    %54 = arith.truncf %53 : vector<32x108xf32> to vector<32x108xbf16>
    %c1_57 = arith.constant 1 : index
    %c2_58 = arith.constant 2 : index
    %c0_59 = arith.constant 0 : index
    %c0_60 = arith.constant 0 : index
    %55 = vector.load %arg2[%c1_57, %c2_58, %c0_59, %c0_60] : memref<2x5x108x256xbf16, #tpu.memory_space<vmem>>, vector<1x1x108x256xbf16>
    %56 = vector.shape_cast %55 : vector<1x1x108x256xbf16> to vector<108x256xbf16>
    %cst_61 = arith.constant dense<0.000000e+00> : vector<32x256xf32>
    %57 = tpu.matmul %54, %56, %cst_61 {dimension_numbers = #tpu.dot_dimension_numbers<[1], [0], [0], [1], [0, 0, 1, 1], [], []>} : vector<32x108xbf16>, vector<108x256xbf16>, vector<32x256xf32> -> vector<32x256xf32>
    %58 = arith.addf %51, %57 : vector<32x256xf32>
    %c0_62 = arith.constant 0 : index
    %c3_63 = arith.constant 3 : index
    %c0_64 = arith.constant 0 : index
    %59 = vector.load %arg1[%c0_62, %c3_63, %c0_64] : memref<1x36x108xf32, #tpu.memory_space<vmem>>, vector<1x32x108xf32>
    %60 = vector.shape_cast %59 : vector<1x32x108xf32> to vector<32x108xf32>
    %61 = arith.truncf %60 : vector<32x108xf32> to vector<32x108xbf16>
    %c1_65 = arith.constant 1 : index
    %c3_66 = arith.constant 3 : index
    %c0_67 = arith.constant 0 : index
    %c0_68 = arith.constant 0 : index
    %62 = vector.load %arg2[%c1_65, %c3_66, %c0_67, %c0_68] : memref<2x5x108x256xbf16, #tpu.memory_space<vmem>>, vector<1x1x108x256xbf16>
    %63 = vector.shape_cast %62 : vector<1x1x108x256xbf16> to vector<108x256xbf16>
    %cst_69 = arith.constant dense<0.000000e+00> : vector<32x256xf32>
    %64 = tpu.matmul %61, %63, %cst_69 {dimension_numbers = #tpu.dot_dimension_numbers<[1], [0], [0], [1], [0, 0, 1, 1], [], []>} : vector<32x108xbf16>, vector<108x256xbf16>, vector<32x256xf32> -> vector<32x256xf32>
    %65 = arith.addf %58, %64 : vector<32x256xf32>
    %c0_70 = arith.constant 0 : index
    %c4_71 = arith.constant 4 : index
    %c0_72 = arith.constant 0 : index
    %66 = vector.load %arg1[%c0_70, %c4_71, %c0_72] : memref<1x36x108xf32, #tpu.memory_space<vmem>>, vector<1x32x108xf32>
    %67 = vector.shape_cast %66 : vector<1x32x108xf32> to vector<32x108xf32>
    %68 = arith.truncf %67 : vector<32x108xf32> to vector<32x108xbf16>
    %c1_73 = arith.constant 1 : index
    %c4_74 = arith.constant 4 : index
    %c0_75 = arith.constant 0 : index
    %c0_76 = arith.constant 0 : index
    %69 = vector.load %arg2[%c1_73, %c4_74, %c0_75, %c0_76] : memref<2x5x108x256xbf16, #tpu.memory_space<vmem>>, vector<1x1x108x256xbf16>
    %70 = vector.shape_cast %69 : vector<1x1x108x256xbf16> to vector<108x256xbf16>
    %cst_77 = arith.constant dense<0.000000e+00> : vector<32x256xf32>
    %71 = tpu.matmul %68, %70, %cst_77 {dimension_numbers = #tpu.dot_dimension_numbers<[1], [0], [0], [1], [0, 0, 1, 1], [], []>} : vector<32x108xbf16>, vector<108x256xbf16>, vector<32x256xf32> -> vector<32x256xf32>
    %72 = arith.addf %65, %71 : vector<32x256xf32>
    %c0_78 = arith.constant 0 : index
    %c0_79 = arith.constant 0 : index
    %73 = vector.load %arg5[%c0_78, %c0_79] : memref<32x256xf32, #tpu.memory_space<vmem>>, vector<32x256xf32>
    %74 = arith.maximumf %73, %72 : vector<32x256xf32>
    %75 = vector.shape_cast %74 : vector<32x256xf32> to vector<1x16x2x256xf32>
    %76 = vector.extract_strided_slice %75 {offsets = [0, 0, 0, 0], sizes = [1, 16, 1, 256], strides = [1, 1, 1, 1]} : vector<1x16x2x256xf32> to vector<1x16x1x256xf32>
    %77 = vector.shape_cast %76 : vector<1x16x1x256xf32> to vector<1x16x256xf32>
    %78 = vector.extract_strided_slice %75 {offsets = [0, 0, 1, 0], sizes = [1, 16, 1, 256], strides = [1, 1, 1, 1]} : vector<1x16x2x256xf32> to vector<1x16x1x256xf32>
    %79 = vector.shape_cast %78 : vector<1x16x1x256xf32> to vector<1x16x256xf32>
    %80 = arith.maximumf %77, %79 : vector<1x16x256xf32>
    %c0_80 = arith.constant 0 : index
    %c0_81 = arith.constant 0 : index
    %81 = vector.load %arg3[%c0_80, %c0_81] : memref<1x256xf32, #tpu.memory_space<vmem>>, vector<1x256xf32>
    %82 = vector.shape_cast %81 : vector<1x256xf32> to vector<1x1x256xf32>
    %83 = vector.broadcast %82 : vector<1x1x256xf32> to vector<1x16x256xf32>
    %84 = arith.addf %80, %83 : vector<1x16x256xf32>
    %cst_82 = arith.constant 0.000000e+00 : f32
    %85 = vector.broadcast %cst_82 : f32 to vector<1x16x256xf32>
    %86 = arith.maximumf %84, %85 : vector<1x16x256xf32>
    %c0_83 = arith.constant 0 : index
    %c0_84 = arith.constant 0 : index
    %c0_85 = arith.constant 0 : index
    %87 = vector.load %arg4[%c0_83, %c0_84, %c0_85] : memref<1x16x256xf32, #tpu.memory_space<vmem>>, vector<1x16x256xf32>
    tpu.vector_store %arg4[%c0_83, %c0_84, %c0_85], %86 {strides = array<i32>} : memref<1x16x256xf32, #tpu.memory_space<vmem>>, vector<1x16x256xf32>,
    return
  }
  func.func @transform_0(%arg0: i32) -> (i32, i32, i32) {
    %c0_i32 = arith.constant 0 : i32
    %c0_i32_0 = arith.constant 0 : i32
    %c0_i32_1 = arith.constant 0 : i32
    return %arg0, %c0_i32, %c0_i32_0 : i32, i32, i32
  }
  func.func @transform_1(%arg0: i32) -> (i32, i32, i32, i32) {
    %c0_i32 = arith.constant 0 : i32
    %c0_i32_0 = arith.constant 0 : i32
    %c0_i32_1 = arith.constant 0 : i32
    %c0_i32_2 = arith.constant 0 : i32
    %c0_i32_3 = arith.constant 0 : i32
    return %c0_i32, %c0_i32_0, %c0_i32_1, %c0_i32_2 : i32, i32, i32, i32
  }
  func.func @transform_2(%arg0: i32) -> (i32, i32) {
    %c0_i32 = arith.constant 0 : i32
    %c0_i32_0 = arith.constant 0 : i32
    %c0_i32_1 = arith.constant 0 : i32
    return %c0_i32, %c0_i32_0 : i32, i32
  }
  func.func @transform_3(%arg0: i32) -> (i32, i32, i32) {
    %c0_i32 = arith.constant 0 : i32
    %c0_i32_0 = arith.constant 0 : i32
    %c0_i32_1 = arith.constant 0 : i32
    return %arg0, %c0_i32, %c0_i32_0 : i32, i32, i32
  }
}

module attributes {stable_mosaic.version = 11 : i64} {
  func.func @_conv_bn_relu_pool_kernel(%arg0: i32, %arg1: memref<1x20x320xf32, #tpu.memory_space<vmem>>, %arg2: memref<2x5x320x256xbf16, #tpu.memory_space<vmem>>, %arg3: memref<1x256xf32, #tpu.memory_space<vmem>>, %arg4: memref<1x8x256xf32, #tpu.memory_space<vmem>>, %arg5: memref<16x256xf32, #tpu.memory_space<vmem>>) attributes {dimension_semantics = [#tpu.dimension_semantics<parallel>], iteration_bounds = array<i64: 2>, scalar_prefetch = 0 : i64, scratch_operands = 1 : i64, tpu.core_type = #tpu.core_type<tc>, window_params = [{transform_indices = @transform_0, window_bounds = array<i64: 1, 20, 320>}, {pipeline_mode = #tpu.pipeline_mode<synchronous>, transform_indices = @transform_1, window_bounds = array<i64: 2, 5, 320, 256>}, {pipeline_mode = #tpu.pipeline_mode<synchronous>, transform_indices = @transform_2, window_bounds = array<i64: 1, 256>}, {transform_indices = @transform_3, window_bounds = array<i64: 1, 8, 256>}]} {
    %cst = arith.constant 0.000000e+00 : f32
    %0 = vector.broadcast %cst : f32 to vector<16x256xf32>
    %c0 = arith.constant 0 : index
    %c0_0 = arith.constant 0 : index
    %c0_1 = arith.constant 0 : index
    %1 = vector.load %arg1[%c0, %c0_0, %c0_1] : memref<1x20x320xf32, #tpu.memory_space<vmem>>, vector<1x16x320xf32>
    %2 = vector.shape_cast %1 : vector<1x16x320xf32> to vector<16x320xf32>
    %3 = arith.truncf %2 : vector<16x320xf32> to vector<16x320xbf16>
    %c0_2 = arith.constant 0 : index
    %c0_3 = arith.constant 0 : index
    %c0_4 = arith.constant 0 : index
    %c0_5 = arith.constant 0 : index
    %4 = vector.load %arg2[%c0_2, %c0_3, %c0_4, %c0_5] : memref<2x5x320x256xbf16, #tpu.memory_space<vmem>>, vector<1x1x320x256xbf16>
    %5 = vector.shape_cast %4 : vector<1x1x320x256xbf16> to vector<320x256xbf16>
    %cst_6 = arith.constant dense<0.000000e+00> : vector<16x256xf32>
    %6 = tpu.matmul %3, %5, %cst_6 {dimension_numbers = #tpu.dot_dimension_numbers<[1], [0], [0], [1], [0, 0, 1, 1], [], []>} : vector<16x320xbf16>, vector<320x256xbf16>, vector<16x256xf32> -> vector<16x256xf32>
    %7 = arith.addf %0, %6 : vector<16x256xf32>
    %c0_7 = arith.constant 0 : index
    %c1 = arith.constant 1 : index
    %c0_8 = arith.constant 0 : index
    %8 = vector.load %arg1[%c0_7, %c1, %c0_8] : memref<1x20x320xf32, #tpu.memory_space<vmem>>, vector<1x16x320xf32>
    %9 = vector.shape_cast %8 : vector<1x16x320xf32> to vector<16x320xf32>
    %10 = arith.truncf %9 : vector<16x320xf32> to vector<16x320xbf16>
    %c0_9 = arith.constant 0 : index
    %c1_10 = arith.constant 1 : index
    %c0_11 = arith.constant 0 : index
    %c0_12 = arith.constant 0 : index
    %11 = vector.load %arg2[%c0_9, %c1_10, %c0_11, %c0_12] : memref<2x5x320x256xbf16, #tpu.memory_space<vmem>>, vector<1x1x320x256xbf16>
    %12 = vector.shape_cast %11 : vector<1x1x320x256xbf16> to vector<320x256xbf16>
    %cst_13 = arith.constant dense<0.000000e+00> : vector<16x256xf32>
    %13 = tpu.matmul %10, %12, %cst_13 {dimension_numbers = #tpu.dot_dimension_numbers<[1], [0], [0], [1], [0, 0, 1, 1], [], []>} : vector<16x320xbf16>, vector<320x256xbf16>, vector<16x256xf32> -> vector<16x256xf32>
    %14 = arith.addf %7, %13 : vector<16x256xf32>
    %c0_14 = arith.constant 0 : index
    %c2 = arith.constant 2 : index
    %c0_15 = arith.constant 0 : index
    %15 = vector.load %arg1[%c0_14, %c2, %c0_15] : memref<1x20x320xf32, #tpu.memory_space<vmem>>, vector<1x16x320xf32>
    %16 = vector.shape_cast %15 : vector<1x16x320xf32> to vector<16x320xf32>
    %17 = arith.truncf %16 : vector<16x320xf32> to vector<16x320xbf16>
    %c0_16 = arith.constant 0 : index
    %c2_17 = arith.constant 2 : index
    %c0_18 = arith.constant 0 : index
    %c0_19 = arith.constant 0 : index
    %18 = vector.load %arg2[%c0_16, %c2_17, %c0_18, %c0_19] : memref<2x5x320x256xbf16, #tpu.memory_space<vmem>>, vector<1x1x320x256xbf16>
    %19 = vector.shape_cast %18 : vector<1x1x320x256xbf16> to vector<320x256xbf16>
    %cst_20 = arith.constant dense<0.000000e+00> : vector<16x256xf32>
    %20 = tpu.matmul %17, %19, %cst_20 {dimension_numbers = #tpu.dot_dimension_numbers<[1], [0], [0], [1], [0, 0, 1, 1], [], []>} : vector<16x320xbf16>, vector<320x256xbf16>, vector<16x256xf32> -> vector<16x256xf32>
    %21 = arith.addf %14, %20 : vector<16x256xf32>
    %c0_21 = arith.constant 0 : index
    %c3 = arith.constant 3 : index
    %c0_22 = arith.constant 0 : index
    %22 = vector.load %arg1[%c0_21, %c3, %c0_22] : memref<1x20x320xf32, #tpu.memory_space<vmem>>, vector<1x16x320xf32>
    %23 = vector.shape_cast %22 : vector<1x16x320xf32> to vector<16x320xf32>
    %24 = arith.truncf %23 : vector<16x320xf32> to vector<16x320xbf16>
    %c0_23 = arith.constant 0 : index
    %c3_24 = arith.constant 3 : index
    %c0_25 = arith.constant 0 : index
    %c0_26 = arith.constant 0 : index
    %25 = vector.load %arg2[%c0_23, %c3_24, %c0_25, %c0_26] : memref<2x5x320x256xbf16, #tpu.memory_space<vmem>>, vector<1x1x320x256xbf16>
    %26 = vector.shape_cast %25 : vector<1x1x320x256xbf16> to vector<320x256xbf16>
    %cst_27 = arith.constant dense<0.000000e+00> : vector<16x256xf32>
    %27 = tpu.matmul %24, %26, %cst_27 {dimension_numbers = #tpu.dot_dimension_numbers<[1], [0], [0], [1], [0, 0, 1, 1], [], []>} : vector<16x320xbf16>, vector<320x256xbf16>, vector<16x256xf32> -> vector<16x256xf32>
    %28 = arith.addf %21, %27 : vector<16x256xf32>
    %c0_28 = arith.constant 0 : index
    %c4 = arith.constant 4 : index
    %c0_29 = arith.constant 0 : index
    %29 = vector.load %arg1[%c0_28, %c4, %c0_29] : memref<1x20x320xf32, #tpu.memory_space<vmem>>, vector<1x16x320xf32>
    %30 = vector.shape_cast %29 : vector<1x16x320xf32> to vector<16x320xf32>
    %31 = arith.truncf %30 : vector<16x320xf32> to vector<16x320xbf16>
    %c0_30 = arith.constant 0 : index
    %c4_31 = arith.constant 4 : index
    %c0_32 = arith.constant 0 : index
    %c0_33 = arith.constant 0 : index
    %32 = vector.load %arg2[%c0_30, %c4_31, %c0_32, %c0_33] : memref<2x5x320x256xbf16, #tpu.memory_space<vmem>>, vector<1x1x320x256xbf16>
    %33 = vector.shape_cast %32 : vector<1x1x320x256xbf16> to vector<320x256xbf16>
    %cst_34 = arith.constant dense<0.000000e+00> : vector<16x256xf32>
    %34 = tpu.matmul %31, %33, %cst_34 {dimension_numbers = #tpu.dot_dimension_numbers<[1], [0], [0], [1], [0, 0, 1, 1], [], []>} : vector<16x320xbf16>, vector<320x256xbf16>, vector<16x256xf32> -> vector<16x256xf32>
    %35 = arith.addf %28, %34 : vector<16x256xf32>
    %c0_35 = arith.constant 0 : index
    %c0_36 = arith.constant 0 : index
    %36 = vector.load %arg5[%c0_35, %c0_36] : memref<16x256xf32, #tpu.memory_space<vmem>>, vector<16x256xf32>
    tpu.vector_store %arg5[%c0_35, %c0_36], %35 {strides = array<i32>} : memref<16x256xf32, #tpu.memory_space<vmem>>, vector<16x256xf32>,
    %cst_37 = arith.constant 0.000000e+00 : f32
    %37 = vector.broadcast %cst_37 : f32 to vector<16x256xf32>
    %c0_38 = arith.constant 0 : index
    %c0_39 = arith.constant 0 : index
    %c0_40 = arith.constant 0 : index
    %38 = vector.load %arg1[%c0_38, %c0_39, %c0_40] : memref<1x20x320xf32, #tpu.memory_space<vmem>>, vector<1x16x320xf32>
    %39 = vector.shape_cast %38 : vector<1x16x320xf32> to vector<16x320xf32>
    %40 = arith.truncf %39 : vector<16x320xf32> to vector<16x320xbf16>
    %c1_41 = arith.constant 1 : index
    %c0_42 = arith.constant 0 : index
    %c0_43 = arith.constant 0 : index
    %c0_44 = arith.constant 0 : index
    %41 = vector.load %arg2[%c1_41, %c0_42, %c0_43, %c0_44] : memref<2x5x320x256xbf16, #tpu.memory_space<vmem>>, vector<1x1x320x256xbf16>
    %42 = vector.shape_cast %41 : vector<1x1x320x256xbf16> to vector<320x256xbf16>
    %cst_45 = arith.constant dense<0.000000e+00> : vector<16x256xf32>
    %43 = tpu.matmul %40, %42, %cst_45 {dimension_numbers = #tpu.dot_dimension_numbers<[1], [0], [0], [1], [0, 0, 1, 1], [], []>} : vector<16x320xbf16>, vector<320x256xbf16>, vector<16x256xf32> -> vector<16x256xf32>
    %44 = arith.addf %37, %43 : vector<16x256xf32>
    %c0_46 = arith.constant 0 : index
    %c1_47 = arith.constant 1 : index
    %c0_48 = arith.constant 0 : index
    %45 = vector.load %arg1[%c0_46, %c1_47, %c0_48] : memref<1x20x320xf32, #tpu.memory_space<vmem>>, vector<1x16x320xf32>
    %46 = vector.shape_cast %45 : vector<1x16x320xf32> to vector<16x320xf32>
    %47 = arith.truncf %46 : vector<16x320xf32> to vector<16x320xbf16>
    %c1_49 = arith.constant 1 : index
    %c1_50 = arith.constant 1 : index
    %c0_51 = arith.constant 0 : index
    %c0_52 = arith.constant 0 : index
    %48 = vector.load %arg2[%c1_49, %c1_50, %c0_51, %c0_52] : memref<2x5x320x256xbf16, #tpu.memory_space<vmem>>, vector<1x1x320x256xbf16>
    %49 = vector.shape_cast %48 : vector<1x1x320x256xbf16> to vector<320x256xbf16>
    %cst_53 = arith.constant dense<0.000000e+00> : vector<16x256xf32>
    %50 = tpu.matmul %47, %49, %cst_53 {dimension_numbers = #tpu.dot_dimension_numbers<[1], [0], [0], [1], [0, 0, 1, 1], [], []>} : vector<16x320xbf16>, vector<320x256xbf16>, vector<16x256xf32> -> vector<16x256xf32>
    %51 = arith.addf %44, %50 : vector<16x256xf32>
    %c0_54 = arith.constant 0 : index
    %c2_55 = arith.constant 2 : index
    %c0_56 = arith.constant 0 : index
    %52 = vector.load %arg1[%c0_54, %c2_55, %c0_56] : memref<1x20x320xf32, #tpu.memory_space<vmem>>, vector<1x16x320xf32>
    %53 = vector.shape_cast %52 : vector<1x16x320xf32> to vector<16x320xf32>
    %54 = arith.truncf %53 : vector<16x320xf32> to vector<16x320xbf16>
    %c1_57 = arith.constant 1 : index
    %c2_58 = arith.constant 2 : index
    %c0_59 = arith.constant 0 : index
    %c0_60 = arith.constant 0 : index
    %55 = vector.load %arg2[%c1_57, %c2_58, %c0_59, %c0_60] : memref<2x5x320x256xbf16, #tpu.memory_space<vmem>>, vector<1x1x320x256xbf16>
    %56 = vector.shape_cast %55 : vector<1x1x320x256xbf16> to vector<320x256xbf16>
    %cst_61 = arith.constant dense<0.000000e+00> : vector<16x256xf32>
    %57 = tpu.matmul %54, %56, %cst_61 {dimension_numbers = #tpu.dot_dimension_numbers<[1], [0], [0], [1], [0, 0, 1, 1], [], []>} : vector<16x320xbf16>, vector<320x256xbf16>, vector<16x256xf32> -> vector<16x256xf32>
    %58 = arith.addf %51, %57 : vector<16x256xf32>
    %c0_62 = arith.constant 0 : index
    %c3_63 = arith.constant 3 : index
    %c0_64 = arith.constant 0 : index
    %59 = vector.load %arg1[%c0_62, %c3_63, %c0_64] : memref<1x20x320xf32, #tpu.memory_space<vmem>>, vector<1x16x320xf32>
    %60 = vector.shape_cast %59 : vector<1x16x320xf32> to vector<16x320xf32>
    %61 = arith.truncf %60 : vector<16x320xf32> to vector<16x320xbf16>
    %c1_65 = arith.constant 1 : index
    %c3_66 = arith.constant 3 : index
    %c0_67 = arith.constant 0 : index
    %c0_68 = arith.constant 0 : index
    %62 = vector.load %arg2[%c1_65, %c3_66, %c0_67, %c0_68] : memref<2x5x320x256xbf16, #tpu.memory_space<vmem>>, vector<1x1x320x256xbf16>
    %63 = vector.shape_cast %62 : vector<1x1x320x256xbf16> to vector<320x256xbf16>
    %cst_69 = arith.constant dense<0.000000e+00> : vector<16x256xf32>
    %64 = tpu.matmul %61, %63, %cst_69 {dimension_numbers = #tpu.dot_dimension_numbers<[1], [0], [0], [1], [0, 0, 1, 1], [], []>} : vector<16x320xbf16>, vector<320x256xbf16>, vector<16x256xf32> -> vector<16x256xf32>
    %65 = arith.addf %58, %64 : vector<16x256xf32>
    %c0_70 = arith.constant 0 : index
    %c4_71 = arith.constant 4 : index
    %c0_72 = arith.constant 0 : index
    %66 = vector.load %arg1[%c0_70, %c4_71, %c0_72] : memref<1x20x320xf32, #tpu.memory_space<vmem>>, vector<1x16x320xf32>
    %67 = vector.shape_cast %66 : vector<1x16x320xf32> to vector<16x320xf32>
    %68 = arith.truncf %67 : vector<16x320xf32> to vector<16x320xbf16>
    %c1_73 = arith.constant 1 : index
    %c4_74 = arith.constant 4 : index
    %c0_75 = arith.constant 0 : index
    %c0_76 = arith.constant 0 : index
    %69 = vector.load %arg2[%c1_73, %c4_74, %c0_75, %c0_76] : memref<2x5x320x256xbf16, #tpu.memory_space<vmem>>, vector<1x1x320x256xbf16>
    %70 = vector.shape_cast %69 : vector<1x1x320x256xbf16> to vector<320x256xbf16>
    %cst_77 = arith.constant dense<0.000000e+00> : vector<16x256xf32>
    %71 = tpu.matmul %68, %70, %cst_77 {dimension_numbers = #tpu.dot_dimension_numbers<[1], [0], [0], [1], [0, 0, 1, 1], [], []>} : vector<16x320xbf16>, vector<320x256xbf16>, vector<16x256xf32> -> vector<16x256xf32>
    %72 = arith.addf %65, %71 : vector<16x256xf32>
    %c0_78 = arith.constant 0 : index
    %c0_79 = arith.constant 0 : index
    %73 = vector.load %arg5[%c0_78, %c0_79] : memref<16x256xf32, #tpu.memory_space<vmem>>, vector<16x256xf32>
    %74 = arith.maximumf %73, %72 : vector<16x256xf32>
    %75 = vector.shape_cast %74 : vector<16x256xf32> to vector<1x8x2x256xf32>
    %76 = vector.extract_strided_slice %75 {offsets = [0, 0, 0, 0], sizes = [1, 8, 1, 256], strides = [1, 1, 1, 1]} : vector<1x8x2x256xf32> to vector<1x8x1x256xf32>
    %77 = vector.shape_cast %76 : vector<1x8x1x256xf32> to vector<1x8x256xf32>
    %78 = vector.extract_strided_slice %75 {offsets = [0, 0, 1, 0], sizes = [1, 8, 1, 256], strides = [1, 1, 1, 1]} : vector<1x8x2x256xf32> to vector<1x8x1x256xf32>
    %79 = vector.shape_cast %78 : vector<1x8x1x256xf32> to vector<1x8x256xf32>
    %80 = arith.maximumf %77, %79 : vector<1x8x256xf32>
    %c0_80 = arith.constant 0 : index
    %c0_81 = arith.constant 0 : index
    %81 = vector.load %arg3[%c0_80, %c0_81] : memref<1x256xf32, #tpu.memory_space<vmem>>, vector<1x256xf32>
    %82 = vector.shape_cast %81 : vector<1x256xf32> to vector<1x1x256xf32>
    %83 = vector.broadcast %82 : vector<1x1x256xf32> to vector<1x8x256xf32>
    %84 = arith.addf %80, %83 : vector<1x8x256xf32>
    %cst_82 = arith.constant 0.000000e+00 : f32
    %85 = vector.broadcast %cst_82 : f32 to vector<1x8x256xf32>
    %86 = arith.maximumf %84, %85 : vector<1x8x256xf32>
    %c0_83 = arith.constant 0 : index
    %c0_84 = arith.constant 0 : index
    %c0_85 = arith.constant 0 : index
    %87 = vector.load %arg4[%c0_83, %c0_84, %c0_85] : memref<1x8x256xf32, #tpu.memory_space<vmem>>, vector<1x8x256xf32>
    tpu.vector_store %arg4[%c0_83, %c0_84, %c0_85], %86 {strides = array<i32>} : memref<1x8x256xf32, #tpu.memory_space<vmem>>, vector<1x8x256xf32>,
    return
  }
  func.func @transform_0(%arg0: i32) -> (i32, i32, i32) {
    %c0_i32 = arith.constant 0 : i32
    %c0_i32_0 = arith.constant 0 : i32
    %c0_i32_1 = arith.constant 0 : i32
    return %arg0, %c0_i32, %c0_i32_0 : i32, i32, i32
  }
  func.func @transform_1(%arg0: i32) -> (i32, i32, i32, i32) {
    %c0_i32 = arith.constant 0 : i32
    %c0_i32_0 = arith.constant 0 : i32
    %c0_i32_1 = arith.constant 0 : i32
    %c0_i32_2 = arith.constant 0 : i32
    %c0_i32_3 = arith.constant 0 : i32
    return %c0_i32, %c0_i32_0, %c0_i32_1, %c0_i32_2 : i32, i32, i32, i32
  }
  func.func @transform_2(%arg0: i32) -> (i32, i32) {
    %c0_i32 = arith.constant 0 : i32
    %c0_i32_0 = arith.constant 0 : i32
    %c0_i32_1 = arith.constant 0 : i32
    return %c0_i32, %c0_i32_0 : i32, i32
  }
  func.func @transform_3(%arg0: i32) -> (i32, i32, i32) {
    %c0_i32 = arith.constant 0 : i32
    %c0_i32_0 = arith.constant 0 : i32
    %c0_i32_1 = arith.constant 0 : i32
    return %arg0, %c0_i32, %c0_i32_0 : i32, i32, i32
  }
}

module attributes {stable_mosaic.version = 11 : i64} {
  func.func @_fc_head_kernel(%arg0: i32, %arg1: memref<2x2048xf32, #tpu.memory_space<vmem>>, %arg2: memref<2048x128xbf16, #tpu.memory_space<vmem>>, %arg3: memref<1x128xf32, #tpu.memory_space<vmem>>, %arg4: memref<128x128xbf16, #tpu.memory_space<vmem>>, %arg5: memref<1x128xf32, #tpu.memory_space<vmem>>, %arg6: memref<128x128xbf16, #tpu.memory_space<vmem>>, %arg7: memref<1x128xf32, #tpu.memory_space<vmem>>, %arg8: memref<2x128xf32, #tpu.memory_space<vmem>>) attributes {dimension_semantics = [#tpu.dimension_semantics<parallel>], iteration_bounds = array<i64: 1>, scalar_prefetch = 0 : i64, scratch_operands = 0 : i64, tpu.core_type = #tpu.core_type<tc>, window_params = [{transform_indices = @transform_0, window_bounds = array<i64: 2, 2048>}, {pipeline_mode = #tpu.pipeline_mode<synchronous>, transform_indices = @transform_1, window_bounds = array<i64: 2048, 128>}, {pipeline_mode = #tpu.pipeline_mode<synchronous>, transform_indices = @transform_2, window_bounds = array<i64: 1, 128>}, {pipeline_mode = #tpu.pipeline_mode<synchronous>, transform_indices = @transform_3, window_bounds = array<i64: 128, 128>}, {pipeline_mode = #tpu.pipeline_mode<synchronous>, transform_indices = @transform_4, window_bounds = array<i64: 1, 128>}, {pipeline_mode = #tpu.pipeline_mode<synchronous>, transform_indices = @transform_5, window_bounds = array<i64: 128, 128>}, {pipeline_mode = #tpu.pipeline_mode<synchronous>, transform_indices = @transform_6, window_bounds = array<i64: 1, 128>}, {transform_indices = @transform_7, window_bounds = array<i64: 2, 128>}]} {
    %c0 = arith.constant 0 : index
    %c0_0 = arith.constant 0 : index
    %0 = vector.load %arg1[%c0, %c0_0] : memref<2x2048xf32, #tpu.memory_space<vmem>>, vector<2x2048xf32>
    %1 = arith.truncf %0 : vector<2x2048xf32> to vector<2x2048xbf16>
    %c0_1 = arith.constant 0 : index
    %c0_2 = arith.constant 0 : index
    %2 = vector.load %arg2[%c0_1, %c0_2] : memref<2048x128xbf16, #tpu.memory_space<vmem>>, vector<2048x128xbf16>
    %cst = arith.constant dense<0.000000e+00> : vector<2x128xf32>
    %3 = tpu.matmul %1, %2, %cst {dimension_numbers = #tpu.dot_dimension_numbers<[1], [0], [0], [1], [0, 0, 1, 1], [], []>} : vector<2x2048xbf16>, vector<2048x128xbf16>, vector<2x128xf32> -> vector<2x128xf32>
    %c0_3 = arith.constant 0 : index
    %c0_4 = arith.constant 0 : index
    %4 = vector.load %arg3[%c0_3, %c0_4] : memref<1x128xf32, #tpu.memory_space<vmem>>, vector<1x128xf32>
    %5 = vector.broadcast %4 : vector<1x128xf32> to vector<2x128xf32>
    %6 = arith.addf %3, %5 : vector<2x128xf32>
    %cst_5 = arith.constant 0.000000e+00 : f32
    %7 = vector.broadcast %cst_5 : f32 to vector<2x128xf32>
    %8 = arith.maximumf %6, %7 : vector<2x128xf32>
    %9 = arith.truncf %8 : vector<2x128xf32> to vector<2x128xbf16>
    %c0_6 = arith.constant 0 : index
    %c0_7 = arith.constant 0 : index
    %10 = vector.load %arg4[%c0_6, %c0_7] : memref<128x128xbf16, #tpu.memory_space<vmem>>, vector<128x128xbf16>
    %cst_8 = arith.constant dense<0.000000e+00> : vector<2x128xf32>
    %11 = tpu.matmul %9, %10, %cst_8 {dimension_numbers = #tpu.dot_dimension_numbers<[1], [0], [0], [1], [0, 0, 1, 1], [], []>} : vector<2x128xbf16>, vector<128x128xbf16>, vector<2x128xf32> -> vector<2x128xf32>
    %c0_9 = arith.constant 0 : index
    %c0_10 = arith.constant 0 : index
    %12 = vector.load %arg5[%c0_9, %c0_10] : memref<1x128xf32, #tpu.memory_space<vmem>>, vector<1x128xf32>
    %13 = vector.broadcast %12 : vector<1x128xf32> to vector<2x128xf32>
    %14 = arith.addf %11, %13 : vector<2x128xf32>
    %cst_11 = arith.constant 0.000000e+00 : f32
    %15 = vector.broadcast %cst_11 : f32 to vector<2x128xf32>
    %16 = arith.maximumf %14, %15 : vector<2x128xf32>
    %17 = arith.truncf %16 : vector<2x128xf32> to vector<2x128xbf16>
    %c0_12 = arith.constant 0 : index
    %c0_13 = arith.constant 0 : index
    %18 = vector.load %arg6[%c0_12, %c0_13] : memref<128x128xbf16, #tpu.memory_space<vmem>>, vector<128x128xbf16>
    %cst_14 = arith.constant dense<0.000000e+00> : vector<2x128xf32>
    %19 = tpu.matmul %17, %18, %cst_14 {dimension_numbers = #tpu.dot_dimension_numbers<[1], [0], [0], [1], [0, 0, 1, 1], [], []>} : vector<2x128xbf16>, vector<128x128xbf16>, vector<2x128xf32> -> vector<2x128xf32>
    %c0_15 = arith.constant 0 : index
    %c0_16 = arith.constant 0 : index
    %20 = vector.load %arg7[%c0_15, %c0_16] : memref<1x128xf32, #tpu.memory_space<vmem>>, vector<1x128xf32>
    %21 = vector.broadcast %20 : vector<1x128xf32> to vector<2x128xf32>
    %22 = arith.addf %19, %21 : vector<2x128xf32>
    %c0_17 = arith.constant 0 : index
    %c0_18 = arith.constant 0 : index
    %23 = vector.load %arg8[%c0_17, %c0_18] : memref<2x128xf32, #tpu.memory_space<vmem>>, vector<2x128xf32>
    tpu.vector_store %arg8[%c0_17, %c0_18], %22 {strides = array<i32>} : memref<2x128xf32, #tpu.memory_space<vmem>>, vector<2x128xf32>,
    return
  }
  func.func @transform_0(%arg0: i32) -> (i32, i32) {
    %c0_i32 = arith.constant 0 : i32
    %c0_i32_0 = arith.constant 0 : i32
    return %arg0, %c0_i32 : i32, i32
  }
  func.func @transform_1(%arg0: i32) -> (i32, i32) {
    %c0_i32 = arith.constant 0 : i32
    %c0_i32_0 = arith.constant 0 : i32
    %c0_i32_1 = arith.constant 0 : i32
    return %c0_i32, %c0_i32_0 : i32, i32
  }
  func.func @transform_2(%arg0: i32) -> (i32, i32) {
    %c0_i32 = arith.constant 0 : i32
    %c0_i32_0 = arith.constant 0 : i32
    %c0_i32_1 = arith.constant 0 : i32
    return %c0_i32, %c0_i32_0 : i32, i32
  }
  func.func @transform_3(%arg0: i32) -> (i32, i32) {
    %c0_i32 = arith.constant 0 : i32
    %c0_i32_0 = arith.constant 0 : i32
    %c0_i32_1 = arith.constant 0 : i32
    return %c0_i32, %c0_i32_0 : i32, i32
  }
  func.func @transform_4(%arg0: i32) -> (i32, i32) {
    %c0_i32 = arith.constant 0 : i32
    %c0_i32_0 = arith.constant 0 : i32
    %c0_i32_1 = arith.constant 0 : i32
    return %c0_i32, %c0_i32_0 : i32, i32
  }
  func.func @transform_5(%arg0: i32) -> (i32, i32) {
    %c0_i32 = arith.constant 0 : i32
    %c0_i32_0 = arith.constant 0 : i32
    %c0_i32_1 = arith.constant 0 : i32
    return %c0_i32, %c0_i32_0 : i32, i32
  }
  func.func @transform_6(%arg0: i32) -> (i32, i32) {
    %c0_i32 = arith.constant 0 : i32
    %c0_i32_0 = arith.constant 0 : i32
    %c0_i32_1 = arith.constant 0 : i32
    return %c0_i32, %c0_i32_0 : i32, i32
  }
  func.func @transform_7(%arg0: i32) -> (i32, i32) {
    %c0_i32 = arith.constant 0 : i32
    %c0_i32_0 = arith.constant 0 : i32
    return %arg0, %c0_i32 : i32, i32
  }
}

</mosaic_0001>

<bundles_post_ra>
// kernel: net_forward.3
= control target key start
LH: loop header
LB: loop body
LE: loop exit
PB: predicated region body
PF: predicated region fallthrough
CT: control target
= control target key end

     0   :  { %s2833_s12 = smov 0   ;;  %s3663_s0 = inlined_call_operand.vmem [shape: f32[2,36,108], index: 0, kind: input, shape index: {}]   ;;  %s3664_s1 = inlined_call_operand.vmem [shape: bf16[2,5,108,256], index: 1, kind: input, shape index: {}]   ;;  %s3665_s2 = inlined_call_operand.vmem [shape: f32[1,256], index: 2, kind: input, shape index: {}]   ;;  %s3666_s3 = inlined_call_operand.vmem [shape: f32[2,16,256], index: 3, kind: output, shape index: {}]  }
   0x1 LB: > { %s2259_s13 = sadd.s32 4294967295, %s2809_s12   ;;  %p2263_p0 = scmp.ge.s32.totalorder %s2809_s12, 1  ;;  %s2809_s12 = sphi %s2833_s12, %s13_s12  }
   0x2   : > { %p137_p1 = scmp.lt.s32.totalorder %s2809_s12, 3 }
   0x4   : > { %p138_p2 = pnand %p2263_p0, %p137_p1 }
   0x6   : > { %141 = sbr.rel (%p138_p2) target bundleno = 403 (0x193), region = 32 }
   0xb   : > { %v2593_v0 = vld [vmem:[%s3664_s1 + $0xd4] ss:$8 sps:$4 sm:$0x3f]   ;;  %vm288_vm0 = vcmask 1045504   ;;  %v2811_v3 = vmov 0   ;;  %p161_p3 = scmp.lt.s32.totalorder %s2259_s13, 1 }
   0xc   : > { %2295 = vmatprep.subr.msk.bf16.mxu0 %vm288_vm0, %v2593_v0  ;;  %v2595_v1 = vld [vmem:[%s3664_s1 + $0x64] ss:$8 sps:$4 sm:$0x3f]   ;;  %v2597_v2 = vld [vmem:[%s3664_s1 + $0xd0] ss:$8 sps:$4 sm:$0x3f]   ;;  %327 = vmatprep.mubr.bf16.mxu0 %v2811_v3 }
   0xd   : > { %v2598_v4 = vld [vmem:[%s3664_s1 + $0x60] ss:$8 sps:$4 sm:$0x3f]   ;;  %v2599_v5 = vld [vmem:[%s3664_s1 + $0xc4] ss:$8 sps:$4 sm:$0xff]   ;;  %460 = vmatprep.mubr.bf16.mxu1 %v2811_v3  ;;  %2312 = vmatprep.subr.msk.bf16.mxu1 %vm288_vm0, %v2595_v1  ;;  %v290_v6 = vsel %vm288_vm0, %v2597_v2, 0 }
   0xe   : > { %v2601_v7 = vld [vmem:[%s3664_s1 + $0x54] ss:$8 sps:$4 sm:$0xff]   ;;  %298 = vmatpush1.bf16.msra.mxu0 %v290_v6  ;;  %v423_v8 = vsel %vm288_vm0, %v2598_v4, 0  ;;  %v2603_v9 = vld [vmem:[%s3664_s1 + $0xc0] ss:$8 sps:$4 sm:$0xff]   ;;  %s3684_s13 = smov (!%p161_p3, %s2259_s13), 1 }
   0xf   : > { %v2604_v10 = vld [vmem:[%s3664_s1 + $0x50] ss:$8 sps:$4 sm:$0xff]   ;;  %431 = vmatpush1.bf16.msra.mxu1 %v423_v8  ;;  %299 = vmatprep.subr.bf16.mxu0 %v2599_v5  ;;  %v2605_v11 = vld [vmem:[%s3664_s1 + $0xb4] ss:$8 sps:$4 sm:$0xff]   ;;  %v2607_v12 = vld [vmem:[%s3664_s1 + $0x44] ss:$8 sps:$4 sm:$0xff]  }
  0x10   : > { %432 = vmatprep.subr.bf16.mxu1 %v2601_v7  ;;  %v2609_v13 = vld [vmem:[%s3664_s1 + $0xb0] ss:$8 sps:$4 sm:$0xff]   ;;  %v2610_v14 = vld [vmem:[%s3664_s1 + $0x40] ss:$8 sps:$4 sm:$0xff]   ;;  %v2611_v15 = vld [vmem:[%s3664_s1 + $0xa4] ss:$8 sps:$4 sm:$0xff]  }
  0x11   : > { %v2613_v16 = vld [vmem:[%s3664_s1 + $0x34] ss:$8 sps:$4 sm:$0xff]   ;;  %v2615_v17 = vld [vmem:[%s3664_s1 + $0xa0] ss:$8 sps:$4 sm:$0xff]   ;;  %v2616_v18 = vld [vmem:[%s3664_s1 + $0x30] ss:$8 sps:$4 sm:$0xff]  }
  0x12   : > { %300 = vmatpush1.bf16.msra.mxu0 %v2603_v9  ;;  %v2617_v19 = vld [vmem:[%s3664_s1 + $0x94] ss:$8 sps:$4 sm:$0xff]   ;;  %v2619_v20 = vld [vmem:[%s3664_s1 + $0x24] ss:$8 sps:$4 sm:$0xff]   ;;  %s2582_s25 = smul.u32 40, %s3684_s13  ;;  %vm281_vm1 = vcmask 883712  }
  0x13   : > { %433 = vmatpush1.bf16.msra.mxu1 %v2604_v10  ;;  %301 = vmatprep.subr.bf16.mxu0 %v2605_v11  ;;  %v2621_v21 = vld [vmem:[%s3664_s1 + $0x90] ss:$8 sps:$4 sm:$0xff]   ;;  %v2622_v22 = vld [vmem:[%s3664_s1 + $0x20] ss:$8 sps:$4 sm:$0xff]   ;;  %v2623_v23 = vld [vmem:[%s3664_s1 + $0x84] ss:$8 sps:$4 sm:$0xff]  }
  0x14   : > { %434 = vmatprep.subr.bf16.mxu1 %v2607_v12  ;;  %v2625_v24 = vld [vmem:[%s3664_s1 + $0x14] ss:$8 sps:$4 sm:$0xff]   ;;  %s2923_s9 = scalar_lea.vmem %s3663_s0, %s2582_s25  ;;  %v2627_v25 = vld [vmem:[%s3664_s1 + $0x80] ss:$8 sps:$4 sm:$0xff]   ;;  %v2628_v26 = vld [vmem:[%s3664_s1 + $0x10] ss:$8 sps:$4 sm:$0xff]  }
  0x15   : > { %v2629_v27 = vld [vmem:[%s3664_s1 + $0x74] ss:$8 sps:$4 sm:$0xff]   ;;  %v2631_v28 = vld [vmem:[%s3664_s1 + $0x4] ss:$8 sps:$4 sm:$0xff]   ;;  %v2633_v29 = vld [vmem:[%s3664_s1 + $0x70] ss:$8 sps:$4 sm:$0xff]  }
  0x16   : > { %302 = vmatpush1.bf16.msra.mxu0 %v2609_v13  ;;  %v192_v30 = vld [vmem:[%s2923_s9 + $0x1] sm:$0xff]  ;;  %v193_v31 = vld [vmem:[%s2923_s9 + $0x9] sm:$0xff]  ;;  %v2637_v36 = vld [vmem:[%s3664_s1 + $0x1b4] ss:$8 sps:$4 sm:$0x3f]   ;;  %vm2161_vm2 = vcmask 1041409  }
  0x17   : > { %435 = vmatpush1.bf16.msra.mxu1 %v2610_v14  ;;  %303 = vmatprep.subr.bf16.mxu0 %v2611_v15  ;;  %v2634_v32 = vld [vmem:[%s3664_s1] ss:$8 sps:$4 sm:$0xff]   ;;  %v2635_v34 = vld [vmem:[%s3664_s1 + $0x144] ss:$8 sps:$4 sm:$0x3f]   ;;  %v2959_v39 = vpack.c.bf16 %v193_v31, %v192_v30  ;;  %v194_v48 = vld [vmem:[%s2923_s9 + $0x11] sm:$0xff] }
  0x18   : > { %436 = vmatprep.subr.bf16.mxu1 %v2613_v16  ;;  %v172_v33 = vld [vmem:[%s2923_s9] sm:$0xff]  ;;  %v173_v35 = vld [vmem:[%s2923_s9 + $0x8] sm:$0xff]  ;;  %v2640_v38 = vld [vmem:[%s3664_s1 + $0x1b0] ss:$8 sps:$4 sm:$0x3f]   ;;  %vm2163_vm3 = vcmask 1042434  }
  0x19   : > { %v2639_v37 = vld [vmem:[%s3664_s1 + $0x140] ss:$8 sps:$4 sm:$0x3f]   ;;  %v2961_v40 = vpack.c.bf16 %v173_v35, %v172_v33  ;;  %v2643_v42 = vld [vmem:[%s3664_s1 + $0x134] ss:$8 sps:$4 sm:$0xff]   ;;  %v739_v43 = vsel %vm288_vm0, %v2640_v38, 0 }
  0x1a   : > { %304 = vmatpush1.bf16.msra.mxu0 %v2615_v17  ;;  %v577_v41 = vsel %vm288_vm0, %v2639_v37, 0  ;;  %v2641_v44 = vld [vmem:[%s3664_s1 + $0x130] ss:$8 sps:$4 sm:$0xff]   ;;  %v2646_v45 = vld [vmem:[%s3664_s1 + $0x1a4] ss:$8 sps:$4 sm:$0xff]   ;;  %vm2165_vm4 = vcmask 1043459  }
  0x1b   : > { %437 = vmatpush1.bf16.msra.mxu1 %v2616_v18  ;;  %305 = vmatprep.subr.bf16.mxu0 %v2617_v19  ;;  %v2644_v46 = vld [vmem:[%s3664_s1 + $0x1a0] ss:$8 sps:$4 sm:$0xff]   ;;  %v2649_v47 = vld [vmem:[%s3664_s1 + $0x124] ss:$8 sps:$4 sm:$0xff]   ;;  %v174_v50 = vld [vmem:[%s2923_s9 + $0x10] sm:$0xff]  ;;  %vm2167_vm5 = vcmask 1044484  }
  0x1c   : > { %438 = vmatprep.subr.bf16.mxu1 %v2619_v20  ;;  %v195_v49 = vld [vmem:[%s2923_s9 + $0x19] sm:$0xff]  ;;  %v2658_v58 = vld [vmem:[%s3664_s1 + $0x184] ss:$8 sps:$4 sm:$0xff]   ;;  %vm2169_vm6 = vcmask 1045509   ;;  %vm2171_vm7 = vcmask 1046534   ;;  %vm2173_vm8 = vcmask 1047559  }
  0x1d   : > { %v175_v51 = vld [vmem:[%s2923_s9 + $0x18] sm:$0xff]  ;;  %v2995_v53 = vpack.c.bf16 %v195_v49, %v194_v48  ;;  %v2647_v54 = vld [vmem:[%s3664_s1 + $0x120] ss:$8 sps:$4 sm:$0xff]   ;;  %v2661_v61 = vld [vmem:[%s3664_s1 + $0x104] ss:$8 sps:$4 sm:$0xff]   ;;  %s2581_s30 = sshll.u32 %s3684_s13, 5 }
  0x1e   : > { %306 = vmatpush1.bf16.msra.mxu0 %v2621_v21  ;;  %v2652_v52 = vld [vmem:[%s3664_s1 + $0x194] ss:$8 sps:$4 sm:$0xff]   ;;  %v2650_v55 = vld [vmem:[%s3664_s1 + $0x190] ss:$8 sps:$4 sm:$0xff]   ;;  %v3003_v56 = vpack.c.bf16 %v175_v51, %v174_v50  ;;  %v2656_v60 = vld [vmem:[%s3664_s1 + $0x180] ss:$8 sps:$4 sm:$0xff]   ;;  %s3599_s5 = scalar_lea.vmem %s3666_s3, %s2581_s30 }
  0x1f   : > { %439 = vmatpush1.bf16.msra.mxu1 %v2622_v22  ;;  %307 = vmatprep.subr.bf16.mxu0 %v2623_v23  ;;  %v2655_v57 = vld [vmem:[%s3664_s1 + $0x114] ss:$8 sps:$4 sm:$0xff]   ;;  %v2653_v59 = vld [vmem:[%s3664_s1 + $0x110] ss:$8 sps:$4 sm:$0xff]   ;;  %v2659_v63 = vld [vmem:[%s3664_s1 + $0x100] ss:$8 sps:$4 sm:$0xff]  }
  0x20   : > { %440 = vmatprep.subr.bf16.mxu1 %v2625_v24  ;;  %v2664_v62 = vld [vmem:[%s3664_s1 + $0x174] ss:$8 sps:$4 sm:$0xff]   ;;  %v2662_v0 = vld [vmem:[%s3664_s1 + $0x170] ss:$8 sps:$4 sm:$0xff]   ;;  %v2670_v2 = vld [vmem:[%s3664_s1 + $0x164] ss:$8 sps:$4 sm:$0xff]  }
  0x21   : > { %v2667_v1 = vld [vmem:[%s3664_s1 + $0xf4] ss:$8 sps:$4 sm:$0xff]   ;;  %v2665_v4 = vld [vmem:[%s3664_s1 + $0xf0] ss:$8 sps:$4 sm:$0xff]   ;;  %v2668_v5 = vld [vmem:[%s3664_s1 + $0x160] ss:$8 sps:$4 sm:$0xff]  }
  0x22   : > { %308 = vmatpush1.bf16.msra.mxu0 %v2627_v25  ;;  %v2673_v6 = vld [vmem:[%s3664_s1 + $0xe4] ss:$8 sps:$4 sm:$0xff]   ;;  %v2676_v7 = vld [vmem:[%s3664_s1 + $0x154] ss:$8 sps:$4 sm:$0xff]   ;;  %v2671_v8 = vld [vmem:[%s3664_s1 + $0xe0] ss:$8 sps:$4 sm:$0xff]  }
  0x23   : > { %441 = vmatpush1.bf16.msra.mxu1 %v2628_v26  ;;  %309 = vmatprep.subr.bf16.mxu0 %v2629_v27  ;;  %v481_v9 = vld [vmem:[%s2923_s9 + $0x2] sm:$0xff]  ;;  %v482_v10 = vld [vmem:[%s2923_s9 + $0xa] sm:$0xff]  ;;  %v2685_v21 = vld [vmem:[%s3664_s1 + $0x214] ss:$8 sps:$4 sm:$0xff]  }
  0x24   : > { %442 = vmatprep.subr.bf16.mxu1 %v2631_v28  ;;  %v2674_v11 = vld [vmem:[%s3664_s1 + $0x150] ss:$8 sps:$4 sm:$0xff]   ;;  %v643_v12 = vld [vmem:[%s2923_s9 + $0x3] sm:$0xff]  ;;  %v3075_v18 = vpack.c.bf16 %v482_v10, %v481_v9  ;;  %v2688_v24 = vld [vmem:[%s3664_s1 + $0x2f4] ss:$8 sps:$4 sm:$0xff]  }
  0x25   : > { %v644_v13 = vld [vmem:[%s2923_s9 + $0xb] sm:$0xff]  ;;  %v2681_v16 = vld [vmem:[%s3664_s1 + $0x220] ss:$8 sps:$4 sm:$0x3f]   ;;  %v2700_v37 = vld [vmem:[%s3664_s1 + $0x2d4] ss:$8 sps:$4 sm:$0xff]  }
  0x26   : > { %310 = vmatpush1.bf16.msra.mxu0 %v2633_v29  ;;  %v2677_v14 = vld [vmem:[%s3664_s1 + $0x224] ss:$8 sps:$4 sm:$0x3f]   ;;  %v2682_v17 = vld [vmem:[%s3664_s1 + $0x300] ss:$8 sps:$4 sm:$0x3f]   ;;  %v3077_v19 = vpack.c.bf16 %v644_v13, %v643_v12 }
  0x27   : > { %443 = vmatpush1.bf16.msra.mxu1 %v2634_v32  ;;  %2343 = vmatprep.subr.msk.bf16.mxu0 %vm288_vm0, %v2635_v34  ;;  %v2679_v15 = vld [vmem:[%s3664_s1 + $0x304] ss:$8 sps:$4 sm:$0x3f]   ;;  %v901_v20 = vsel %vm288_vm0, %v2681_v16, 0  ;;  %v1092_v22 = vsel %vm288_vm0, %v2682_v17, 0  ;;  %v483_v26 = vld [vmem:[%s2923_s9 + $0x12] sm:$0xff] }
  0x28   : > { %2374 = vmatprep.subr.msk.bf16.mxu1 %vm288_vm0, %v2637_v36  ;;  %v2683_v23 = vld [vmem:[%s3664_s1 + $0x210] ss:$8 sps:$4 sm:$0xff]   ;;  %v2691_v28 = vld [vmem:[%s3664_s1 + $0x204] ss:$8 sps:$4 sm:$0xff]   ;;  %v2689_v33 = vld [vmem:[%s3664_s1 + $0x200] ss:$8 sps:$4 sm:$0xff]  }
  0x29   : > { %2296 = vmatmul.mubr.msk.bf16.vlgmr.msra.gmra.mxu0 %vm281_vm1, %v2959_v39  ;;  %v2686_v25 = vld [vmem:[%s3664_s1 + $0x2f0] ss:$8 sps:$4 sm:$0xff]   ;;  %v2694_v31 = vld [vmem:[%s3664_s1 + $0x2e4] ss:$8 sps:$4 sm:$0xff]   ;;  %v2692_v34 = vld [vmem:[%s3664_s1 + $0x2e0] ss:$8 sps:$4 sm:$0xff]  }
  0x2a   : > { %2313 = vmatmul.mubr.msk.bf16.vlgmr.msra.gmra.mxu1 %vm281_vm1, %v2961_v40  ;;  %585 = vmatpush1.bf16.msra.mxu0 %v577_v41  ;;  %v484_v27 = vld [vmem:[%s2923_s9 + $0x1a] sm:$0xff]  ;;  %v2715_v50 = vld [vmem:[%s3664_s1 + $0x1c4] ss:$8 sps:$4 sm:$0xff]  }
  0x2b   : > { %747 = vmatpush1.bf16.msra.mxu1 %v739_v43  ;;  %586 = vmatprep.subr.bf16.mxu0 %v2643_v42  ;;  %v645_v29 = vld [vmem:[%s2923_s9 + $0x13] sm:$0xff]  ;;  %v646_v30 = vld [vmem:[%s2923_s9 + $0x1b] sm:$0xff]  ;;  %v3110_v32 = vpack.c.bf16 %v484_v27, %v483_v26  ;;  %v2703_v42 = vld [vmem:[%s3664_s1 + $0x1e4] ss:$8 sps:$4 sm:$0xff]  }
  0x2c   : > { %748 = vmatprep.subr.bf16.mxu1 %v2646_v45  ;;  %337 = vmatprep.mubr.bf16.mxu0 %v2811_v3  ;;  %v3119_v35 = vpack.c.bf16 %v646_v30, %v645_v29  ;;  %v2697_v36 = vld [vmem:[%s3664_s1 + $0x1f4] ss:$8 sps:$4 sm:$0xff]   ;;  %v2695_v38 = vld [vmem:[%s3664_s1 + $0x1f0] ss:$8 sps:$4 sm:$0xff]   ;;  %v2706_v43 = vld [vmem:[%s3664_s1 + $0x2c4] ss:$8 sps:$4 sm:$0xff]  }
  0x2d   : > { %470 = vmatprep.mubr.bf16.mxu1 %v2811_v3  ;;  %v2698_v41 = vld [vmem:[%s3664_s1 + $0x2d0] ss:$8 sps:$4 sm:$0xff]   ;;  %v2704_v45 = vld [vmem:[%s3664_s1 + $0x2c0] ss:$8 sps:$4 sm:$0xff]   ;;  %v2718_v51 = vld [vmem:[%s3664_s1 + $0x2a4] ss:$8 sps:$4 sm:$0xff]  }
  0x2e   : > { %587 = vmatpush1.bf16.msra.mxu0 %v2641_v44  ;;  %v2701_v44 = vld [vmem:[%s3664_s1 + $0x1e0] ss:$8 sps:$4 sm:$0xff]   ;;  %v2707_v48 = vld [vmem:[%s3664_s1 + $0x1d0] ss:$8 sps:$4 sm:$0xff]   ;;  %v2739_v12 = vld [vmem:[%s3664_s1 + $0x264] ss:$8 sps:$4 sm:$0xff]  }
  0x2f   : > { %749 = vmatpush1.bf16.msra.mxu1 %v2644_v46  ;;  %588 = vmatprep.subr.bf16.mxu0 %v2649_v47  ;;  %v2709_v46 = vld [vmem:[%s3664_s1 + $0x1d4] ss:$8 sps:$4 sm:$0xff]   ;;  %v2710_v49 = vld [vmem:[%s3664_s1 + $0x2b0] ss:$8 sps:$4 sm:$0xff]   ;;  %v2742_v13 = vld [vmem:[%s3664_s1 + $0x344] ss:$8 sps:$4 sm:$0xff]  }
  0x30   : > { %750 = vmatprep.subr.bf16.mxu1 %v2652_v52  ;;  %v2712_v47 = vld [vmem:[%s3664_s1 + $0x2b4] ss:$8 sps:$4 sm:$0xff]   ;;  %v2713_v52 = vld [vmem:[%s3664_s1 + $0x1c0] ss:$8 sps:$4 sm:$0xff]   ;;  %v2731_v10 = vld [vmem:[%s3664_s1 + $0x270] ss:$8 sps:$4 sm:$0xff]  }
  0x31   : > { %2297 = vmatmul.mubr.msk.bf16.gmra.mxu0 %vm281_vm1, %v2995_v53  ;;  %v2745_v16 = vld [vmem:[%s3664_s1 + $0x254] ss:$8 sps:$4 sm:$0xff]   ;;  %v2755_v27 = vld [vmem:[%s3664_s1 + $0x230] ss:$8 sps:$4 sm:$0xff]  }
  0x32   : > { %589 = vmatpush1.bf16.msra.mxu0 %v2647_v54  ;;  %2314 = vmatmul.mubr.msk.bf16.gmra.mxu1 %vm281_vm1, %v3003_v56  ;;  %v805_v54 = vld [vmem:[%s2923_s9 + $0x4] sm:$0xff]  ;;  %v2748_v17 = vld [vmem:[%s3664_s1 + $0x334] ss:$8 sps:$4 sm:$0xff]  }
  0x33   : > { %751 = vmatpush1.bf16.msra.mxu1 %v2650_v55  ;;  %590 = vmatprep.subr.bf16.mxu0 %v2655_v57  ;;  %v806_v55 = vld [vmem:[%s2923_s9 + $0xc] sm:$0xff]  ;;  %v2719_v57 = vld [vmem:[%s3664_s1 + $0x294] ss:$8 sps:$4 sm:$0x3f]  }
  0x34   : > { %752 = vmatprep.subr.bf16.mxu1 %v2658_v58  ;;  %614 = vmatprep.mubr.bf16.mxu0 %v2811_v3  ;;  %v2721_v58 = vld [vmem:[%s3664_s1 + $0x374] ss:$8 sps:$4 sm:$0x3f]   ;;  %v2761_v29 = vld [vmem:[%s3664_s1 + $0x3e4] ss:$8 sps:$4 sm:$0x3f]  }
  0x35   : > { %776 = vmatprep.mubr.bf16.mxu1 %v2811_v3  ;;  %v2760_v26 = vld [vmem:[%s3664_s1 + $0x314] ss:$8 sps:$4 sm:$0xff]   ;;  %v2765_v30 = vld [vmem:[%s3664_s1 + $0x3e0] ss:$8 sps:$4 sm:$0x3f]  }
  0x36   : > { %591 = vmatpush1.bf16.msra.mxu0 %v2653_v59  ;;  %v2716_v59 = vld [vmem:[%s3664_s1 + $0x2a0] ss:$8 sps:$4 sm:$0xff]  }
  0x37   : > { %753 = vmatpush1.bf16.msra.mxu1 %v2656_v60  ;;  %592 = vmatprep.subr.bf16.mxu0 %v2661_v61  ;;  %v2723_v60 = vld [vmem:[%s3664_s1 + $0x290] ss:$8 sps:$4 sm:$0x3f]  }
  0x38   : > { %754 = vmatprep.subr.bf16.mxu1 %v2664_v62  ;;  %v2724_v61 = vld [vmem:[%s3664_s1 + $0x370] ss:$8 sps:$4 sm:$0x3f]   ;;  %v3189_v62 = vpack.c.bf16 %v806_v55, %v805_v54  ;;  %v2794_v55 = vld [vmem:[%s3664_s1 + $0x400] ss:$8 sps:$4 sm:$0xff]  }
  0x39   : > { %v2791_v54 = vld [vmem:[%s3664_s1 + $0x390] ss:$8 sps:$4 sm:$0xff]  }
  0x3a   : > { %593 = vmatpush1.bf16.msra.mxu0 %v2659_v63  ;;  %v1225_v63 = vsel %vm288_vm0, %v2723_v60, 0  ;;  %v2800_v60 = vld [vmem:[%s3664_s1 + $0x3f0] ss:$8 sps:$4 sm:$0xff]  }
  0x3b   : > { %755 = vmatpush1.bf16.msra.mxu1 %v2662_v0  ;;  %594 = vmatprep.subr.bf16.mxu0 %v2667_v1  ;;  %v2727_v0 = vld [vmem:[%s3664_s1 + $0x284] ss:$8 sps:$4 sm:$0xff]   ;;  %v1379_v1 = vsel %vm288_vm0, %v2724_v61, 0 }
  0x3c   : > { %756 = vmatprep.subr.bf16.mxu1 %v2670_v2  ;;  %v2730_v2 = vld [vmem:[%s3664_s1 + $0x364] ss:$8 sps:$4 sm:$0xff]  }
  0x3e   : > { %595 = vmatpush1.bf16.msra.mxu0 %v2665_v4  ;;  %v2725_v4 = vld [vmem:[%s3664_s1 + $0x280] ss:$8 sps:$4 sm:$0xff]  }
  0x3f   : > { %757 = vmatpush1.bf16.msra.mxu1 %v2668_v5  ;;  %596 = vmatprep.subr.bf16.mxu0 %v2673_v6  ;;  %v807_v5 = vld [vmem:[%s2923_s9 + $0x14] sm:$0xff]  ;;  %v808_v6 = vld [vmem:[%s2923_s9 + $0x1c] sm:$0xff] }
  0x40   : > { %758 = vmatprep.subr.bf16.mxu1 %v2676_v7  ;;  %v2728_v7 = vld [vmem:[%s3664_s1 + $0x360] ss:$8 sps:$4 sm:$0xff]   ;;  %v3220_v9 = vpack.c.bf16 %v808_v6, %v807_v5 }
  0x42   : > { %597 = vmatpush1.bf16.msra.mxu0 %v2671_v8  ;;  %v2733_v8 = vld [vmem:[%s3664_s1 + $0x274] ss:$8 sps:$4 sm:$0xff]  }
  0x43   : > { %759 = vmatpush1.bf16.msra.mxu1 %v2674_v11  ;;  %2405 = vmatprep.subr.msk.bf16.mxu0 %vm288_vm0, %v2677_v14  ;;  %v2734_v11 = vld [vmem:[%s3664_s1 + $0x350] ss:$8 sps:$4 sm:$0xff]   ;;  %v2737_v14 = vld [vmem:[%s3664_s1 + $0x260] ss:$8 sps:$4 sm:$0xff]  }
  0x44   : > { %2450 = vmatprep.subr.msk.bf16.mxu1 %vm288_vm0, %v2679_v15  ;;  %v2740_v15 = vld [vmem:[%s3664_s1 + $0x340] ss:$8 sps:$4 sm:$0xff]  }
  0x45   : > { %2344 = vmatmul.mubr.msk.bf16.vlgmr.msra.gmra.mxu0 %vm281_vm1, %v3075_v18 }
  0x46   : > { %2375 = vmatmul.mubr.msk.bf16.vlgmr.msra.gmra.mxu1 %vm281_vm1, %v3077_v19  ;;  %909 = vmatpush1.bf16.msra.mxu0 %v901_v20  ;;  %v2746_v20 = vld [vmem:[%s3664_s1 + $0x330] ss:$8 sps:$4 sm:$0xff]  }
  0x47   : > { %1100 = vmatpush1.bf16.msra.mxu1 %v1092_v22  ;;  %910 = vmatprep.subr.bf16.mxu0 %v2685_v21  ;;  %v2751_v21 = vld [vmem:[%s3664_s1 + $0x244] ss:$8 sps:$4 sm:$0xff]  }
  0x48   : > { %1101 = vmatprep.subr.bf16.mxu1 %v2688_v24  ;;  %624 = vmatprep.mubr.bf16.mxu0 %v2811_v3  ;;  %v2754_v22 = vld [vmem:[%s3664_s1 + $0x324] ss:$8 sps:$4 sm:$0xff]   ;;  %v2752_v24 = vld [vmem:[%s3664_s1 + $0x320] ss:$8 sps:$4 sm:$0xff]  }
  0x49   : > { %786 = vmatprep.mubr.bf16.mxu1 %v2811_v3 }
  0x4a   : > { %911 = vmatpush1.bf16.msra.mxu0 %v2683_v23  ;;  %v2749_v23 = vld [vmem:[%s3664_s1 + $0x240] ss:$8 sps:$4 sm:$0xff]  }
  0x4b   : > { %1102 = vmatpush1.bf16.msra.mxu1 %v2686_v25  ;;  %912 = vmatprep.subr.bf16.mxu0 %v2691_v28  ;;  %v2757_v25 = vld [vmem:[%s3664_s1 + $0x234] ss:$8 sps:$4 sm:$0xff]   ;;  %v2758_v28 = vld [vmem:[%s3664_s1 + $0x310] ss:$8 sps:$4 sm:$0xff]  }
  0x4c   : > { %1103 = vmatprep.subr.bf16.mxu1 %v2694_v31  ;;  %v2763_v31 = vld [vmem:[%s3664_s1 + $0x454] ss:$8 sps:$4 sm:$0x3f]  }
  0x4d   : > { %2345 = vmatmul.mubr.msk.bf16.gmra.mxu0 %vm281_vm1, %v3110_v32 }
  0x4e   : > { %913 = vmatpush1.bf16.msra.mxu0 %v2689_v33  ;;  %2376 = vmatmul.mubr.msk.bf16.gmra.mxu1 %vm281_vm1, %v3119_v35  ;;  %v2766_v33 = vld [vmem:[%s3664_s1 + $0x450] ss:$8 sps:$4 sm:$0x3f]  }
  0x4f   : > { %1104 = vmatpush1.bf16.msra.mxu1 %v2692_v34  ;;  %914 = vmatprep.subr.bf16.mxu0 %v2697_v36  ;;  %v1541_v34 = vsel %vm288_vm0, %v2765_v30, 0  ;;  %v2769_v36 = vld [vmem:[%s3664_s1 + $0x3d4] ss:$8 sps:$4 sm:$0xff]  }
  0x50   : > { %1105 = vmatprep.subr.bf16.mxu1 %v2700_v37  ;;  %938 = vmatprep.mubr.bf16.mxu0 %v2811_v3  ;;  %v1703_v37 = vsel %vm288_vm0, %v2766_v33, 0 }
  0x51   : > { %1129 = vmatprep.mubr.bf16.mxu1 %v2811_v3 }
  0x52   : > { %915 = vmatpush1.bf16.msra.mxu0 %v2695_v38  ;;  %v2772_v38 = vld [vmem:[%s3664_s1 + $0x444] ss:$8 sps:$4 sm:$0xff]  }
  0x53   : > { %1106 = vmatpush1.bf16.msra.mxu1 %v2698_v41  ;;  %916 = vmatprep.subr.bf16.mxu0 %v2703_v42  ;;  %v2767_v41 = vld [vmem:[%s3664_s1 + $0x3d0] ss:$8 sps:$4 sm:$0xff]   ;;  %v2770_v42 = vld [vmem:[%s3664_s1 + $0x440] ss:$8 sps:$4 sm:$0xff]  }
  0x54   : > { %1107 = vmatprep.subr.bf16.mxu1 %v2706_v43  ;;  %v2775_v43 = vld [vmem:[%s3664_s1 + $0x3c4] ss:$8 sps:$4 sm:$0xff]  }
  0x56   : > { %917 = vmatpush1.bf16.msra.mxu0 %v2701_v44  ;;  %v2776_v44 = vld [vmem:[%s3664_s1 + $0x430] ss:$8 sps:$4 sm:$0xff]  }
  0x57   : > { %1108 = vmatpush1.bf16.msra.mxu1 %v2704_v45  ;;  %918 = vmatprep.subr.bf16.mxu0 %v2709_v46  ;;  %v2781_v45 = vld [vmem:[%s3664_s1 + $0x3b4] ss:$8 sps:$4 sm:$0xff]   ;;  %v2784_v46 = vld [vmem:[%s3664_s1 + $0x424] ss:$8 sps:$4 sm:$0xff]  }
  0x58   : > { %1109 = vmatprep.subr.bf16.mxu1 %v2712_v47  ;;  %v2779_v47 = vld [vmem:[%s3664_s1 + $0x3b0] ss:$8 sps:$4 sm:$0xff]  }
  0x5a   : > { %919 = vmatpush1.bf16.msra.mxu0 %v2707_v48  ;;  %v2782_v48 = vld [vmem:[%s3664_s1 + $0x420] ss:$8 sps:$4 sm:$0xff]  }
  0x5b   : > { %1110 = vmatpush1.bf16.msra.mxu1 %v2710_v49  ;;  %920 = vmatprep.subr.bf16.mxu0 %v2715_v50  ;;  %v2787_v49 = vld [vmem:[%s3664_s1 + $0x3a4] ss:$8 sps:$4 sm:$0xff]   ;;  %v2788_v50 = vld [vmem:[%s3664_s1 + $0x410] ss:$8 sps:$4 sm:$0xff]  }
  0x5c   : > { %1111 = vmatprep.subr.bf16.mxu1 %v2718_v51  ;;  %v2793_v51 = vld [vmem:[%s3664_s1 + $0x394] ss:$8 sps:$4 sm:$0xff]  }
  0x5e   : > { %921 = vmatpush1.bf16.msra.mxu0 %v2713_v52  ;;  %v2796_v52 = vld [vmem:[%s3664_s1 + $0x404] ss:$8 sps:$4 sm:$0xff]  }
  0x5f   : > { %1112 = vmatpush1.bf16.msra.mxu1 %v2716_v59  ;;  %2467 = vmatprep.subr.msk.bf16.mxu0 %vm288_vm0, %v2719_v57  ;;  %v2799_v57 = vld [vmem:[%s3664_s1 + $0x384] ss:$8 sps:$4 sm:$0xff]   ;;  %v2797_v59 = vld [vmem:[%s3664_s1 + $0x380] ss:$8 sps:$4 sm:$0xff]  }
  0x60   : > { %2498 = vmatprep.subr.msk.bf16.mxu1 %vm288_vm0, %v2721_v58  ;;  %v2802_v58 = vld [vmem:[%s3664_s1 + $0x3f4] ss:$8 sps:$4 sm:$0xff]  }
  0x61   : > { %2406 = vmatmul.mubr.msk.bf16.vlgmr.msra.gmra.mxu0 %vm281_vm1, %v3189_v62 }
  0x62   : > { %2451 = vmatmul.mubr.msk.bf16.vlgmr.msra.gmra.mxu1 %vm281_vm1, %v2959_v39  ;;  %1233 = vmatpush1.bf16.msra.mxu0 %v1225_v63  ;;  %v2736_v39 = vld [vmem:[%s3664_s1 + $0x354] ss:$8 sps:$4 sm:$0xff]  }
  0x63   : > { %1387 = vmatpush1.bf16.msra.mxu1 %v1379_v1  ;;  %1234 = vmatprep.subr.bf16.mxu0 %v2727_v0 }
  0x64   : > { %1388 = vmatprep.subr.bf16.mxu1 %v2730_v2  ;;  %948 = vmatprep.mubr.bf16.mxu0 %v2811_v3 }
  0x65   : > { %1139 = vmatprep.mubr.bf16.mxu1 %v2811_v3 }
  0x66   : > { %1235 = vmatpush1.bf16.msra.mxu0 %v2725_v4 }
  0x67   : > { %1389 = vmatpush1.bf16.msra.mxu1 %v2728_v7  ;;  %1236 = vmatprep.subr.bf16.mxu0 %v2733_v8 }
  0x68   : > { %1390 = vmatprep.subr.bf16.mxu1 %v2736_v39 }
  0x69   : > { %2407 = vmatmul.mubr.msk.bf16.gmra.mxu0 %vm281_vm1, %v3220_v9 }
  0x6a   : > { %1237 = vmatpush1.bf16.msra.mxu0 %v2731_v10  ;;  %2452 = vmatmul.mubr.msk.bf16.gmra.mxu1 %vm281_vm1, %v2995_v53  ;;  %v2743_v53 = vld [vmem:[%s3664_s1 + $0x250] ss:$8 sps:$4 sm:$0xff]  }
  0x6b   : > { %1391 = vmatpush1.bf16.msra.mxu1 %v2734_v11  ;;  %1238 = vmatprep.subr.bf16.mxu0 %v2739_v12 }
  0x6c   : > { %1392 = vmatprep.subr.bf16.mxu1 %v2742_v13  ;;  %1262 = vmatprep.mubr.bf16.mxu0 %v2811_v3 }
  0x6d   : > { %1416 = vmatprep.mubr.bf16.mxu1 %v2811_v3 }
  0x6e   : > { %1239 = vmatpush1.bf16.msra.mxu0 %v2737_v14 }
  0x6f   : > { %1393 = vmatpush1.bf16.msra.mxu1 %v2740_v15  ;;  %1240 = vmatprep.subr.bf16.mxu0 %v2745_v16 }
  0x70   : > { %1394 = vmatprep.subr.bf16.mxu1 %v2748_v17 }
  0x72   : > { %1241 = vmatpush1.bf16.msra.mxu0 %v2743_v53 }
  0x73   : > { %1395 = vmatpush1.bf16.msra.mxu1 %v2746_v20  ;;  %1242 = vmatprep.subr.bf16.mxu0 %v2751_v21 }
  0x74   : > { %1396 = vmatprep.subr.bf16.mxu1 %v2754_v22 }
  0x76   : > { %1243 = vmatpush1.bf16.msra.mxu0 %v2749_v23 }
  0x77   : > { %1397 = vmatpush1.bf16.msra.mxu1 %v2752_v24  ;;  %1244 = vmatprep.subr.bf16.mxu0 %v2757_v25 }
  0x78   : > { %1398 = vmatprep.subr.bf16.mxu1 %v2760_v26 }
  0x7a   : > { %1245 = vmatpush1.bf16.msra.mxu0 %v2755_v27 }
  0x7b   : > { %1399 = vmatpush1.bf16.msra.mxu1 %v2758_v28  ;;  %2529 = vmatprep.subr.msk.bf16.mxu0 %vm288_vm0, %v2761_v29 }
  0x7c   : > { %2560 = vmatprep.subr.msk.bf16.mxu1 %vm288_vm0, %v2763_v31 }
  0x7d   : > { %2468 = vmatmul.mubr.msk.bf16.vlgmr.msra.gmra.mxu0 %vm281_vm1, %v2961_v40  ;;  %v2778_v40 = vld [vmem:[%s3664_s1 + $0x434] ss:$8 sps:$4 sm:$0xff]  }
  0x7e   : > { %2499 = vmatmul.mubr.msk.bf16.vlgmr.msra.gmra.mxu1 %vm281_vm1, %v3075_v18  ;;  %1549 = vmatpush1.bf16.msra.mxu0 %v1541_v34  ;;  %v2773_v18 = vld [vmem:[%s3664_s1 + $0x3c0] ss:$8 sps:$4 sm:$0xff]  }
  0x7f   : > { %1711 = vmatpush1.bf16.msra.mxu1 %v1703_v37  ;;  %1550 = vmatprep.subr.bf16.mxu0 %v2769_v36 }
  0x80   : > { %1712 = vmatprep.subr.bf16.mxu1 %v2772_v38  ;;  %1272 = vmatprep.mubr.bf16.mxu0 %v2811_v3 }
  0x81   : > { %1426 = vmatprep.mubr.bf16.mxu1 %v2811_v3 }
  0x82   : > { %1551 = vmatpush1.bf16.msra.mxu0 %v2767_v41 }
  0x83   : > { %1713 = vmatpush1.bf16.msra.mxu1 %v2770_v42  ;;  %1552 = vmatprep.subr.bf16.mxu0 %v2775_v43 }
  0x84   : > { %1714 = vmatprep.subr.bf16.mxu1 %v2778_v40 }
  0x85   : > { %2469 = vmatmul.mubr.msk.bf16.gmra.mxu0 %vm281_vm1, %v3003_v56  ;;  %v2790_v56 = vld [vmem:[%s3664_s1 + $0x414] ss:$8 sps:$4 sm:$0xff]  }
  0x86   : > { %1553 = vmatpush1.bf16.msra.mxu0 %v2773_v18  ;;  %2500 = vmatmul.mubr.msk.bf16.gmra.mxu1 %vm281_vm1, %v3110_v32  ;;  %v2785_v32 = vld [vmem:[%s3664_s1 + $0x3a0] ss:$8 sps:$4 sm:$0xff]  }
  0x87   : > { %1715 = vmatpush1.bf16.msra.mxu1 %v2776_v44  ;;  %1554 = vmatprep.subr.bf16.mxu0 %v2781_v45 }
  0x88   : > { %1716 = vmatprep.subr.bf16.mxu1 %v2784_v46  ;;  %1578 = vmatprep.mubr.bf16.mxu0 %v2811_v3 }
  0x89   : > { %1740 = vmatprep.mubr.bf16.mxu1 %v2811_v3 }
  0x8a   : > { %1555 = vmatpush1.bf16.msra.mxu0 %v2779_v47 }
  0x8b   : > { %1717 = vmatpush1.bf16.msra.mxu1 %v2782_v48  ;;  %1556 = vmatprep.subr.bf16.mxu0 %v2787_v49 }
  0x8c   : > { %1718 = vmatprep.subr.bf16.mxu1 %v2790_v56 }
  0x8e   : > { %1557 = vmatpush1.bf16.msra.mxu0 %v2785_v32 }
  0x8f   : > { %1719 = vmatpush1.bf16.msra.mxu1 %v2788_v50  ;;  %1558 = vmatprep.subr.bf16.mxu0 %v2793_v51 }
  0x90   : > { %1720 = vmatprep.subr.bf16.mxu1 %v2796_v52  ;;  %v1798_v52 = vlaneseq }
  0x92   : > { %1559 = vmatpush1.bf16.msra.mxu0 %v2791_v54 }
  0x93   : > { %1721 = vmatpush1.bf16.msra.mxu1 %v2794_v55  ;;  %1560 = vmatprep.subr.bf16.mxu0 %v2799_v57  ;;  %v1799_v57 = vshrl.u32 %v1798_v52, 7 }
  0x94   : > { %1722 = vmatprep.subr.bf16.mxu1 %v2802_v58 }
  0x96   : > { %1561 = vmatpush1.bf16.msra.mxu0 %v2797_v59 }
  0x97   : > { %1723 = vmatpush1.bf16.msra.mxu1 %v2800_v60  ;;  %v3465_v60 = vsub.s32 0, %v1799_v57 }
  0x99   : > { %2530 = vmatmul.mubr.msk.bf16.vlgmr.msra.gmra.mxu0 %vm281_vm1, %v3077_v19  ;;  %3674 = vst [vmem:[#allocation6_spill] sm:$0xff] %v3465_v60 }
  0x9a   : > { %2561 = vmatmul.mubr.msk.bf16.vlgmr.msra.gmra.mxu1 %vm281_vm1, %v3189_v62  ;;  %1588 = vmatprep.mubr.bf16.mxu0 %v2811_v3 }
  0x9b   : > { %1750 = vmatprep.mubr.bf16.mxu1 %v2811_v3 }
  0xa1   : > { %2531 = vmatmul.mubr.msk.bf16.gmra.mxu0 %vm281_vm1, %v3119_v35 }
  0xa2   : > { %2562 = vmatmul.mubr.msk.bf16.gmra.mxu1 %vm281_vm1, %v3220_v9 }
  0xe9   : > { %v3393_v61 = vpop.f32.mrf.mxu0 }
  0xea   : > { %v3395_v63 = vpop.f32.mrf.mxu1 }
  0xeb   : > { %v3397_v0 = vpop.f32.mrf.mxu0 }
  0xec   : > { %v3399_v19 = vpop.f32.mrf.mxu1 }
  0xed   : > { %v3401_v1 = vpop.f32.mrf.mxu0 }
  0xee   : > { %v3403_v62 = vpop.f32.mrf.mxu1 }
  0xef   : > { %v3405_v2 = vpop.f32.mrf.mxu0 }
  0xf0   : > { %v3407_v3 = vpop.f32.mrf.mxu1 }
  0xf1   : > { %v339_v35 = vpop.f32.mrf.mxu0 }
  0xf2   : > { %v472_v4 = vpop.f32.mrf.mxu1 }
  0xf3   : > { %v473_v5 = vadd.f32 %v472_v4, %v339_v35  ;;  %v341_v6 = vpop.f32.mrf.mxu0  ;;  %v1953_v35 = vsub.s32 1, %v1799_v57 }
  0xf4   : > { %v474_v7 = vpop.f32.mrf.mxu1 }
  0xf5   : > { %v3409_v8 = vadd.f32 %v474_v7, %v341_v6  ;;  %v343_v39 = vpop.f32.mrf.mxu0  ;;  %v2812_v7 = vmov 1983009808  }
  0xf6   : > { %v476_v9 = vpop.f32.mrf.mxu1 }
  0xf7   : > { %v477_v10 = vadd.f32 %v476_v9, %v343_v39  ;;  %v345_v11 = vpop.f32.mrf.mxu0  ;;  %v1796_v39 = vunpack.c.l.s4 %v2812_v7 }
  0xf8   : > { %v478_v12 = vpop.f32.mrf.mxu1 }
  0xf9   : > { %v3411_v13 = vadd.f32 %v478_v12, %v345_v11 }
 0x105   : > { %v3413_v14 = vpop.f32.mrf.mxu0 }
 0x106   : > { %v3415_v15 = vpop.f32.mrf.mxu1 }
 0x107   : > { %v3417_v16 = vpop.f32.mrf.mxu0 }
 0x108   : > { %v3419_v17 = vpop.f32.mrf.mxu1 }
 0x109   : > { %v3421_v53 = vpop.f32.mrf.mxu0 }
 0x10a   : > { %v3423_v20 = vpop.f32.mrf.mxu1 }
 0x10b   : > { %v3425_v21 = vpop.f32.mrf.mxu0 }
 0x10c   : > { %v3427_v22 = vpop.f32.mrf.mxu1 }
 0x10d   : > { %v626_v23 = vpop.f32.mrf.mxu0 }
 0x10e   : > { %v639_v24 = vadd.f32 %v626_v23, %v473_v5  ;;  %v788_v25 = vpop.f32.mrf.mxu1  ;;  %v1945_v5 = vld [vmem:[%s3665_s2] sm:$0x3]  ;;  %v1797_v23 = vunpack.c.0.s8 %v1796_v39 }
 0x10f   : > { %v3429_v26 = vpop.f32.mrf.mxu0  ;;  %v1950_v9 = vrot.slane %v1945_v5, %v3465_v60 }
 0x110   : > { %v3431_v27 = vadd.f32 %v788_v25, %v639_v24  ;;  %v3433_v28 = vpop.f32.mrf.mxu1 }
 0x111   : > { %v630_v29 = vpop.f32.mrf.mxu0 }
 0x112   : > { %v641_v30 = vadd.f32 %v630_v29, %v477_v10  ;;  %v792_v31 = vpop.f32.mrf.mxu1  ;;  %v1954_v10 = vrot.slane %v1945_v5, %v1953_v35  ;;  %v463_v35 = vadd.f32 %v3395_v63, %v3393_v61  ;;  %v465_v5 = vadd.f32 %v3399_v19, %v3397_v0 }
 0x113   : > { %v3437_v34 = vpop.f32.mrf.mxu0 }
 0x114   : > { %v3435_v33 = vadd.f32 %v792_v31, %v641_v30  ;;  %v3439_v36 = vpop.f32.mrf.mxu1  ;;  %v1955_v25 = vcombine.low %v1950_v9, %v1954_v10  ;;  %v3473_v30 = vsub.s32 %v1797_v23, %v1799_v57  ;;  %v636_v61 = vadd.f32 %v3417_v16, %v465_v5 }
 0x116   : > { %3671 = vst [vmem:[#allocation3_spill] sm:$0xff] %v3435_v33  ;;  %3675 = vst [vmem:[#allocation7_spill] sm:$0xff] %v3473_v30  ;;  %v3478_v52 = vrot.slane %v1955_v25, %v3473_v30 }
 0x118   : > { %v3488_v39 = vcombine.high %v3478_v52, %v3478_v52 }
 0x121   : > { %v3441_v37 = vpop.f32.mrf.mxu0 }
 0x122   : > { %v1131_v38 = vpop.f32.mrf.mxu1 }
 0x123   : > { %v3443_v41 = vpop.f32.mrf.mxu0 }
 0x124   : > { %v1133_v42 = vpop.f32.mrf.mxu1 }
 0x125   : > { %v3445_v43 = vpop.f32.mrf.mxu0 }
 0x126   : > { %v1135_v40 = vpop.f32.mrf.mxu1 }
 0x127   : > { %v3447_v18 = vpop.f32.mrf.mxu0 }
 0x128   : > { %v1137_v44 = vpop.f32.mrf.mxu1 }
 0x129   : > { %v3449_v45 = vpop.f32.mrf.mxu0 }
 0x12a   : > { %v3451_v46 = vpop.f32.mrf.mxu1 }
 0x12b   : > { %v3453_v47 = vpop.f32.mrf.mxu0 }
 0x12c   : > { %v3455_v48 = vpop.f32.mrf.mxu1 }
 0x12d   : > { %v3457_v49 = vpop.f32.mrf.mxu0 }
 0x12e   : > { %3672 = vst [vmem:[#allocation4_spill] sm:$0xff] %v3457_v49  ;;  %v3459_v56 = vpop.f32.mrf.mxu1 }
 0x12f   : > { %v3461_v32 = vpop.f32.mrf.mxu0 }
 0x130   : > { %3673 = vst [vmem:[#allocation5_spill] sm:$0xff] %v3461_v32  ;;  %v3463_v50 = vpop.f32.mrf.mxu1  ;;  %v1956_v32 = vcombine.high %v1950_v9, %v1954_v10  ;;  %v467_v9 = vadd.f32 %v3403_v62, %v3401_v1  ;;  %v1974_v1 = vrot.slane %v3488_v39, 1  ;;  %v3503_v62 = vsub.s32 2, %v1799_v57 }
 0x132   : > { %v3491_v23 = vrot.slane %v1956_v32, %v3473_v30  ;;  %v637_v0 = vadd.f32 %v3421_v53, %v467_v9  ;;  %v1973_v32 = vrot.slane %v3478_v52, 1 }
 0x13d   : > { %v1264_v51 = vpop.f32.mrf.mxu0 }
 0x13e   : > { %v1418_v54 = vpop.f32.mrf.mxu1  ;;  %v1265_v7 = vadd.f32 %v1264_v51, %v1131_v38  ;;  %v469_v38 = vadd.f32 %v3407_v3, %v3405_v2  ;;  %v635_v51 = vadd.f32 %v3413_v14, %v463_v35  ;;  %v3507_v2 = vcombine.high %v3491_v23, %v3491_v23 }
 0x13f   : > { %v1266_v55 = vpop.f32.mrf.mxu0 }
 0x140   : > { %v1420_v58 = vpop.f32.mrf.mxu1  ;;  %v1267_v10 = vadd.f32 %v1266_v55, %v1133_v42  ;;  %v1437_v19 = vadd.f32 %v1418_v54, %v1265_v7  ;;  %v1975_v42 = vrot.slane %v3491_v23, 1  ;;  %v798_v54 = vadd.f32 %v3419_v17, %v636_v61 }
 0x141   : > { %v1268_v59 = vpop.f32.mrf.mxu0  ;;  %v642_v55 = vadd.f32 %v3437_v34, %v3411_v13 }
 0x142   : > { %v1422_v4 = vpop.f32.mrf.mxu1  ;;  %v1269_v25 = vadd.f32 %v1268_v59, %v1135_v40  ;;  %v1438_v3 = vadd.f32 %v1420_v58, %v1267_v10  ;;  %v797_v40 = vadd.f32 %v3415_v15, %v635_v51  ;;  %v799_v59 = vadd.f32 %v3423_v20, %v637_v0 }
 0x143   : > { %v1270_v6 = vpop.f32.mrf.mxu0  ;;  %v960_v15 = vadd.f32 %v3443_v41, %v798_v54 }
 0x144   : > { %v1424_v11 = vpop.f32.mrf.mxu1  ;;  %v1271_v14 = vadd.f32 %v1270_v6, %v1137_v44  ;;  %v1439_v7 = vadd.f32 %v1422_v4, %v1269_v25  ;;  %v959_v35 = vadd.f32 %v3441_v37, %v797_v40  ;;  %v3524_v4 = vadd.f32 %v3439_v36, %v642_v55 }
 0x145   : > { %v1274_v12 = vpop.f32.mrf.mxu0  ;;  %v1976_v37 = vrot.slane %v3507_v2, 1 }
 0x146   : > { %v3471_v24 = vpop.f32.mrf.mxu1  ;;  %v1275_v17 = vadd.f32 %v1274_v12, %v3451_v46 }
 0x147   : > { %v1276_v29 = vpop.f32.mrf.mxu0 }
 0x148   : > { %v3475_v31 = vpop.f32.mrf.mxu1 }
 0x149   : > { %v1278_v49 = vpop.f32.mrf.mxu0 }
 0x14a   : > { %v3480_v33 = vpop.f32.mrf.mxu1 }
 0x14b   : > { %3676 = vst [vmem:[#allocation8_spill] sm:$0xff] %v3480_v33  ;;  %v1280_v63 = vpop.f32.mrf.mxu0  ;;  %v638_v33 = vadd.f32 %v3425_v21, %v469_v38  ;;  %v640_v21 = vadd.f32 %v3429_v26, %v3409_v8  ;;  %v1440_v8 = vadd.f32 %v1424_v11, %v1271_v14  ;;  %v1277_v26 = vadd.f32 %v1276_v29, %v3455_v48  ;;  %v3678_v14 = vld [vmem:[#allocation4_spill] sm:$0xff] }
 0x14c   : > { %v1434_v60 = vpop.f32.mrf.mxu1  ;;  %v1441_v48 = vadd.f32 %v3471_v24, %v1275_v17  ;;  %v1279_v29 = vadd.f32 %v1278_v49, %v3459_v56 }
 0x14d   : > { %v802_v20 = vadd.f32 %v3433_v28, %v640_v21  ;;  %v1281_v28 = vadd.f32 %v1280_v63, %v3463_v50  ;;  %v1442_v51 = vadd.f32 %v3475_v31, %v1277_v26  ;;  %v3679_v50 = vld [vmem:[#allocation7_spill] sm:$0xff] }
 0x14f   : > { %v964_v25 = vadd.f32 %v3453_v47, %v802_v20  ;;  %v3543_v21 = vadd.f32 %v1434_v60, %v1281_v28 }
 0x152   : > { %v3680_v40 = vld [vmem:[#allocation8_spill] sm:$0xff] }
 0x153   : > { %v1443_v54 = vadd.f32 %v3680_v40, %v1279_v29 }
 0x159   : > { %v1580_v30 = vpop.f32.mrf.mxu0 }
 0x15a   : > { %v1599_v16 = vadd.f32 %v1580_v30, %v1437_v19  ;;  %v1742_v53 = vpop.f32.mrf.mxu1  ;;  %v800_v30 = vadd.f32 %v3427_v22, %v638_v33  ;;  %v961_v22 = vadd.f32 %v3445_v43, %v799_v59 }
 0x15b   : > { %v1582_v57 = vpop.f32.mrf.mxu0 }
 0x15c   : > { %v1761_v58 = vadd.f32 %v1742_v53, %v1599_v16  ;;  %v1600_v44 = vadd.f32 %v1582_v57, %v1438_v3  ;;  %v1744_v6 = vpop.f32.mrf.mxu1  ;;  %v962_v41 = vadd.f32 %v3447_v18, %v800_v30  ;;  %v963_v18 = vadd.f32 %v3449_v45, %v3431_v27  ;;  %v3677_v3 = vld [vmem:[#allocation3_spill] sm:$0xff] }
 0x15d   : > { %v1584_v5 = vpop.f32.mrf.mxu0  ;;  %v3538_v24 = vadd.f32 %v3678_v14, %v3677_v3 }
 0x15e   : > { %v1762_v13 = vadd.f32 %v1744_v6, %v1600_v44  ;;  %v1601_v34 = vadd.f32 %v1584_v5, %v1439_v7  ;;  %v1746_v9 = vpop.f32.mrf.mxu1  ;;  %v1777_v46 = vmax.f32 %v959_v35, %v1761_v58 }
 0x15f   : > { %v1586_v33 = vpop.f32.mrf.mxu0 }
 0x160   : > { %v1778_v12 = vmax.f32 %v960_v15, %v1762_v13  ;;  %v1602_v11 = vadd.f32 %v1586_v33, %v1440_v8  ;;  %v1748_v10 = vpop.f32.mrf.mxu1  ;;  %v1763_v38 = vadd.f32 %v1746_v9, %v1601_v34 }
 0x161   : > { %v1590_v36 = vpop.f32.mrf.mxu0 }
 0x162   : > { %v1793_v43 = vcombine.low %v1777_v46, %v1778_v12  ;;  %v1794_v61 = vcombine.high %v1777_v46, %v1778_v12  ;;  %v1764_v0 = vadd.f32 %v1748_v10, %v1602_v11  ;;  %v1752_v19 = vpop.f32.mrf.mxu1  ;;  %v1603_v49 = vadd.f32 %v1590_v36, %v1441_v48 }
 0x163   : > { %v1592_v56 = vpop.f32.mrf.mxu0  ;;  %v1779_v55 = vmax.f32 %v961_v22, %v1763_v38 }
 0x164   : > { %v1801_v63 = vrot.slane %v1793_v43, %v3679_v50  ;;  %v1808_v16 = vrot.slane %v1794_v61, %v3679_v50  ;;  %v1780_v31 = vmax.f32 %v962_v41, %v1764_v0  ;;  %v1604_v53 = vadd.f32 %v1592_v56, %v1442_v51  ;;  %v1754_v7 = vpop.f32.mrf.mxu1 }
 0x165   : > { %v1765_v27 = vadd.f32 %v1752_v19, %v1603_v49  ;;  %v1594_v58 = vpop.f32.mrf.mxu0  ;;  %v3681_v19 = vld [vmem:[#allocation6_spill] sm:$0xff] }
 0x166   : > { %v1809_v45 = vcombine.high %v1801_v63, %v1801_v63  ;;  %v1810_v47 = vcombine.high %v1808_v16, %v1808_v16  ;;  %v2563_v57 = vrot.slane %v1801_v63, 9  ;;  %v2565_v59 = vrot.slane %v1808_v16, 9 }
 0x167   : > { %v1811_v44 = vcombine.low %v1779_v55, %v1780_v31  ;;  %v1812_v6 = vcombine.high %v1779_v55, %v1780_v31  ;;  %v3545_v30 = vmax.f32 %v963_v18, %v1765_v27  ;;  %v1766_v35 = vadd.f32 %v1754_v7, %v1604_v53 }
 0x168   : > { %v2564_v15 = vrot.slane %v1809_v45, 9  ;;  %v2566_v17 = vrot.slane %v1810_v47, 9  ;;  %v1929_v5 = vmax.f32 %v1801_v63, %v2563_v57  ;;  %v1931_v8 = vmax.f32 %v1808_v16, %v2565_v59 }
 0x169   : > { %v1819_v60 = vrot.slane %v1811_v44, %v3679_v50  ;;  %v1826_v26 = vrot.slane %v1812_v6, %v3679_v50  ;;  %v3549_v13 = vmax.f32 %v964_v25, %v1766_v35  ;;  %v3551_v34 = vadd.f32 %v1594_v58, %v1443_v54 }
 0x16a   : > { %v1930_v9 = vmax.f32 %v1809_v45, %v2564_v15  ;;  %v1932_v20 = vmax.f32 %v1810_v47, %v2566_v17  ;;  %v1985_v22 = vadd.f32 %v3478_v52, %v1929_v5  ;;  %v1987_v33 = vadd.f32 %v3488_v39, %v1931_v8 }
 0x16b   : > { %v1827_v41 = vcombine.high %v1819_v60, %v1819_v60  ;;  %v1828_v46 = vcombine.high %v1826_v26, %v1826_v26  ;;  %v2567_v12 = vrot.slane %v1819_v60, 9  ;;  %v2569_v11 = vrot.slane %v1826_v26, 9 }
 0x16c   : > { %v1986_v10 = vadd.f32 %v1973_v32, %v1930_v9  ;;  %v1988_v48 = vadd.f32 %v1974_v1, %v1932_v20  ;;  %v2001_v29 = vmax.f32 %v1985_v22, 0.0  ;;  %v2003_v28 = vmax.f32 %v1987_v33, 0.0 }
 0x16d   : > { %v2568_v38 = vrot.slane %v1827_v41, 9  ;;  %v2570_v36 = vrot.slane %v1828_v46, 9  ;;  %v1933_v51 = vmax.f32 %v1819_v60, %v2567_v12  ;;  %v1935_v43 = vmax.f32 %v1826_v26, %v2569_v11 }
 0x16e   : > { %v2002_v61 = vmax.f32 %v1986_v10, 0.0  ;;  %v2004_v0 = vmax.f32 %v1988_v48, 0.0  ;;  %v2036_v18 = vrot.slane %v2001_v29, %v3681_v19  ;;  %v2040_v25 = vrot.slane %v2001_v29, %v3503_v62 }
 0x16f   : > { %v2052_v3 = vrot.slane %v2003_v28, %v3681_v19  ;;  %v2056_v14 = vrot.slane %v2003_v28, %v3503_v62  ;;  %v1934_v49 = vmax.f32 %v1827_v41, %v2568_v38  ;;  %v1936_v56 = vmax.f32 %v1828_v46, %v2570_v36  ;;  %v1756_v41 = vpop.f32.mrf.mxu1 }
 0x170   : > { %v2044_v63 = vrot.slane %v2002_v61, %v3681_v19  ;;  %v2048_v16 = vrot.slane %v2002_v61, %v3503_v62  ;;  %v2060_v31 = vrot.slane %v2004_v0, %v3681_v19  ;;  %v2064_v53 = vrot.slane %v2004_v0, %v3503_v62 }
 0x171   : > { %v1989_v40 = vadd.f32 %v3491_v23, %v1933_v51  ;;  %v1990_v54 = vadd.f32 %v1975_v42, %v1934_v49  ;;  %v1991_v55 = vadd.f32 %v3507_v2, %v1935_v43  ;;  %v1992_v27 = vadd.f32 %v1976_v37, %v1936_v56  ;;  %v3682_v49 = vld [vmem:[#allocation5_spill] sm:$0xff] }
 0x172   : > { %v2162_v45 = vsel %vm2161_vm2, %v2044_v63, %v2036_v18  ;;  %v2175_v47 = vsel %vm2161_vm2, %v2048_v16, %v2040_v25  ;;  %v1829_v57 = vcombine.low %v3545_v30, %v3549_v13  ;;  %v1830_v59 = vcombine.high %v3545_v30, %v3549_v13  ;;  %v1596_v13 = vpop.f32.mrf.mxu0 }
 0x173   : > { %v2164_v7 = vsel %vm2163_vm3, %v2052_v3, %v2162_v45  ;;  %v2176_v58 = vsel %vm2163_vm3, %v2056_v14, %v2175_v47  ;;  %v2005_v44 = vmax.f32 %v1989_v40, 0.0  ;;  %v2006_v6 = vmax.f32 %v1990_v54, 0.0  ;;  %v1758_v14 = vpop.f32.mrf.mxu1 }
 0x174   : > { %v2166_v35 = vsel %vm2165_vm4, %v2060_v31, %v2164_v7  ;;  %v2177_v15 = vsel %vm2165_vm4, %v2064_v53, %v2176_v58  ;;  %v2007_v17 = vmax.f32 %v1991_v55, 0.0  ;;  %v2008_v5 = vmax.f32 %v1992_v27, 0.0 }
 0x175   : > { %v2068_v8 = vrot.slane %v2005_v44, %v3681_v19  ;;  %v2072_v60 = vrot.slane %v2005_v44, %v3503_v62  ;;  %v2076_v26 = vrot.slane %v2006_v6, %v3681_v19  ;;  %v2080_v30 = vrot.slane %v2006_v6, %v3503_v62 }
 0x176   : > { %v2084_v9 = vrot.slane %v2007_v17, %v3681_v19  ;;  %v2088_v20 = vrot.slane %v2007_v17, %v3503_v62  ;;  %v2092_v22 = vrot.slane %v2008_v5, %v3681_v19  ;;  %v2096_v33 = vrot.slane %v2008_v5, %v3503_v62 }
 0x177   : > { %v2168_v46 = vsel %vm2167_vm5, %v2068_v8, %v2166_v35  ;;  %v2178_v12 = vsel %vm2167_vm5, %v2072_v60, %v2177_v15  ;;  %v1837_v11 = vrot.slane %v1829_v57, %v3679_v50  ;;  %v1844_v10 = vrot.slane %v1830_v59, %v3679_v50 }
 0x178   : > { %v2170_v48 = vsel %vm2169_vm6, %v2076_v26, %v2168_v46  ;;  %v2179_v29 = vsel %vm2169_vm6, %v2080_v30, %v2178_v12  ;;  %v1767_v28 = vadd.f32 %v1756_v41, %v3551_v34  ;;  %v1606_v38 = vadd.f32 %v1596_v13, %v3543_v21 }
 0x179   : > { %v2172_v36 = vsel %vm2171_vm7, %v2084_v9, %v2170_v48  ;;  %v2180_v51 = vsel %vm2171_vm7, %v2088_v20, %v2179_v29  ;;  %v1845_v43 = vcombine.high %v1837_v11, %v1837_v11  ;;  %v1846_v61 = vcombine.high %v1844_v10, %v1844_v10 }
 0x17a   : > { %v2174_v0 = vsel %vm2173_vm8, %v2092_v22, %v2172_v36  ;;  %v2181_v18 = vsel %vm2173_vm8, %v2096_v33, %v2180_v51  ;;  %v2571_v25 = vrot.slane %v1837_v11, 9  ;;  %v2573_v3 = vrot.slane %v1844_v10, 9 }
 0x17b   : > { %v966_v56 = vadd.f32 %v3682_v49, %v3524_v4  ;;  %2200 = vst [vmem:[%s3599_s5] sm:$0xff] %v2174_v0  ;;  %2201 = vst [vmem:[%s3599_s5 + $0x8] sm:$0xff] %v2181_v18  ;;  %v2572_v34 = vrot.slane %v1845_v43, 9  ;;  %v2574_v21 = vrot.slane %v1846_v61, 9  ;;  %v1768_v63 = vadd.f32 %v1758_v14, %v1606_v38 }
 0x17c   : > { %v1937_v16 = vmax.f32 %v1837_v11, %v2571_v25  ;;  %v1939_v31 = vmax.f32 %v1844_v10, %v2573_v3  ;;  %v1783_v54 = vmax.f32 %v3538_v24, %v1767_v28 }
 0x17d   : > { %v1938_v53 = vmax.f32 %v1845_v43, %v2572_v34  ;;  %v1940_v40 = vmax.f32 %v1846_v61, %v2574_v21  ;;  %v1784_v55 = vmax.f32 %v966_v56, %v1768_v63 }
 0x17e   : > { %v1993_v27 = vadd.f32 %v3478_v52, %v1937_v16  ;;  %v1995_v45 = vadd.f32 %v3488_v39, %v1939_v31 }
 0x17f   : > { %v1994_v47 = vadd.f32 %v1973_v32, %v1938_v53  ;;  %v1996_v4 = vadd.f32 %v1974_v1, %v1940_v40  ;;  %v1847_v57 = vcombine.low %v1783_v54, %v1784_v55  ;;  %v1848_v59 = vcombine.high %v1783_v54, %v1784_v55 }
 0x180   : > { %v2009_v7 = vmax.f32 %v1993_v27, 0.0  ;;  %v2011_v58 = vmax.f32 %v1995_v45, 0.0 }
 0x181   : > { %v2010_v44 = vmax.f32 %v1994_v47, 0.0  ;;  %v2012_v6 = vmax.f32 %v1996_v4, 0.0  ;;  %v1855_v35 = vrot.slane %v1847_v57, %v3679_v50  ;;  %v1862_v24 = vrot.slane %v1848_v59, %v3679_v50 }
 0x182   : > { %v2100_v15 = vrot.slane %v2009_v7, %v3681_v19  ;;  %v2104_v17 = vrot.slane %v2009_v7, %v3503_v62  ;;  %v2116_v39 = vrot.slane %v2011_v58, %v3681_v19  ;;  %v2120_v1 = vrot.slane %v2011_v58, %v3503_v62 }
 0x183   : > { %v2108_v52 = vrot.slane %v2010_v44, %v3681_v19  ;;  %v2112_v32 = vrot.slane %v2010_v44, %v3503_v62  ;;  %v1863_v5 = vcombine.high %v1855_v35, %v1855_v35  ;;  %v1864_v8 = vcombine.high %v1862_v24, %v1862_v24 }
 0x184   : > { %v2575_v60 = vrot.slane %v1855_v35, 9  ;;  %v2577_v26 = vrot.slane %v1862_v24, 9  ;;  %v2124_v30 = vrot.slane %v2012_v6, %v3681_v19  ;;  %v2128_v50 = vrot.slane %v2012_v6, %v3503_v62 }
 0x185   : > { %v2182_v13 = vsel %vm2161_vm2, %v2108_v52, %v2100_v15  ;;  %v2189_v9 = vsel %vm2161_vm2, %v2112_v32, %v2104_v17  ;;  %v2576_v33 = vrot.slane %v1863_v5, 9  ;;  %v2578_v41 = vrot.slane %v1864_v8, 9 }
 0x186   : > { %v2183_v20 = vsel %vm2163_vm3, %v2116_v39, %v2182_v13  ;;  %v2190_v22 = vsel %vm2163_vm3, %v2120_v1, %v2189_v9  ;;  %v1941_v11 = vmax.f32 %v1855_v35, %v2575_v60  ;;  %v1943_v10 = vmax.f32 %v1862_v24, %v2577_v26 }
 0x187   : > { %v2184_v46 = vsel %vm2165_vm4, %v2124_v30, %v2183_v20  ;;  %v2191_v12 = vsel %vm2165_vm4, %v2128_v50, %v2190_v22  ;;  %v1942_v48 = vmax.f32 %v1863_v5, %v2576_v33  ;;  %v1944_v29 = vmax.f32 %v1864_v8, %v2578_v41 }
 0x188   : > { %v1997_v28 = vadd.f32 %v3491_v23, %v1941_v11  ;;  %v1999_v38 = vadd.f32 %v3507_v2, %v1943_v10 }
 0x189   : > { %v1998_v36 = vadd.f32 %v1975_v42, %v1942_v48  ;;  %v2000_v51 = vadd.f32 %v1976_v37, %v1944_v29 }
 0x18a   : > { %v2013_v43 = vmax.f32 %v1997_v28, 0.0  ;;  %v2015_v61 = vmax.f32 %v1999_v38, 0.0 }
 0x18b   : > { %v2014_v0 = vmax.f32 %v1998_v36, 0.0  ;;  %v2016_v18 = vmax.f32 %v2000_v51, 0.0 }
 0x18c   : > { %v2132_v25 = vrot.slane %v2013_v43, %v3681_v19  ;;  %v2136_v3 = vrot.slane %v2013_v43, %v3503_v62  ;;  %v2148_v23 = vrot.slane %v2015_v61, %v3681_v19  ;;  %v2152_v42 = vrot.slane %v2015_v61, %v3503_v62 }
 0x18d   : > { %v2140_v14 = vrot.slane %v2014_v0, %v3681_v19  ;;  %v2144_v49 = vrot.slane %v2014_v0, %v3503_v62  ;;  %v2156_v56 = vrot.slane %v2016_v18, %v3681_v19  ;;  %v2160_v34 = vrot.slane %v2016_v18, %v3503_v62 }
 0x18e   : > { %v2185_v2 = vsel %vm2167_vm5, %v2132_v25, %v2184_v46  ;;  %v2192_v37 = vsel %vm2167_vm5, %v2136_v3, %v2191_v12 }
 0x18f   : > { %v2186_v21 = vsel %vm2169_vm6, %v2140_v14, %v2185_v2  ;;  %v2193_v63 = vsel %vm2169_vm6, %v2144_v49, %v2192_v37 }
 0x190   : > { %v2187_v16 = vsel %vm2171_vm7, %v2148_v23, %v2186_v21  ;;  %v2194_v31 = vsel %vm2171_vm7, %v2152_v42, %v2193_v63 }
 0x191   : > { %v2188_v53 = vsel %vm2173_vm8, %v2156_v56, %v2187_v16  ;;  %v2195_v40 = vsel %vm2173_vm8, %v2160_v34, %v2194_v31 }
 0x192   : > { %2202 = vst [vmem:[%s3599_s5 + $0x10] sm:$0xff] %v2188_v53  ;;  %2203 = vst [vmem:[%s3599_s5 + $0x18] sm:$0xff] %v2195_v40 }
 0x193 PF: > { %s13_s12 = sadd.s32 1, %s2809_s12  }
 0x194   : > { %p10_p4 = scmp.ge.s32.totalorder %s13_s12, 4  }
 0x196   :  { %12 = sbr.rel (!%p10_p4) target bundleno = 1 (0x1), region = 71 }

// kernel: net_forward.5
= control target key start
LH: loop header
LB: loop body
LE: loop exit
PB: predicated region body
PF: predicated region fallthrough
CT: control target
= control target key end

     0   :  { %v40_v28 = vlaneseq  ;;  %v2283_v36 = vmov 1983009808   ;;  %s2811_s0 = inlined_call_operand.vmem [shape: f32[2,2048], index: 0, kind: input, shape index: {}]   ;;  %s2812_s1 = inlined_call_operand.vmem [shape: bf16[2048,128], index: 1, kind: input, shape index: {}]   ;;  %s2813_s2 = inlined_call_operand.vmem [shape: f32[1,128], index: 2, kind: input, shape index: {}]   ;;  %s2814_s3 = inlined_call_operand.vmem [shape: bf16[128,128], index: 3, kind: input, shape index: {}]   ;;  %s2815_s4 = inlined_call_operand.vmem [shape: f32[1,128], index: 4, kind: input, shape index: {}]   ;;  %s2816_s5 = inlined_call_operand.vmem [shape: bf16[128,128], index: 5, kind: input, shape index: {}]   ;;  %s2817_s6 = inlined_call_operand.vmem [shape: f32[1,128], index: 6, kind: input, shape index: {}]   ;;  %s2818_s7 = inlined_call_operand.hbm [shape: f32[2,128], index: 7, kind: output, shape index: {}]  }
   0x1   :  { %v2113_v0 = vld [vmem:[%s2812_s1 + $0x78] sm:$0xff]   ;;  %v2117_v4 = vld [vmem:[%s2812_s1 + $0x70] sm:$0xff]   ;;  %v2121_v8 = vld [vmem:[%s2812_s1 + $0x68] sm:$0xff]   ;;  %v38_v37 = vunpack.c.l.s4 %v2283_v36 }
   0x2   :  { %v2114_v1 = vld [vmem:[%s2812_s1 + $0xf8] sm:$0xff]   ;;  %1875 = vmatprep.subr.bf16.mxu0 %v2113_v0  ;;  %v2118_v5 = vld [vmem:[%s2812_s1 + $0xf0] sm:$0xff]   ;;  %v2122_v9 = vld [vmem:[%s2812_s1 + $0xe8] sm:$0xff]   ;;  %v41_v33 = vshrl.u32 %v40_v28, 7 }
   0x3   :  { %v2115_v2 = vld [vmem:[%s2812_s1 + $0x38] sm:$0xff]   ;;  %1897 = vmatprep.subr.bf16.mxu1 %v2114_v1  ;;  %v2119_v6 = vld [vmem:[%s2812_s1 + $0x30] sm:$0xff]   ;;  %v2123_v10 = vld [vmem:[%s2812_s1 + $0x28] sm:$0xff]   ;;  %v39_v39 = vunpack.c.0.s8 %v38_v37 }
   0x4   :  { %v2116_v3 = vld [vmem:[%s2812_s1 + $0xb8] sm:$0xff]   ;;  %1876 = vmatpush3.bf16.msra.mxu0 %v2115_v2  ;;  %v2120_v7 = vld [vmem:[%s2812_s1 + $0xb0] sm:$0xff]   ;;  %v2124_v11 = vld [vmem:[%s2812_s1 + $0xa8] sm:$0xff]  }
   0x5   :  { %1898 = vmatpush3.bf16.msra.mxu1 %v2116_v3  ;;  %1877 = vmatprep.subr.bf16.mxu0 %v2117_v4  ;;  %v2125_v12 = vld [vmem:[%s2812_s1 + $0x60] sm:$0xff]   ;;  %v2129_v16 = vld [vmem:[%s2812_s1 + $0x58] sm:$0xff]   ;;  %v2133_v20 = vld [vmem:[%s2812_s1 + $0x50] sm:$0xff]   ;;  %v2432_v41 = vsub.s32 %v39_v39, %v41_v33 }
   0x6   :  { %1899 = vmatprep.subr.bf16.mxu1 %v2118_v5  ;;  %v2126_v13 = vld [vmem:[%s2812_s1 + $0xe0] sm:$0xff]   ;;  %v2130_v17 = vld [vmem:[%s2812_s1 + $0xd8] sm:$0xff]   ;;  %v2134_v21 = vld [vmem:[%s2812_s1 + $0xd0] sm:$0xff]  }
   0x7   :  { %v2127_v14 = vld [vmem:[%s2812_s1 + $0x20] sm:$0xff]   ;;  %v2131_v18 = vld [vmem:[%s2812_s1 + $0x18] sm:$0xff]   ;;  %v2135_v22 = vld [vmem:[%s2812_s1 + $0x10] sm:$0xff]  }
   0x8   :  { %1878 = vmatpush3.bf16.msra.mxu0 %v2119_v6  ;;  %v2128_v15 = vld [vmem:[%s2812_s1 + $0xa0] sm:$0xff]   ;;  %v2132_v19 = vld [vmem:[%s2812_s1 + $0x98] sm:$0xff]   ;;  %v2136_v23 = vld [vmem:[%s2812_s1 + $0x90] sm:$0xff]  }
   0x9   :  { %1900 = vmatpush3.bf16.msra.mxu1 %v2120_v7  ;;  %1879 = vmatprep.subr.bf16.mxu0 %v2121_v8  ;;  %v2137_v24 = vld [vmem:[%s2812_s1 + $0x48] sm:$0xff]   ;;  %v2141_v29 = vld [vmem:[%s2812_s1 + $0x40] sm:$0xff]   ;;  %v2146_v35 = vld [vmem:[%s2812_s1 + $0x178] sm:$0xff]  }
   0xa   :  { %1901 = vmatprep.subr.bf16.mxu1 %v2122_v9  ;;  %v2138_v25 = vld [vmem:[%s2812_s1 + $0xc8] sm:$0xff]   ;;  %v2142_v30 = vld [vmem:[%s2812_s1 + $0xc0] sm:$0xff]   ;;  %v2147_v38 = vld [vmem:[%s2812_s1 + $0x1f8] sm:$0xff]  }
   0xb   :  { %v2139_v26 = vld [vmem:[%s2812_s1 + $0x8] sm:$0xff]   ;;  %v2143_v31 = vld [vmem:[%s2812_s1] sm:$0xff]   ;;  %v2148_v46 = vld [vmem:[%s2812_s1 + $0x138] sm:$0xff]  }
   0xc   :  { %1880 = vmatpush3.bf16.msra.mxu0 %v2123_v10  ;;  %v2140_v27 = vld [vmem:[%s2812_s1 + $0x88] sm:$0xff]   ;;  %v2144_v32 = vld [vmem:[%s2812_s1 + $0x80] sm:$0xff]   ;;  %v2149_v49 = vld [vmem:[%s2812_s1 + $0x1b8] sm:$0xff]  }
   0xd   :  { %1902 = vmatpush3.bf16.msra.mxu1 %v2124_v11  ;;  %1881 = vmatprep.subr.bf16.mxu0 %v2125_v12  ;;  %v28_v34 = vld [vmem:[%s2811_s0] sm:$0xff]  ;;  %v2150_v52 = vld [vmem:[%s2812_s1 + $0x170] sm:$0xff]   ;;  %v2154_v56 = vld [vmem:[%s2812_s1 + $0x168] sm:$0xff]  }
   0xe   :  { %1903 = vmatprep.subr.bf16.mxu1 %v2126_v13  ;;  %v36_v40 = vcombine.high %v28_v34, %v28_v34  ;;  %v43_v42 = vrot.slane %v28_v34, %v2432_v41  ;;  %v2151_v53 = vld [vmem:[%s2812_s1 + $0x1f0] sm:$0xff]   ;;  %v2155_v57 = vld [vmem:[%s2812_s1 + $0x1e8] sm:$0xff]   ;;  %v2158_v60 = vld [vmem:[%s2812_s1 + $0x160] sm:$0xff]  }
   0xf   :  { %v2152_v54 = vld [vmem:[%s2812_s1 + $0x130] sm:$0xff]   ;;  %v2156_v58 = vld [vmem:[%s2812_s1 + $0x128] sm:$0xff]   ;;  %v2159_v61 = vld [vmem:[%s2812_s1 + $0x1e0] sm:$0xff]  }
  0x10   :  { %1882 = vmatpush3.bf16.msra.mxu0 %v2127_v14  ;;  %v50_v43 = vrot.slane %v36_v40, %v2432_v41  ;;  %v51_v44 = vcombine.high %v43_v42, %v43_v42  ;;  %v120_v47 = vpack.c.bf16 %v43_v42, %v43_v42  ;;  %v2153_v55 = vld [vmem:[%s2812_s1 + $0x1b0] sm:$0xff]   ;;  %v2157_v59 = vld [vmem:[%s2812_s1 + $0x1a8] sm:$0xff]   ;;  %v2160_v62 = vld [vmem:[%s2812_s1 + $0x120] sm:$0xff]  }
  0x11   :  { %1904 = vmatpush3.bf16.msra.mxu1 %v2128_v15  ;;  %1883 = vmatprep.subr.bf16.mxu0 %v2129_v16  ;;  %v2161_v63 = vld [vmem:[%s2812_s1 + $0x1a0] sm:$0xff]   ;;  %v2162_v0 = vld [vmem:[%s2812_s1 + $0x158] sm:$0xff]   ;;  %v2166_v4 = vld [vmem:[%s2812_s1 + $0x150] sm:$0xff]  }
  0x12   :  { %1905 = vmatprep.subr.bf16.mxu1 %v2130_v17  ;;  %v52_v45 = vcombine.high %v50_v43, %v50_v43  ;;  %v122_v48 = vpack.c.bf16 %v50_v43, %v50_v43  ;;  %v121_v50 = vpack.c.bf16 %v51_v44, %v51_v44  ;;  %v2163_v1 = vld [vmem:[%s2812_s1 + $0x1d8] sm:$0xff]   ;;  %v2167_v5 = vld [vmem:[%s2812_s1 + $0x1d0] sm:$0xff]   ;;  %v2170_v8 = vld [vmem:[%s2812_s1 + $0x148] sm:$0xff]  }
  0x13   :  { %v2164_v2 = vld [vmem:[%s2812_s1 + $0x118] sm:$0xff]   ;;  %v2168_v6 = vld [vmem:[%s2812_s1 + $0x110] sm:$0xff]   ;;  %v2171_v9 = vld [vmem:[%s2812_s1 + $0x1c8] sm:$0xff]  }
  0x14   :  { %1884 = vmatpush3.bf16.msra.mxu0 %v2131_v18  ;;  %v123_v51 = vpack.c.bf16 %v52_v45, %v52_v45  ;;  %1199 = vmatprep.mubr.bf16.mxu0 %v121_v50  ;;  %v2165_v3 = vld [vmem:[%s2812_s1 + $0x198] sm:$0xff]   ;;  %v2169_v7 = vld [vmem:[%s2812_s1 + $0x190] sm:$0xff]   ;;  %v29_v10 = vld [vmem:[%s2811_s0 + $0x8] sm:$0xff] }
  0x15   :  { %1906 = vmatpush3.bf16.msra.mxu1 %v2132_v19  ;;  %1885 = vmatprep.subr.bf16.mxu0 %v2133_v20  ;;  %v2172_v11 = vld [vmem:[%s2812_s1 + $0x108] sm:$0xff]   ;;  %v60_v12 = vrot.slane %v29_v10, %v2432_v41  ;;  %v53_v13 = vcombine.high %v29_v10, %v29_v10  ;;  %v2174_v15 = vld [vmem:[%s2812_s1 + $0x140] sm:$0xff]   ;;  %v2186_v33 = vld [vmem:[%s2812_s1 + $0x2b0] sm:$0xff]  }
  0x16   :  { %1907 = vmatprep.subr.bf16.mxu1 %v2134_v21  ;;  %1239 = vmatprep.mubr.bf16.mxu1 %v123_v51  ;;  %v2173_v14 = vld [vmem:[%s2812_s1 + $0x188] sm:$0xff]   ;;  %v2175_v18 = vld [vmem:[%s2812_s1 + $0x1c0] sm:$0xff]   ;;  %v2195_v43 = vld [vmem:[%s2812_s1 + $0x258] sm:$0xff]  }
  0x17   :  { %v68_v16 = vcombine.high %v60_v12, %v60_v12  ;;  %v67_v17 = vrot.slane %v53_v13, %v2432_v41  ;;  %v2176_v19 = vld [vmem:[%s2812_s1 + $0x100] sm:$0xff]   ;;  %v2187_v34 = vld [vmem:[%s2812_s1 + $0x268] sm:$0xff]   ;;  %v2196_v44 = vld [vmem:[%s2812_s1 + $0x2d8] sm:$0xff]  }
  0x18   :  { %1886 = vmatpush3.bf16.msra.mxu0 %v2135_v22  ;;  %v2177_v22 = vld [vmem:[%s2812_s1 + $0x180] sm:$0xff]   ;;  %v2189_v36 = vld [vmem:[%s2812_s1 + $0x228] sm:$0xff]   ;;  %v2197_v45 = vld [vmem:[%s2812_s1 + $0x218] sm:$0xff]  }
  0x19   :  { %1908 = vmatpush3.bf16.msra.mxu1 %v2136_v23  ;;  %1887 = vmatprep.subr.bf16.mxu0 %v2137_v24  ;;  %v125_v20 = vpack.c.bf16 %v68_v16, %v68_v16  ;;  %v69_v21 = vcombine.high %v67_v17, %v67_v17  ;;  %v2179_v24 = vld [vmem:[%s2812_s1 + $0x278] sm:$0xff]   ;;  %v126_v28 = vpack.c.bf16 %v67_v17, %v67_v17  ;;  %v2190_v37 = vld [vmem:[%s2812_s1 + $0x2a8] sm:$0xff]   ;;  %v2192_v39 = vld [vmem:[%s2812_s1 + $0x2e0] sm:$0xff]  }
  0x1a   :  { %1909 = vmatprep.subr.bf16.mxu1 %v2138_v25  ;;  %v2180_v25 = vld [vmem:[%s2812_s1 + $0x2f8] sm:$0xff]   ;;  %v2193_v40 = vld [vmem:[%s2812_s1 + $0x220] sm:$0xff]   ;;  %v2202_v50 = vld [vmem:[%s2812_s1 + $0x290] sm:$0xff]  }
  0x1b   :  { %v127_v23 = vpack.c.bf16 %v69_v21, %v69_v21  ;;  %v2194_v42 = vld [vmem:[%s2812_s1 + $0x2a0] sm:$0xff]   ;;  %v2203_v51 = vld [vmem:[%s2812_s1 + $0x248] sm:$0xff]   ;;  %v2217_v10 = vld [vmem:[%s2812_s1 + $0x3f0] sm:$0xff]  }
  0x1c   :  { %1888 = vmatpush3.bf16.msra.mxu0 %v2139_v26  ;;  %v2181_v26 = vld [vmem:[%s2812_s1 + $0x238] sm:$0xff]   ;;  %v2220_v13 = vld [vmem:[%s2812_s1 + $0x368] sm:$0xff]   ;;  %v2224_v17 = vld [vmem:[%s2812_s1 + $0x360] sm:$0xff]  }
  0x1d   :  { %1910 = vmatpush3.bf16.msra.mxu1 %v2140_v27  ;;  %1889 = vmatprep.subr.bf16.mxu0 %v2141_v29  ;;  %v124_v27 = vpack.c.bf16 %v60_v12, %v60_v12  ;;  %v2182_v29 = vld [vmem:[%s2812_s1 + $0x2b8] sm:$0xff]   ;;  %v2219_v12 = vld [vmem:[%s2812_s1 + $0x3b0] sm:$0xff]   ;;  %v2223_v16 = vld [vmem:[%s2812_s1 + $0x3a8] sm:$0xff]  }
  0x1e   :  { %1911 = vmatprep.subr.bf16.mxu1 %v2142_v30  ;;  %v2183_v30 = vld [vmem:[%s2812_s1 + $0x270] sm:$0xff]   ;;  %v2228_v21 = vld [vmem:[%s2812_s1 + $0x358] sm:$0xff]  }
  0x20   :  { %1890 = vmatpush3.bf16.msra.mxu0 %v2143_v31  ;;  %v2184_v31 = vld [vmem:[%s2812_s1 + $0x2f0] sm:$0xff]  }
  0x21   :  { %1912 = vmatpush3.bf16.msra.mxu1 %v2144_v32  ;;  %1919 = vmatprep.subr.bf16.mxu0 %v2146_v35  ;;  %v2185_v32 = vld [vmem:[%s2812_s1 + $0x230] sm:$0xff]   ;;  %v2188_v35 = vld [vmem:[%s2812_s1 + $0x2e8] sm:$0xff]  }
  0x22   :  { %1941 = vmatprep.subr.bf16.mxu1 %v2147_v38  ;;  %v2191_v38 = vld [vmem:[%s2812_s1 + $0x260] sm:$0xff]  }
  0x23   :  { %1200 = vmatmul.mubr.bf16.vlgmr.msra.gmra.mxu0 %v120_v47  ;;  %v2199_v47 = vld [vmem:[%s2812_s1 + $0x250] sm:$0xff]  }
  0x24   :  { %1240 = vmatmul.mubr.bf16.vlgmr.msra.gmra.mxu1 %v122_v48  ;;  %1920 = vmatpush3.bf16.msra.mxu0 %v2148_v46  ;;  %v2198_v46 = vld [vmem:[%s2812_s1 + $0x298] sm:$0xff]   ;;  %v2200_v48 = vld [vmem:[%s2812_s1 + $0x2d0] sm:$0xff]  }
  0x25   :  { %1942 = vmatpush3.bf16.msra.mxu1 %v2149_v49  ;;  %1921 = vmatprep.subr.bf16.mxu0 %v2150_v52  ;;  %v2201_v49 = vld [vmem:[%s2812_s1 + $0x210] sm:$0xff]   ;;  %v2204_v52 = vld [vmem:[%s2812_s1 + $0x2c8] sm:$0xff]  }
  0x26   :  { %1943 = vmatprep.subr.bf16.mxu1 %v2151_v53  ;;  %1279 = vmatprep.mubr.bf16.mxu0 %v125_v20  ;;  %v30_v53 = vld [vmem:[%s2811_s0 + $0x10] sm:$0xff]  ;;  %v2227_v20 = vld [vmem:[%s2812_s1 + $0x3a0] sm:$0xff]  }
  0x27   :  { %1319 = vmatprep.mubr.bf16.mxu1 %v127_v23  ;;  %v2230_v23 = vld [vmem:[%s2812_s1 + $0x318] sm:$0xff]  }
  0x28   :  { %1922 = vmatpush3.bf16.msra.mxu0 %v2152_v54  ;;  %v2205_v54 = vld [vmem:[%s2812_s1 + $0x208] sm:$0xff]  }
  0x29   :  { %1944 = vmatpush3.bf16.msra.mxu1 %v2153_v55  ;;  %1923 = vmatprep.subr.bf16.mxu0 %v2154_v56  ;;  %v77_v55 = vrot.slane %v30_v53, %v2432_v41  ;;  %v70_v56 = vcombine.high %v30_v53, %v30_v53 }
  0x2a   :  { %1945 = vmatprep.subr.bf16.mxu1 %v2155_v57  ;;  %v2206_v57 = vld [vmem:[%s2812_s1 + $0x288] sm:$0xff]  }
  0x2c   :  { %1924 = vmatpush3.bf16.msra.mxu0 %v2156_v58  ;;  %v2207_v58 = vld [vmem:[%s2812_s1 + $0x240] sm:$0xff]  }
  0x2d   :  { %1946 = vmatpush3.bf16.msra.mxu1 %v2157_v59  ;;  %1925 = vmatprep.subr.bf16.mxu0 %v2158_v60  ;;  %v85_v59 = vcombine.high %v77_v55, %v77_v55  ;;  %v84_v60 = vrot.slane %v70_v56, %v2432_v41 }
  0x2e   :  { %1947 = vmatprep.subr.bf16.mxu1 %v2159_v61  ;;  %v2208_v61 = vld [vmem:[%s2812_s1 + $0x2c0] sm:$0xff]  }
  0x30   :  { %1926 = vmatpush3.bf16.msra.mxu0 %v2160_v62  ;;  %v2209_v62 = vld [vmem:[%s2812_s1 + $0x200] sm:$0xff]  }
  0x31   :  { %1948 = vmatpush3.bf16.msra.mxu1 %v2161_v63  ;;  %1927 = vmatprep.subr.bf16.mxu0 %v2162_v0  ;;  %v129_v63 = vpack.c.bf16 %v85_v59, %v85_v59  ;;  %v86_v0 = vcombine.high %v84_v60, %v84_v60 }
  0x32   :  { %1949 = vmatprep.subr.bf16.mxu1 %v2163_v1  ;;  %v2210_v1 = vld [vmem:[%s2812_s1 + $0x280] sm:$0xff]  }
  0x34   :  { %1928 = vmatpush3.bf16.msra.mxu0 %v2164_v2  ;;  %v131_v2 = vpack.c.bf16 %v86_v0, %v86_v0 }
  0x35   :  { %1950 = vmatpush3.bf16.msra.mxu1 %v2165_v3  ;;  %1929 = vmatprep.subr.bf16.mxu0 %v2166_v4  ;;  %v2212_v3 = vld [vmem:[%s2812_s1 + $0x378] sm:$0xff]  }
  0x36   :  { %1951 = vmatprep.subr.bf16.mxu1 %v2167_v5  ;;  %v2213_v4 = vld [vmem:[%s2812_s1 + $0x3f8] sm:$0xff]  }
  0x37   :  { %v2214_v5 = vld [vmem:[%s2812_s1 + $0x338] sm:$0xff]  }
  0x38   :  { %1930 = vmatpush3.bf16.msra.mxu0 %v2168_v6  ;;  %v128_v6 = vpack.c.bf16 %v77_v55, %v77_v55 }
  0x39   :  { %1952 = vmatpush3.bf16.msra.mxu1 %v2169_v7  ;;  %1931 = vmatprep.subr.bf16.mxu0 %v2170_v8  ;;  %v130_v7 = vpack.c.bf16 %v84_v60, %v84_v60  ;;  %v2215_v8 = vld [vmem:[%s2812_s1 + $0x3b8] sm:$0xff]  }
  0x3a   :  { %1953 = vmatprep.subr.bf16.mxu1 %v2171_v9  ;;  %v2216_v9 = vld [vmem:[%s2812_s1 + $0x370] sm:$0xff]  }
  0x3c   :  { %1932 = vmatpush3.bf16.msra.mxu0 %v2172_v11  ;;  %v2218_v11 = vld [vmem:[%s2812_s1 + $0x330] sm:$0xff]  }
  0x3d   :  { %1954 = vmatpush3.bf16.msra.mxu1 %v2173_v14  ;;  %1933 = vmatprep.subr.bf16.mxu0 %v2174_v15  ;;  %v2221_v14 = vld [vmem:[%s2812_s1 + $0x3e8] sm:$0xff]  }
  0x3e   :  { %1955 = vmatprep.subr.bf16.mxu1 %v2175_v18  ;;  %v2222_v15 = vld [vmem:[%s2812_s1 + $0x328] sm:$0xff]   ;;  %v2225_v18 = vld [vmem:[%s2812_s1 + $0x3e0] sm:$0xff]  }
  0x40   :  { %1934 = vmatpush3.bf16.msra.mxu0 %v2176_v19  ;;  %v2226_v19 = vld [vmem:[%s2812_s1 + $0x320] sm:$0xff]  }
  0x41   :  { %1956 = vmatpush3.bf16.msra.mxu1 %v2177_v22  ;;  %1963 = vmatprep.subr.bf16.mxu0 %v2179_v24  ;;  %v2229_v22 = vld [vmem:[%s2812_s1 + $0x3d8] sm:$0xff]  }
  0x42   :  { %1985 = vmatprep.subr.bf16.mxu1 %v2180_v25  ;;  %v2231_v24 = vld [vmem:[%s2812_s1 + $0x398] sm:$0xff]   ;;  %v2232_v25 = vld [vmem:[%s2812_s1 + $0x350] sm:$0xff]  }
  0x43   :  { %1280 = vmatmul.mubr.bf16.vlgmr.msra.gmra.mxu0 %v124_v27  ;;  %v2234_v27 = vld [vmem:[%s2812_s1 + $0x310] sm:$0xff]  }
  0x44   :  { %1320 = vmatmul.mubr.bf16.vlgmr.msra.gmra.mxu1 %v126_v28  ;;  %1964 = vmatpush3.bf16.msra.mxu0 %v2181_v26  ;;  %v2233_v26 = vld [vmem:[%s2812_s1 + $0x3d0] sm:$0xff]  }
  0x45   :  { %1986 = vmatpush3.bf16.msra.mxu1 %v2182_v29  ;;  %1965 = vmatprep.subr.bf16.mxu0 %v2183_v30  ;;  %v2235_v28 = vld [vmem:[%s2812_s1 + $0x390] sm:$0xff]   ;;  %v2236_v29 = vld [vmem:[%s2812_s1 + $0x348] sm:$0xff]  }
  0x46   :  { %1987 = vmatprep.subr.bf16.mxu1 %v2184_v31  ;;  %1359 = vmatprep.mubr.bf16.mxu0 %v129_v63  ;;  %v2237_v30 = vld [vmem:[%s2812_s1 + $0x3c8] sm:$0xff]  }
  0x47   :  { %1399 = vmatprep.mubr.bf16.mxu1 %v131_v2  ;;  %v2238_v31 = vld [vmem:[%s2812_s1 + $0x308] sm:$0xff]  }
  0x48   :  { %1966 = vmatpush3.bf16.msra.mxu0 %v2185_v32  ;;  %v2239_v32 = vld [vmem:[%s2812_s1 + $0x388] sm:$0xff]  }
  0x49   :  { %1988 = vmatpush3.bf16.msra.mxu1 %v2186_v33  ;;  %1967 = vmatprep.subr.bf16.mxu0 %v2187_v34  ;;  %v31_v33 = vld [vmem:[%s2811_s0 + $0x18] sm:$0xff]  ;;  %v2240_v34 = vld [vmem:[%s2812_s1 + $0x340] sm:$0xff]  }
  0x4a   :  { %1989 = vmatprep.subr.bf16.mxu1 %v2188_v35  ;;  %v2241_v35 = vld [vmem:[%s2812_s1 + $0x3c0] sm:$0xff]  }
  0x4c   :  { %1968 = vmatpush3.bf16.msra.mxu0 %v2189_v36  ;;  %v94_v36 = vrot.slane %v31_v33, %v2432_v41 }
  0x4d   :  { %1990 = vmatpush3.bf16.msra.mxu1 %v2190_v37  ;;  %1969 = vmatprep.subr.bf16.mxu0 %v2191_v38  ;;  %v87_v37 = vcombine.high %v31_v33, %v31_v33 }
  0x4e   :  { %1991 = vmatprep.subr.bf16.mxu1 %v2192_v39  ;;  %v102_v38 = vcombine.high %v94_v36, %v94_v36 }
  0x4f   :  { %v101_v39 = vrot.slane %v87_v37, %v2432_v41 }
  0x50   :  { %1970 = vmatpush3.bf16.msra.mxu0 %v2193_v40  ;;  %v2242_v40 = vld [vmem:[%s2812_s1 + $0x300] sm:$0xff]  }
  0x51   :  { %1992 = vmatpush3.bf16.msra.mxu1 %v2194_v42  ;;  %1971 = vmatprep.subr.bf16.mxu0 %v2195_v43  ;;  %v2243_v42 = vld [vmem:[%s2812_s1 + $0x380] sm:$0xff]   ;;  %v133_v43 = vpack.c.bf16 %v102_v38, %v102_v38 }
  0x52   :  { %1993 = vmatprep.subr.bf16.mxu1 %v2196_v44  ;;  %v103_v44 = vcombine.high %v101_v39, %v101_v39 }
  0x54   :  { %1972 = vmatpush3.bf16.msra.mxu0 %v2197_v45  ;;  %v135_v45 = vpack.c.bf16 %v103_v44, %v103_v44 }
  0x55   :  { %1994 = vmatpush3.bf16.msra.mxu1 %v2198_v46  ;;  %1973 = vmatprep.subr.bf16.mxu0 %v2199_v47  ;;  %v132_v46 = vpack.c.bf16 %v94_v36, %v94_v36  ;;  %v134_v47 = vpack.c.bf16 %v101_v39, %v101_v39 }
  0x56   :  { %1995 = vmatprep.subr.bf16.mxu1 %v2200_v48 }
  0x58   :  { %1974 = vmatpush3.bf16.msra.mxu0 %v2201_v49 }
  0x59   :  { %1996 = vmatpush3.bf16.msra.mxu1 %v2202_v50  ;;  %1975 = vmatprep.subr.bf16.mxu0 %v2203_v51 }
  0x5a   :  { %1997 = vmatprep.subr.bf16.mxu1 %v2204_v52 }
  0x5c   :  { %1976 = vmatpush3.bf16.msra.mxu0 %v2205_v54 }
  0x5d   :  { %1998 = vmatpush3.bf16.msra.mxu1 %v2206_v57  ;;  %1977 = vmatprep.subr.bf16.mxu0 %v2207_v58 }
  0x5e   :  { %1999 = vmatprep.subr.bf16.mxu1 %v2208_v61 }
  0x60   :  { %1978 = vmatpush3.bf16.msra.mxu0 %v2209_v62 }
  0x61   :  { %2000 = vmatpush3.bf16.msra.mxu1 %v2210_v1  ;;  %2007 = vmatprep.subr.bf16.mxu0 %v2212_v3 }
  0x62   :  { %2029 = vmatprep.subr.bf16.mxu1 %v2213_v4 }
  0x63   :  { %1360 = vmatmul.mubr.bf16.vlgmr.msra.gmra.mxu0 %v128_v6 }
  0x64   :  { %1400 = vmatmul.mubr.bf16.vlgmr.msra.gmra.mxu1 %v130_v7  ;;  %2008 = vmatpush3.bf16.msra.mxu0 %v2214_v5 }
  0x65   :  { %2030 = vmatpush3.bf16.msra.mxu1 %v2215_v8  ;;  %2009 = vmatprep.subr.bf16.mxu0 %v2216_v9 }
  0x66   :  { %2031 = vmatprep.subr.bf16.mxu1 %v2217_v10  ;;  %1439 = vmatprep.mubr.bf16.mxu0 %v133_v43 }
  0x67   :  { %1479 = vmatprep.mubr.bf16.mxu1 %v135_v45 }
  0x68   :  { %2010 = vmatpush3.bf16.msra.mxu0 %v2218_v11 }
  0x69   :  { %2032 = vmatpush3.bf16.msra.mxu1 %v2219_v12  ;;  %2011 = vmatprep.subr.bf16.mxu0 %v2220_v13 }
  0x6a   :  { %2033 = vmatprep.subr.bf16.mxu1 %v2221_v14 }
  0x6c   :  { %2012 = vmatpush3.bf16.msra.mxu0 %v2222_v15 }
  0x6d   :  { %2034 = vmatpush3.bf16.msra.mxu1 %v2223_v16  ;;  %2013 = vmatprep.subr.bf16.mxu0 %v2224_v17 }
  0x6e   :  { %2035 = vmatprep.subr.bf16.mxu1 %v2225_v18 }
  0x70   :  { %2014 = vmatpush3.bf16.msra.mxu0 %v2226_v19 }
  0x71   :  { %2036 = vmatpush3.bf16.msra.mxu1 %v2227_v20  ;;  %2015 = vmatprep.subr.bf16.mxu0 %v2228_v21 }
  0x72   :  { %2037 = vmatprep.subr.bf16.mxu1 %v2229_v22 }
  0x74   :  { %2016 = vmatpush3.bf16.msra.mxu0 %v2230_v23 }
  0x75   :  { %2038 = vmatpush3.bf16.msra.mxu1 %v2231_v24  ;;  %2017 = vmatprep.subr.bf16.mxu0 %v2232_v25 }
  0x76   :  { %2039 = vmatprep.subr.bf16.mxu1 %v2233_v26 }
  0x78   :  { %2018 = vmatpush3.bf16.msra.mxu0 %v2234_v27 }
  0x79   :  { %2040 = vmatpush3.bf16.msra.mxu1 %v2235_v28  ;;  %2019 = vmatprep.subr.bf16.mxu0 %v2236_v29 }
  0x7a   :  { %2041 = vmatprep.subr.bf16.mxu1 %v2237_v30 }
  0x7c   :  { %2020 = vmatpush3.bf16.msra.mxu0 %v2238_v31 }
  0x7d   :  { %2042 = vmatpush3.bf16.msra.mxu1 %v2239_v32  ;;  %2021 = vmatprep.subr.bf16.mxu0 %v2240_v34 }
  0x7e   :  { %2043 = vmatprep.subr.bf16.mxu1 %v2241_v35 }
  0x80   :  { %2022 = vmatpush3.bf16.msra.mxu0 %v2242_v40 }
  0x81   :  { %2044 = vmatpush3.bf16.msra.mxu1 %v2243_v42 }
  0x82   :  { %12 = vsyncpa [#allocation3], 0  ;;  %v2245_v41 = vld [vmem:[%s2814_s3 + $0x38] sm:$0xff]   ;;  %v2284_v48 = vmov 0.0   ;;  %v2246_v49 = vld [vmem:[%s2814_s3 + $0x30] sm:$0xff]   ;;  %vm2285_vm0 = vmmov 0  }
  0x83   :  { %1440 = vmatmul.mubr.bf16.vlgmr.msra.gmra.mxu0 %v132_v46  ;;  %2069 = vmatprep.subr.bf16.mxu0 %v2284_v48  ;;  %v2247_v50 = vld [vmem:[%s2814_s3 + $0x28] sm:$0xff]   ;;  %v2248_v51 = vld [vmem:[%s2814_s3 + $0x20] sm:$0xff]   ;;  %v2249_v52 = vld [vmem:[%s2814_s3 + $0x18] sm:$0xff]   ;;  %s2286_s21 = smov [#allocation2]  }
  0x84   :  { %1480 = vmatmul.mubr.bf16.vlgmr.msra.gmra.mxu1 %v134_v47  ;;  %2089 = vmatprep.subr.bf16.mxu1 %v2284_v48  ;;  %v2250_v53 = vld [vmem:[%s2814_s3 + $0x10] sm:$0xff]   ;;  %v2251_v54 = vld [vmem:[%s2814_s3 + $0x8] sm:$0xff]   ;;  %v2252_v55 = vld [vmem:[%s2814_s3] sm:$0xff]   ;;  %s1720_s22 = sshll.u32 %s2286_s21, 4  ;;  %s1721_s22 = int_to_ptr.vmem [resolvable:$true] %s1720_s22 }
  0x85   :  { %2070 = vmatpush3.bf16.msra.mxu0 %v2245_v41  ;;  %2085 = vmatprep.mubr.msk.bf16.mxu0 %vm2285_vm0, %v2284_v48  ;;  %v2253_v56 = vld [vmem:[%s2816_s5 + $0x38] sm:$0xff]   ;;  %v2254_v57 = vld [vmem:[%s2816_s5 + $0x30] sm:$0xff]   ;;  %v2255_v58 = vld [vmem:[%s2816_s5 + $0x28] sm:$0xff]   ;;  %p2266_p1 = scmp.lt.s32.totalorder %s1721_s22, %s1721_s22 }
  0x86   :  { %2071 = vmatprep.subr.bf16.mxu0 %v2284_v48  ;;  %2105 = vmatprep.mubr.msk.bf16.mxu1 %vm2285_vm0, %v2284_v48  ;;  %v2256_v59 = vld [vmem:[%s2816_s5 + $0x20] sm:$0xff]   ;;  %v2257_v60 = vld [vmem:[%s2816_s5 + $0x18] sm:$0xff]   ;;  %v2258_v61 = vld [vmem:[%s2816_s5 + $0x10] sm:$0xff]  }
  0x87   :  { %2090 = vmatpush3.bf16.msra.mxu1 %v2253_v56  ;;  %v1728_v0 = vld [vmem:[%s2813_s2] ss:$0 sm:$0xff] }
  0x88   :  { %2091 = vmatprep.subr.bf16.mxu1 %v2284_v48 }
  0x89   :  { %2072 = vmatpush3.bf16.msra.mxu0 %v2246_v49 }
  0x8a   :  { %2073 = vmatprep.subr.bf16.mxu0 %v2284_v48 }
  0x8b   :  { %2092 = vmatpush3.bf16.msra.mxu1 %v2254_v57 }
  0x8c   :  { %2093 = vmatprep.subr.bf16.mxu1 %v2284_v48 }
  0x8d   :  { %2074 = vmatpush3.bf16.msra.mxu0 %v2247_v50  ;;  %v2259_v50 = vld [vmem:[%s2816_s5 + $0x8] sm:$0xff]  }
  0x8e   :  { %2075 = vmatprep.subr.bf16.mxu0 %v2284_v48 }
  0x8f   :  { %2094 = vmatpush3.bf16.msra.mxu1 %v2255_v58 }
  0x90   :  { %2095 = vmatprep.subr.bf16.mxu1 %v2284_v48 }
  0x91   :  { %2076 = vmatpush3.bf16.msra.mxu0 %v2248_v51  ;;  %v2260_v51 = vld [vmem:[%s2816_s5] sm:$0xff]  }
  0x92   :  { %2077 = vmatprep.subr.bf16.mxu0 %v2284_v48 }
  0x93   :  { %2096 = vmatpush3.bf16.msra.mxu1 %v2256_v59 }
  0x94   :  { %2097 = vmatprep.subr.bf16.mxu1 %v2284_v48 }
  0x95   :  { %2078 = vmatpush3.bf16.msra.mxu0 %v2249_v52  ;;  %v1857_v52 = vld [vmem:[%s2815_s4] ss:$0 sm:$0xff]  ;;  %s2261_s4 = scalar_lea.vmem %s1721_s22, 32 }
  0x96   :  { %2079 = vmatprep.subr.bf16.mxu0 %v2284_v48  ;;  %p2262_p0 = scmp.ne.s32.totalorder %s1721_s22, %s2261_s4  ;;  %p2267_p2 = scmp.lt.s32.totalorder %s2261_s4, %s2261_s4 }
  0x97   :  { %2098 = vmatpush3.bf16.msra.mxu1 %v2257_v60 }
  0x98   :  { %2099 = vmatprep.subr.bf16.mxu1 %v2284_v48  ;;  %p2268_p3 = por %p2267_p2, %p2266_p1 }
  0x99   :  { %2080 = vmatpush3.bf16.msra.mxu0 %v2250_v53 }
  0x9a   :  { %2081 = vmatprep.subr.bf16.mxu0 %v2284_v48  ;;  %p2269_p4 = pnand %p2268_p3, %p2262_p0 }
  0x9b   :  { %2100 = vmatpush3.bf16.msra.mxu1 %v2258_v61 }
  0x9c   :  { %2101 = vmatprep.subr.bf16.mxu1 %v2284_v48 }
  0x9d   :  { %2082 = vmatpush3.bf16.msra.mxu0 %v2251_v54 }
  0x9e   :  { %2083 = vmatprep.subr.bf16.mxu0 %v2284_v48 }
  0x9f   :  { %2102 = vmatpush3.bf16.msra.mxu1 %v2259_v50 }
  0xa0   :  { %2103 = vmatprep.subr.bf16.mxu1 %v2284_v48  ;;  %v1866_v48 = vld [vmem:[%s2817_s6] ss:$0 sm:$0xff] }
  0xa1   :  { %2084 = vmatpush3.bf16.msra.mxu0 %v2252_v55 }
  0xa3   :  { %2104 = vmatpush3.bf16.msra.mxu1 %v2260_v51 }
  0xe3   :  { %v1891_v62 = vpop.f32.mrf.mxu0 }
  0xe4   :  { %v1913_v63 = vpop.f32.mrf.mxu1 }
  0xe5   :  { %v1892_v1 = vpop.f32.mrf.mxu0 }
  0xe6   :  { %v1914_v2 = vpop.f32.mrf.mxu1  ;;  %v1893_v3 = vadd.f32 %v1892_v1, %v1891_v62 }
  0xe7   :  { %v1915_v4 = vadd.f32 %v1914_v2, %v1913_v63  ;;  %v1894_v5 = vpop.f32.mrf.mxu0 }
  0xe8   :  { %v1916_v6 = vpop.f32.mrf.mxu1  ;;  %v1202_v7 = vadd.f32 %v1893_v3, %v1728_v0 }
  0xe9   :  { %v1895_v8 = vpop.f32.mrf.mxu0 }
  0xea   :  { %v1917_v9 = vpop.f32.mrf.mxu1  ;;  %v1242_v10 = vadd.f32 %v1915_v4, %v1202_v7 }
 0x103   :  { %v1935_v11 = vpop.f32.mrf.mxu0 }
 0x104   :  { %v1957_v12 = vpop.f32.mrf.mxu1 }
 0x105   :  { %v1936_v13 = vpop.f32.mrf.mxu0 }
 0x106   :  { %v1958_v14 = vpop.f32.mrf.mxu1  ;;  %v1937_v27 = vadd.f32 %v1936_v13, %v1935_v11 }
 0x107   :  { %v1938_v15 = vpop.f32.mrf.mxu0  ;;  %v1959_v29 = vadd.f32 %v1958_v14, %v1957_v12 }
 0x108   :  { %v1960_v16 = vpop.f32.mrf.mxu1  ;;  %v1282_v28 = vadd.f32 %v1937_v27, %v1242_v10 }
 0x109   :  { %v1939_v17 = vpop.f32.mrf.mxu0 }
 0x10a   :  { %v1961_v18 = vpop.f32.mrf.mxu1  ;;  %v1322_v31 = vadd.f32 %v1959_v29, %v1282_v28 }
 0x123   :  { %v1979_v19 = vpop.f32.mrf.mxu0 }
 0x124   :  { %v2001_v20 = vpop.f32.mrf.mxu1 }
 0x125   :  { %v1980_v21 = vpop.f32.mrf.mxu0 }
 0x126   :  { %v2002_v22 = vpop.f32.mrf.mxu1  ;;  %v1981_v30 = vadd.f32 %v1980_v21, %v1979_v19 }
 0x127   :  { %v1982_v23 = vpop.f32.mrf.mxu0  ;;  %v2003_v33 = vadd.f32 %v2002_v22, %v2001_v20 }
 0x128   :  { %v2004_v24 = vpop.f32.mrf.mxu1  ;;  %v1362_v32 = vadd.f32 %v1981_v30, %v1322_v31 }
 0x129   :  { %v1983_v25 = vpop.f32.mrf.mxu0 }
 0x12a   :  { %v2005_v26 = vpop.f32.mrf.mxu1  ;;  %v1402_v38 = vadd.f32 %v2003_v33, %v1362_v32 }
 0x143   :  { %v2023_v34 = vpop.f32.mrf.mxu0 }
 0x144   :  { %v2045_v35 = vpop.f32.mrf.mxu1 }
 0x145   :  { %v2024_v36 = vpop.f32.mrf.mxu0 }
 0x146   :  { %v2046_v37 = vpop.f32.mrf.mxu1  ;;  %v2025_v39 = vadd.f32 %v2024_v36, %v2023_v34 }
 0x147   :  { %v2026_v40 = vpop.f32.mrf.mxu0  ;;  %v2047_v44 = vadd.f32 %v2046_v37, %v2045_v35 }
 0x148   :  { %v2048_v42 = vpop.f32.mrf.mxu1  ;;  %v1442_v43 = vadd.f32 %v2025_v39, %v1402_v38 }
 0x149   :  { %v2027_v45 = vpop.f32.mrf.mxu0 }
 0x14a   :  { %v2049_v46 = vpop.f32.mrf.mxu1  ;;  %v1482_v47 = vadd.f32 %v2047_v44, %v1442_v43 }
 0x14c   :  { %v1487_v41 = vmax.f32 %v1482_v47, 0.0 }
 0x14e   :  { %v1488_v49 = vpack.c.bf16 %v1487_v41, %v1487_v41 }
 0x150   :  { %2086 = vmatmul.mubr.bf16.vlgmr.msra.gmra.mxu0 %v1488_v49 }
 0x210   :  { %v1594_v53 = vpop.f32.mrf.mxu0 }
 0x211   :  { %v1595_v54 = vadd.f32 %v1857_v52, %v1594_v53 }
 0x212   :  { %v2087_v55 = vpop.f32.mrf.mxu0 }
 0x213   :  { %v1600_v56 = vmax.f32 %v1595_v54, 0.0 }
 0x214   :  { %v1597_v57 = vpop.f32.mrf.mxu0 }
 0x215   :  { %v1601_v58 = vpack.c.bf16 %v1600_v56, %v1600_v56 }
 0x216   :  { %v2088_v59 = vpop.f32.mrf.mxu0 }
 0x217   :  { %2106 = vmatmul.mubr.bf16.vlgmr.msra.gmra.mxu1 %v1601_v58 }
 0x2d7   :  { %v1707_v60 = vpop.f32.mrf.mxu1 }
 0x2d8   :  { %v1708_v61 = vadd.f32 %v1866_v48, %v1707_v60 }
 0x2d9   :  { %v2107_v62 = vpop.f32.mrf.mxu1 }
 0x2da   :  { %1713 = vst [vmem:[#allocation2] sm:$0x3] %v1708_v61 }
 0x2db   :  { %v1710_v63 = vpop.f32.mrf.mxu1 }
 0x2dc   :  { %2272 = shalt.err (!%p2269_p4)
}
 0x2dd   :  { %1723 = dma.vmem_to_hbm [thread:$0]  %s1721_s22, 32, %s2818_s7, [#allocation3]   ;;  %v2108_v0 = vpop.f32.mrf.mxu1 }
 0x2de   :  { %2281 = dma.done.wait [#allocation3], 32  }
 0x2df   :  { %2282 = vsyncadd [#allocation3], 4294967264 }
 0x2e0   :  { %1727 = vsyncpa [#allocation3], 1 }

// kernel: net_forward.4
= control target key start
LH: loop header
LB: loop body
LE: loop exit
PB: predicated region body
PF: predicated region fallthrough
CT: control target
= control target key end

     0   :  { %s5600_s12 = smov 0   ;;  %s7113_s0 = inlined_call_operand.vmem [shape: f32[2,20,320], index: 0, kind: input, shape index: {}]   ;;  %s7114_s1 = inlined_call_operand.vmem [shape: bf16[2,5,320,256], index: 1, kind: input, shape index: {}]   ;;  %s7115_s2 = inlined_call_operand.vmem [shape: f32[1,256], index: 2, kind: input, shape index: {}]   ;;  %s7116_s3 = inlined_call_operand.vmem [shape: f32[2,8,256], index: 3, kind: output, shape index: {}]  }
   0x1 LB: > { %s4164_s13 = sadd.s32 4294967295, %s5576_s12   ;;  %p4168_p0 = scmp.ge.s32.totalorder %s5576_s12, 1  ;;  %s5576_s12 = sphi %s5600_s12, %s13_s12  }
   0x2   : > { %p137_p1 = scmp.lt.s32.totalorder %s5576_s12, 3 }
   0x4   : > { %p138_p2 = pnand %p4168_p0, %p137_p1 }
   0x6   : > { %141 = sbr.rel (%p138_p2) target bundleno = 640 (0x280), region = 32 }
   0xb   : > { %v4964_v0 = vld [vmem:[%s7114_s1 + $0x1b4] ss:$8 sps:$4 sm:$0xff]   ;;  %p161_p3 = scmp.lt.s32.totalorder %s4164_s13, 1  ;;  %v5578_v2 = vmov 0   ;;  %v4968_v3 = vld [vmem:[%s7114_s1 + $0x1b0] ss:$8 sps:$4 sm:$0xff]  }
   0xc   : > { %v4966_v1 = vld [vmem:[%s7114_s1 + $0x274] ss:$8 sps:$4 sm:$0xff]   ;;  %592 = vmatprep.mubr.bf16.mxu1 %v5578_v2  ;;  %517 = vmatprep.subr.bf16.mxu0 %v4964_v0  ;;  %v4969_v4 = vld [vmem:[%s7114_s1 + $0x270] ss:$8 sps:$4 sm:$0xff]   ;;  %v4970_v5 = vld [vmem:[%s7114_s1 + $0x1a4] ss:$8 sps:$4 sm:$0xff]  }
   0xd   : > { %s7142_s13 = smov (!%p161_p3, %s4164_s13), 1  ;;  %568 = vmatprep.subr.bf16.mxu1 %v4966_v1  ;;  %518 = vmatpush1.bf16.msra.mxu0 %v4968_v3  ;;  %v4972_v6 = vld [vmem:[%s7114_s1 + $0x264] ss:$8 sps:$4 sm:$0xff]   ;;  %v4974_v7 = vld [vmem:[%s7114_s1 + $0x1a0] ss:$8 sps:$4 sm:$0xff]   ;;  %vm513_vm1 = vcmask 523264  }
   0xe   : > { %569 = vmatpush1.bf16.msra.mxu1 %v4969_v4  ;;  %s4953_s28 = smul.u32 72, %s7142_s13  ;;  %519 = vmatprep.subr.bf16.mxu0 %v4970_v5  ;;  %v4975_v8 = vld [vmem:[%s7114_s1 + $0x260] ss:$8 sps:$4 sm:$0xff]   ;;  %v4976_v9 = vld [vmem:[%s7114_s1 + $0x194] ss:$8 sps:$4 sm:$0xff]   ;;  %vm951_vm2 = vcmask 1046528  }
   0xf   : > { %570 = vmatprep.subr.bf16.mxu1 %v4972_v6  ;;  %v4978_v10 = vld [vmem:[%s7114_s1 + $0x254] ss:$8 sps:$4 sm:$0xff]   ;;  %v4980_v11 = vld [vmem:[%s7114_s1 + $0x190] ss:$8 sps:$4 sm:$0xff]   ;;  %v4982_v13 = vld [vmem:[%s7114_s1 + $0x184] ss:$8 sps:$4 sm:$0xff]  }
  0x10   : > { %v4981_v12 = vld [vmem:[%s7114_s1 + $0x250] ss:$8 sps:$4 sm:$0xff]   ;;  %s5654_s18 = scalar_lea.vmem %s7113_s0, %s4953_s28  ;;  %v4984_v14 = vld [vmem:[%s7114_s1 + $0x244] ss:$8 sps:$4 sm:$0xff]   ;;  %v4986_v15 = vld [vmem:[%s7114_s1 + $0x180] ss:$8 sps:$4 sm:$0xff]  }
  0x11   : > { %520 = vmatpush1.bf16.msra.mxu0 %v4974_v7  ;;  %v4987_v16 = vld [vmem:[%s7114_s1 + $0x240] ss:$8 sps:$4 sm:$0xff]   ;;  %v223_v18 = vld [vmem:[%s5654_s18 + $0x10] sm:$0xfe]  ;;  %v4994_v30 = vld [vmem:[%s7114_s1 + $0x164] ss:$8 sps:$4 sm:$0xff]  }
  0x12   : > { %571 = vmatpush1.bf16.msra.mxu1 %v4975_v8  ;;  %521 = vmatprep.subr.bf16.mxu0 %v4976_v9  ;;  %v5666_v17 = vld [vmem:[%s5654_s18 + $0x28] sm:$0xff]  ;;  %v226_v19 = vld [vmem:[%s5654_s18 + $0x40] sm:$0x1]  ;;  %v4988_v20 = vld [vmem:[%s7114_s1 + $0x174] ss:$8 sps:$4 sm:$0xff]   ;;  %vm1715_vm4 = vcmask 1045504  }
  0x13   : > { %572 = vmatprep.subr.bf16.mxu1 %v4978_v10  ;;  %v229_v21 = vpack.c.bf16 %v5666_v17, %v223_v18  ;;  %v232_v22 = vpack.c.bf16 %v226_v19, %v226_v19  ;;  %v4992_v23 = vld [vmem:[%s7114_s1 + $0x74] ss:$8 sps:$4 sm:$0xff]   ;;  %v4993_v27 = vld [vmem:[%s7114_s1 + $0x170] ss:$8 sps:$4 sm:$0xff]   ;;  %vm274_vm0 = vsmask.f32 7424 }
  0x14   : > { %v4990_v32 = vld [vmem:[%s7114_s1 + $0x70] ss:$8 sps:$4 sm:$0xff]   ;;  %v4998_v33 = vld [vmem:[%s7114_s1 + $0x64] ss:$8 sps:$4 sm:$0xff]   ;;  %v4999_v34 = vld [vmem:[%s7114_s1 + $0x160] ss:$8 sps:$4 sm:$0xff]  }
  0x15   : > { %522 = vmatpush1.bf16.msra.mxu0 %v4980_v11  ;;  %v300_v24 = vshrl.u32 %v229_v21, 16  ;;  %v302_v25 = vshll.u32 %v229_v21, 16  ;;  %v307_v26 = vshll.u32 %v232_v22, 16  ;;  %v5000_v36 = vld [vmem:[%s7114_s1 + $0x154] ss:$8 sps:$4 sm:$0xff]   ;;  %v5767_v60 = vld [vmem:[%s5654_s18 + $0x20] sm:$0xff] }
  0x16   : > { %573 = vmatpush1.bf16.msra.mxu1 %v4981_v12  ;;  %523 = vmatprep.subr.bf16.mxu0 %v4982_v13  ;;  %v4996_v37 = vld [vmem:[%s7114_s1 + $0x60] ss:$8 sps:$4 sm:$0xff]   ;;  %v5004_v38 = vld [vmem:[%s7114_s1 + $0x54] ss:$8 sps:$4 sm:$0xff]   ;;  %v5005_v39 = vld [vmem:[%s7114_s1 + $0x150] ss:$8 sps:$4 sm:$0xff]  }
  0x17   : > { %574 = vmatprep.subr.bf16.mxu1 %v4984_v14  ;;  %v304_v28 = vrot.slane %v302_v25, 1  ;;  %v309_v29 = vrot.slane %v307_v26, 1  ;;  %v5006_v40 = vld [vmem:[%s7114_s1 + $0x144] ss:$8 sps:$4 sm:$0xff]   ;;  %v5002_v41 = vld [vmem:[%s7114_s1 + $0x50] ss:$8 sps:$4 sm:$0xff]  }
  0x18   : > { %v5010_v42 = vld [vmem:[%s7114_s1 + $0x44] ss:$8 sps:$4 sm:$0xff]   ;;  %v5011_v43 = vld [vmem:[%s7114_s1 + $0x140] ss:$8 sps:$4 sm:$0xff]   ;;  %v5012_v44 = vld [vmem:[%s7114_s1 + $0x234] ss:$8 sps:$4 sm:$0xff]  }
  0x19   : > { %524 = vmatpush1.bf16.msra.mxu0 %v4986_v15  ;;  %v305_v31 = vor.u32 %v304_v28, %v300_v24  ;;  %v5008_v45 = vld [vmem:[%s7114_s1 + $0x40] ss:$8 sps:$4 sm:$0xff]   ;;  %v5016_v46 = vld [vmem:[%s7114_s1 + $0x34] ss:$8 sps:$4 sm:$0xff]   ;;  %v5017_v47 = vld [vmem:[%s7114_s1 + $0x230] ss:$8 sps:$4 sm:$0xff]  }
  0x1a   : > { %575 = vmatpush1.bf16.msra.mxu1 %v4987_v16  ;;  %525 = vmatprep.subr.bf16.mxu0 %v4988_v20  ;;  %v5018_v48 = vld [vmem:[%s7114_s1 + $0x224] ss:$8 sps:$4 sm:$0xff]   ;;  %v5014_v49 = vld [vmem:[%s7114_s1 + $0x30] ss:$8 sps:$4 sm:$0xff]   ;;  %v5023_v51 = vld [vmem:[%s7114_s1 + $0x220] ss:$8 sps:$4 sm:$0xff]  }
  0x1b   : > { %806 = vmatprep.subr.bf16.mxu1 %v4992_v23  ;;  %v310_v35 = vsel %vm274_vm0, %v305_v31, %v309_v29  ;;  %v5022_v50 = vld [vmem:[%s7114_s1 + $0x24] ss:$8 sps:$4 sm:$0xff]   ;;  %v5024_v52 = vld [vmem:[%s7114_s1 + $0x214] ss:$8 sps:$4 sm:$0xff]   ;;  %v5020_v53 = vld [vmem:[%s7114_s1 + $0x20] ss:$8 sps:$4 sm:$0xff]  }
  0x1c   : > { %v5028_v54 = vld [vmem:[%s7114_s1 + $0x14] ss:$8 sps:$4 sm:$0xff]   ;;  %v5029_v55 = vld [vmem:[%s7114_s1 + $0x210] ss:$8 sps:$4 sm:$0xff]   ;;  %v5030_v56 = vld [vmem:[%s7114_s1 + $0x204] ss:$8 sps:$4 sm:$0xff]  }
  0x1d   : > { %526 = vmatpush1.bf16.msra.mxu0 %v4993_v27  ;;  %4252 = vmatmul.mubr.msk.bf16.vlgmr.msra.gmra.mxu1 %vm513_vm1, %v310_v35  ;;  %v5026_v57 = vld [vmem:[%s7114_s1 + $0x10] ss:$8 sps:$4 sm:$0xff]   ;;  %v5034_v58 = vld [vmem:[%s7114_s1 + $0x4] ss:$8 sps:$4 sm:$0xff]   ;;  %v5035_v59 = vld [vmem:[%s7114_s1 + $0x200] ss:$8 sps:$4 sm:$0xff]  }
  0x1e   : > { %527 = vmatprep.subr.bf16.mxu0 %v4994_v30  ;;  %807 = vmatpush1.bf16.msra.mxu1 %v4990_v32  ;;  %v222_v61 = vld [vmem:[%s5654_s18 + $0x8] sm:$0xfe]  ;;  %v225_v62 = vld [vmem:[%s5654_s18 + $0x38] sm:$0x1]  ;;  %v5036_v63 = vld [vmem:[%s7114_s1 + $0x1f4] ss:$8 sps:$4 sm:$0xff]  }
  0x1f   : > { %808 = vmatprep.subr.bf16.mxu1 %v4998_v33  ;;  %v228_v0 = vpack.c.bf16 %v5767_v60, %v222_v61  ;;  %v231_v1 = vpack.c.bf16 %v225_v62, %v225_v62  ;;  %v5776_v3 = vld [vmem:[%s5654_s18 + $0x18] sm:$0xff]  ;;  %v221_v4 = vld [vmem:[%s5654_s18] sm:$0xfe]  ;;  %v224_v15 = vld [vmem:[%s5654_s18 + $0x30] sm:$0x1]  ;;  %vm4084_vm5 = vcmask 1041409  }
  0x20   : > { %v5032_v5 = vld [vmem:[%s7114_s1] ss:$8 sps:$4 sm:$0xff]   ;;  %v5040_v6 = vld [vmem:[%s7114_s1 + $0xf4] ss:$8 sps:$4 sm:$0xff]   ;;  %v5041_v10 = vld [vmem:[%s7114_s1 + $0x1f0] ss:$8 sps:$4 sm:$0xff]   ;;  %v227_v12 = vpack.c.bf16 %v5776_v3, %v221_v4  ;;  %v230_v21 = vpack.c.bf16 %v224_v15, %v224_v15 }
  0x21   : > { %528 = vmatpush1.bf16.msra.mxu0 %v4999_v34  ;;  %v288_v7 = vshrl.u32 %v228_v0, 16  ;;  %v290_v8 = vshll.u32 %v228_v0, 16  ;;  %v295_v9 = vshll.u32 %v231_v1, 16  ;;  %v5042_v11 = vld [vmem:[%s7114_s1 + $0x1e4] ss:$8 sps:$4 sm:$0xff]   ;;  %vm4086_vm6 = vcmask 1042434  }
  0x22   : > { %529 = vmatprep.subr.bf16.mxu0 %v5000_v36  ;;  %809 = vmatpush1.bf16.msra.mxu1 %v4996_v37  ;;  %v5038_v16 = vld [vmem:[%s7114_s1 + $0xf0] ss:$8 sps:$4 sm:$0xff]   ;;  %v5046_v18 = vld [vmem:[%s7114_s1 + $0xe4] ss:$8 sps:$4 sm:$0xff]   ;;  %v5047_v20 = vld [vmem:[%s7114_s1 + $0x1e0] ss:$8 sps:$4 sm:$0xff]  }
  0x23   : > { %810 = vmatprep.subr.bf16.mxu1 %v5004_v38  ;;  %v292_v13 = vrot.slane %v290_v8, 1  ;;  %v297_v14 = vrot.slane %v295_v9, 1  ;;  %v278_v22 = vshll.u32 %v227_v12, 16  ;;  %v5048_v23 = vld [vmem:[%s7114_s1 + $0x1d4] ss:$8 sps:$4 sm:$0xff]   ;;  %v276_v28 = vshrl.u32 %v227_v12, 16 }
  0x24   : > { %v5044_v25 = vld [vmem:[%s7114_s1 + $0xe0] ss:$8 sps:$4 sm:$0xff]   ;;  %v5052_v26 = vld [vmem:[%s7114_s1 + $0xd4] ss:$8 sps:$4 sm:$0xff]   ;;  %v5053_v27 = vld [vmem:[%s7114_s1 + $0x1d0] ss:$8 sps:$4 sm:$0xff]  }
  0x25   : > { %530 = vmatpush1.bf16.msra.mxu0 %v5005_v39  ;;  %v293_v19 = vor.u32 %v292_v13, %v288_v7  ;;  %v280_v29 = vrot.slane %v278_v22, 1  ;;  %v283_v30 = vshll.u32 %v230_v21, 16  ;;  %v5054_v31 = vld [vmem:[%s7114_s1 + $0x1c4] ss:$8 sps:$4 sm:$0xff]   ;;  %v5050_v34 = vld [vmem:[%s7114_s1 + $0xd0] ss:$8 sps:$4 sm:$0xff]  }
  0x26   : > { %531 = vmatprep.subr.bf16.mxu0 %v5006_v40  ;;  %811 = vmatpush1.bf16.msra.mxu1 %v5002_v41  ;;  %v173_v32 = vld [vmem:[%s5654_s18 + $0x8] sm:$0xff]  ;;  %v5065_v39 = vld [vmem:[%s7114_s1 + $0x134] ss:$8 sps:$4 sm:$0xff]   ;;  %v5084_v62 = vld [vmem:[%s7114_s1 + $0x2f0] ss:$8 sps:$4 sm:$0xff]   ;;  %vm4088_vm7 = vcmask 1043459  }
  0x27   : > { %812 = vmatprep.subr.bf16.mxu1 %v5010_v42  ;;  %v298_v24 = vsel %vm274_vm0, %v293_v19, %v297_v14  ;;  %v179_v33 = vpack.c.bf16 %v5767_v60, %v173_v32  ;;  %v5058_v35 = vld [vmem:[%s7114_s1 + $0xc4] ss:$8 sps:$4 sm:$0xff]   ;;  %v5059_v36 = vld [vmem:[%s7114_s1 + $0x1c0] ss:$8 sps:$4 sm:$0xff]   ;;  %v281_v37 = vor.u32 %v280_v29, %v276_v28  ;;  %v285_v38 = vrot.slane %v283_v30, 1  ;;  %s4952_s26 = sshll.u32 %s7142_s13, 4 }
  0x28   : > { %549 = vmatprep.mubr.bf16.mxu0 %v298_v24  ;;  %v5056_v40 = vld [vmem:[%s7114_s1 + $0xc0] ss:$8 sps:$4 sm:$0xff]   ;;  %v5062_v41 = vld [vmem:[%s7114_s1 + $0xb4] ss:$8 sps:$4 sm:$0xff]   ;;  %v5092_v0 = vld [vmem:[%s7114_s1 + $0x2e4] ss:$8 sps:$4 sm:$0xff]   ;;  %s170_s28 = scalar_lea.vmem %s7116_s3, %s4952_s26 }
  0x29   : > { %532 = vmatpush1.bf16.msra.mxu0 %v5011_v43  ;;  %838 = vmatprep.mubr.bf16.mxu1 %v179_v33  ;;  %v286_v42 = vsel %vm274_vm0, %v281_v37, %v285_v38  ;;  %v5063_v43 = vld [vmem:[%s7114_s1 + $0x130] ss:$8 sps:$4 sm:$0xff]   ;;  %v5093_v7 = vld [vmem:[%s7114_s1 + $0x3a0] ss:$8 sps:$4 sm:$0xff]   ;;  %v5098_v8 = vld [vmem:[%s7114_s1 + $0x2d4] ss:$8 sps:$4 sm:$0xff]  }
  0x2a   : > { %533 = vmatprep.subr.bf16.mxu0 %v5012_v44  ;;  %813 = vmatpush1.bf16.msra.mxu1 %v5008_v45  ;;  %v5071_v44 = vld [vmem:[%s7114_s1 + $0x124] ss:$8 sps:$4 sm:$0xff]   ;;  %v5060_v45 = vld [vmem:[%s7114_s1 + $0xb0] ss:$8 sps:$4 sm:$0xff]   ;;  %v897_v12 = vld [vmem:[%s5654_s18 + $0x40] sm:$0x3] }
  0x2b   : > { %814 = vmatprep.subr.bf16.mxu1 %v5016_v46  ;;  %v5068_v46 = vld [vmem:[%s7114_s1 + $0xa4] ss:$8 sps:$4 sm:$0xff]   ;;  %v5087_v4 = vld [vmem:[%s7114_s1 + $0x3b0] ss:$8 sps:$4 sm:$0xff]   ;;  %v5113_v24 = vld [vmem:[%s7114_s1 + $0x434] ss:$8 sps:$4 sm:$0xff]  }
  0x2c   : > { %v5096_v9 = vld [vmem:[%s7114_s1 + $0x2d0] ss:$8 sps:$4 sm:$0xff]   ;;  %v5104_v13 = vld [vmem:[%s7114_s1 + $0x2c4] ss:$8 sps:$4 sm:$0xff]   ;;  %v5114_v28 = vld [vmem:[%s7114_s1 + $0x2a0] ss:$8 sps:$4 sm:$0xff]  }
  0x2d   : > { %534 = vmatpush2.bf16.msra.mxu0 %v5017_v47  ;;  %v5069_v47 = vld [vmem:[%s7114_s1 + $0x120] ss:$8 sps:$4 sm:$0xff]   ;;  %v5099_v14 = vld [vmem:[%s7114_s1 + $0x390] ss:$8 sps:$4 sm:$0xff]   ;;  %v5107_v19 = vld [vmem:[%s7114_s1 + $0x384] ss:$8 sps:$4 sm:$0xff]  }
  0x2e   : > { %535 = vmatprep.subr.bf16.mxu0 %v5018_v48  ;;  %815 = vmatpush1.bf16.msra.mxu1 %v5014_v49  ;;  %v5077_v48 = vld [vmem:[%s7114_s1 + $0x114] ss:$8 sps:$4 sm:$0xff]   ;;  %v5066_v49 = vld [vmem:[%s7114_s1 + $0xa0] ss:$8 sps:$4 sm:$0xff]   ;;  %v5119_v29 = vld [vmem:[%s7114_s1 + $0x424] ss:$8 sps:$4 sm:$0xff]  }
  0x2f   : > { %816 = vmatprep.subr.bf16.mxu1 %v5022_v50  ;;  %v5074_v50 = vld [vmem:[%s7114_s1 + $0x94] ss:$8 sps:$4 sm:$0xff]   ;;  %v896_v32 = vld [vmem:[%s5654_s18 + $0x38] sm:$0x3]  ;;  %v5117_v33 = vld [vmem:[%s7114_s1 + $0x420] ss:$8 sps:$4 sm:$0xff]  }
  0x30   : > { %v5122_v30 = vld [vmem:[%s7114_s1 + $0x294] ss:$8 sps:$4 sm:$0xff]   ;;  %v5128_v38 = vld [vmem:[%s7114_s1 + $0x284] ss:$8 sps:$4 sm:$0xff]   ;;  %vm1309_vm3 = vsmask.f32 6400 }
  0x31   : > { %536 = vmatpush2.bf16.msra.mxu0 %v5023_v51  ;;  %v5075_v51 = vld [vmem:[%s7114_s1 + $0x110] ss:$8 sps:$4 sm:$0xff]   ;;  %v5125_v37 = vld [vmem:[%s7114_s1 + $0x414] ss:$8 sps:$4 sm:$0xff]   ;;  %vm4090_vm8 = vcmask 1044484   ;;  %vm4092_vm9 = vcmask 1045509  }
  0x32   : > { %537 = vmatprep.subr.bf16.mxu0 %v5024_v52  ;;  %817 = vmatpush1.bf16.msra.mxu1 %v5020_v53  ;;  %v5083_v52 = vld [vmem:[%s7114_s1 + $0x104] ss:$8 sps:$4 sm:$0xff]   ;;  %v5072_v53 = vld [vmem:[%s7114_s1 + $0x90] ss:$8 sps:$4 sm:$0xff]   ;;  %vm4094_vm10 = vcmask 1046534   ;;  %vm4096_vm11 = vcmask 1047559  }
  0x33   : > { %818 = vmatprep.subr.bf16.mxu1 %v5028_v54  ;;  %v5080_v54 = vld [vmem:[%s7114_s1 + $0x84] ss:$8 sps:$4 sm:$0xff]  }
  0x35   : > { %538 = vmatpush2.bf16.msra.mxu0 %v5029_v55  ;;  %v5081_v55 = vld [vmem:[%s7114_s1 + $0x100] ss:$8 sps:$4 sm:$0xff]  }
  0x36   : > { %539 = vmatprep.subr.bf16.mxu0 %v5030_v56  ;;  %819 = vmatpush1.bf16.msra.mxu1 %v5026_v57  ;;  %v174_v56 = vld [vmem:[%s5654_s18 + $0x10] sm:$0xff] }
  0x37   : > { %820 = vmatprep.subr.bf16.mxu1 %v5034_v58  ;;  %v5086_v57 = vld [vmem:[%s7114_s1 + $0x2f4] ss:$8 sps:$4 sm:$0xff]   ;;  %v5078_v58 = vld [vmem:[%s7114_s1 + $0x80] ss:$8 sps:$4 sm:$0xff]   ;;  %v180_v61 = vpack.c.bf16 %v5666_v17, %v174_v56  ;;  %v5143_v56 = vld [vmem:[%s7114_s1 + $0x3e4] ss:$8 sps:$4 sm:$0xff]  }
  0x39   : > { %540 = vmatpush2.bf16.msra.mxu0 %v5035_v59  ;;  %v172_v59 = vld [vmem:[%s5654_s18] sm:$0xff] }
  0x3a   : > { %541 = vmatprep.subr.bf16.mxu0 %v5036_v63  ;;  %821 = vmatpush1.bf16.msra.mxu1 %v5032_v5  ;;  %v5089_v63 = vld [vmem:[%s7114_s1 + $0x3b4] ss:$8 sps:$4 sm:$0xff]   ;;  %v178_v1 = vpack.c.bf16 %v5776_v3, %v172_v59  ;;  %v5090_v5 = vld [vmem:[%s7114_s1 + $0x2e0] ss:$8 sps:$4 sm:$0xff]  }
  0x3b   : > { %822 = vmatprep.subr.bf16.mxu1 %v5040_v6  ;;  %v5095_v6 = vld [vmem:[%s7114_s1 + $0x3a4] ss:$8 sps:$4 sm:$0xff]  }
  0x3d   : > { %542 = vmatpush2.bf16.msra.mxu0 %v5041_v10  ;;  %v5101_v10 = vld [vmem:[%s7114_s1 + $0x394] ss:$8 sps:$4 sm:$0xff]  }
  0x3e   : > { %543 = vmatprep.subr.bf16.mxu0 %v5042_v11  ;;  %823 = vmatpush2.bf16.msra.mxu1 %v5038_v16  ;;  %v894_v11 = vld [vmem:[%s5654_s18 + $0x10] sm:$0xfc]  ;;  %v903_v16 = vpack.c.bf16 %v897_v12, %v897_v12 }
  0x3f   : > { %824 = vmatprep.subr.bf16.mxu1 %v5046_v18  ;;  %v900_v15 = vpack.c.bf16 %v5666_v17, %v894_v11  ;;  %v5102_v18 = vld [vmem:[%s7114_s1 + $0x2c0] ss:$8 sps:$4 sm:$0xff]  }
  0x40   : > { %v5105_v17 = vld [vmem:[%s7114_s1 + $0x380] ss:$8 sps:$4 sm:$0xff]   ;;  %v959_v22 = vrot.slane %v903_v16, 1  ;;  %v5156_v16 = vld [vmem:[%s7114_s1 + $0x330] ss:$8 sps:$4 sm:$0xff]  }
  0x41   : > { %544 = vmatpush2.bf16.msra.mxu0 %v5047_v20  ;;  %v5110_v20 = vld [vmem:[%s7114_s1 + $0x2b4] ss:$8 sps:$4 sm:$0xff]   ;;  %v958_v21 = vrot.slane %v900_v15, 1  ;;  %v5150_v11 = vld [vmem:[%s7114_s1 + $0x340] ss:$8 sps:$4 sm:$0xff]  }
  0x42   : > { %545 = vmatprep.subr.bf16.mxu0 %v5048_v23  ;;  %825 = vmatpush2.bf16.msra.mxu1 %v5044_v25  ;;  %v5108_v23 = vld [vmem:[%s7114_s1 + $0x2b0] ss:$8 sps:$4 sm:$0xff]   ;;  %v5116_v25 = vld [vmem:[%s7114_s1 + $0x2a4] ss:$8 sps:$4 sm:$0xff]   ;;  %v5153_v15 = vld [vmem:[%s7114_s1 + $0x3c0] ss:$8 sps:$4 sm:$0xff]  }
  0x43   : > { %826 = vmatprep.subr.bf16.mxu1 %v5052_v26  ;;  %v960_v26 = vsel %vm951_vm2, %v958_v21, %v959_v22  ;;  %v5167_v21 = vld [vmem:[%s7114_s1 + $0x4a4] ss:$8 sps:$4 sm:$0xff]   ;;  %v5170_v22 = vld [vmem:[%s7114_s1 + $0x314] ss:$8 sps:$4 sm:$0xff]  }
  0x45   : > { %546 = vmatpush2.bf16.msra.mxu0 %v5053_v27  ;;  %v5111_v27 = vld [vmem:[%s7114_s1 + $0x430] ss:$8 sps:$4 sm:$0xff]  }
  0x46   : > { %547 = vmatprep.subr.bf16.mxu0 %v5054_v31  ;;  %827 = vmatpush2.bf16.msra.mxu1 %v5050_v34  ;;  %v893_v31 = vld [vmem:[%s5654_s18 + $0x8] sm:$0xfc] }
  0x47   : > { %828 = vmatprep.subr.bf16.mxu1 %v5058_v35  ;;  %v899_v34 = vpack.c.bf16 %v5767_v60, %v893_v31  ;;  %v902_v35 = vpack.c.bf16 %v896_v32, %v896_v32  ;;  %v5171_v31 = vld [vmem:[%s7114_s1 + $0x490] ss:$8 sps:$4 sm:$0xff]   ;;  %v5174_v32 = vld [vmem:[%s7114_s1 + $0x300] ss:$8 sps:$4 sm:$0xff]  }
  0x49   : > { %548 = vmatpush2.bf16.msra.mxu0 %v5059_v36  ;;  %v5120_v36 = vld [vmem:[%s7114_s1 + $0x290] ss:$8 sps:$4 sm:$0xff]  }
  0x4a   : > { %857 = vmatprep.subr.bf16.mxu0 %v5065_v39  ;;  %829 = vmatpush2.bf16.msra.mxu1 %v5056_v40  ;;  %v955_v39 = vrot.slane %v899_v34, 1  ;;  %v956_v40 = vrot.slane %v902_v35, 1 }
  0x4b   : > { %830 = vmatprep.subr.bf16.mxu1 %v5062_v41  ;;  %v5123_v41 = vld [vmem:[%s7114_s1 + $0x410] ss:$8 sps:$4 sm:$0xff]  }
  0x4c   : > { %550 = vmatmul.mubr.bf16.vlgmr.msra.gmra.mxu0 %v286_v42  ;;  %v957_v42 = vsel %vm951_vm2, %v955_v39, %v956_v40  ;;  %v1261_v39 = vld [vmem:[%s5654_s18 + $0x40] sm:$0x7]  ;;  %v5182_v40 = vld [vmem:[%s7114_s1 + $0x474] ss:$8 sps:$4 sm:$0xff]  }
  0x4d   : > { %858 = vmatpush1.bf16.msra.mxu0 %v5063_v43  ;;  %881 = vmatprep.mubr.bf16.mxu0 %v5578_v2  ;;  %v5126_v43 = vld [vmem:[%s7114_s1 + $0x280] ss:$8 sps:$4 sm:$0xff]  }
  0x4e   : > { %859 = vmatprep.subr.bf16.mxu0 %v5071_v44  ;;  %831 = vmatpush2.bf16.msra.mxu1 %v5060_v45  ;;  %v5131_v44 = vld [vmem:[%s7114_s1 + $0x404] ss:$8 sps:$4 sm:$0xff]   ;;  %v5134_v45 = vld [vmem:[%s7114_s1 + $0x374] ss:$8 sps:$4 sm:$0xff]  }
  0x4f   : > { %832 = vmatprep.subr.bf16.mxu1 %v5068_v46  ;;  %v5129_v46 = vld [vmem:[%s7114_s1 + $0x400] ss:$8 sps:$4 sm:$0xff]  }
  0x51   : > { %860 = vmatpush1.bf16.msra.mxu0 %v5069_v47  ;;  %v5132_v47 = vld [vmem:[%s7114_s1 + $0x370] ss:$8 sps:$4 sm:$0xff]  }
  0x52   : > { %861 = vmatprep.subr.bf16.mxu0 %v5077_v48  ;;  %833 = vmatpush2.bf16.msra.mxu1 %v5066_v49  ;;  %v5137_v48 = vld [vmem:[%s7114_s1 + $0x3f4] ss:$8 sps:$4 sm:$0xff]   ;;  %v5140_v49 = vld [vmem:[%s7114_s1 + $0x364] ss:$8 sps:$4 sm:$0xff]  }
  0x53   : > { %834 = vmatprep.subr.bf16.mxu1 %v5074_v50  ;;  %v1257_v50 = vld [vmem:[%s5654_s18 + $0x8] sm:$0xf8] }
  0x55   : > { %862 = vmatpush1.bf16.msra.mxu0 %v5075_v51  ;;  %v1260_v51 = vld [vmem:[%s5654_s18 + $0x38] sm:$0x7] }
  0x56   : > { %863 = vmatprep.subr.bf16.mxu0 %v5083_v52  ;;  %835 = vmatpush2.bf16.msra.mxu1 %v5072_v53  ;;  %v5135_v52 = vld [vmem:[%s7114_s1 + $0x3f0] ss:$8 sps:$4 sm:$0xff]   ;;  %v5138_v53 = vld [vmem:[%s7114_s1 + $0x360] ss:$8 sps:$4 sm:$0xff]  }
  0x57   : > { %836 = vmatprep.subr.bf16.mxu1 %v5080_v54  ;;  %v1263_v54 = vpack.c.bf16 %v5767_v60, %v1257_v50  ;;  %v5141_v60 = vld [vmem:[%s7114_s1 + $0x3e0] ss:$8 sps:$4 sm:$0xff]   ;;  %v5188_v50 = vld [vmem:[%s7114_s1 + $0x464] ss:$8 sps:$4 sm:$0xff]  }
  0x59   : > { %864 = vmatpush1.bf16.msra.mxu0 %v5081_v55  ;;  %v1266_v55 = vpack.c.bf16 %v1260_v51, %v1260_v51  ;;  %v1331_v59 = vshll.u32 %v1263_v54, 16  ;;  %v5189_v51 = vld [vmem:[%s7114_s1 + $0x4e0] ss:$8 sps:$4 sm:$0xff]  }
  0x5a   : > { %1166 = vmatprep.subr.bf16.mxu0 %v5086_v57  ;;  %837 = vmatpush2.bf16.msra.mxu1 %v5078_v58  ;;  %v5146_v57 = vld [vmem:[%s7114_s1 + $0x354] ss:$8 sps:$4 sm:$0xff]   ;;  %v1328_v58 = vshrl.u32 %v1263_v54, 16 }
  0x5b   : > { %1217 = vmatprep.subr.bf16.mxu1 %v5089_v63 }
  0x5c   : > { %4293 = vmatmul.mubr.msk.bf16.vlgmr.msra.gmra.mxu0 %vm513_vm1, %v180_v61  ;;  %v1336_v61 = vshrl.u32 %v1266_v55, 16  ;;  %v1330_v63 = vrot.slane %v1328_v58, 1  ;;  %v5186_v58 = vld [vmem:[%s7114_s1 + $0x460] ss:$8 sps:$4 sm:$0xff]  }
  0x5d   : > { %1167 = vmatpush1.bf16.msra.mxu0 %v5084_v62  ;;  %839 = vmatmul.mubr.bf16.vlgmr.msra.gmra.mxu1 %v178_v1  ;;  %v1339_v62 = vshll.u32 %v1266_v55, 16 }
  0x5e   : > { %1168 = vmatprep.subr.bf16.mxu0 %v5092_v0  ;;  %1218 = vmatpush1.bf16.msra.mxu1 %v5087_v4  ;;  %v1333_v0 = vrot.slane %v1331_v59, 2  ;;  %v1338_v1 = vrot.slane %v1336_v61, 1  ;;  %v5197_v59 = vld [vmem:[%s7114_s1 + $0x4d4] ss:$8 sps:$4 sm:$0xff]   ;;  %v5195_v61 = vld [vmem:[%s7114_s1 + $0x4d0] ss:$8 sps:$4 sm:$0xff]  }
  0x5f   : > { %1241 = vmatprep.mubr.bf16.mxu1 %v5578_v2  ;;  %1219 = vmatprep.subr.bf16.mxu1 %v5095_v6  ;;  %v1341_v4 = vrot.slane %v1339_v62, 2  ;;  %v5149_v6 = vld [vmem:[%s7114_s1 + $0x3d4] ss:$8 sps:$4 sm:$0xff]  }
  0x60   : > { %1198 = vmatprep.mubr.bf16.mxu0 %v957_v42  ;;  %v1256_v42 = vld [vmem:[%s5654_s18] sm:$0xf8] }
  0x61   : > { %1169 = vmatpush1.bf16.msra.mxu0 %v5090_v5  ;;  %v5144_v5 = vld [vmem:[%s7114_s1 + $0x350] ss:$8 sps:$4 sm:$0xff]  }
  0x62   : > { %1170 = vmatprep.subr.bf16.mxu0 %v5098_v8  ;;  %1220 = vmatpush1.bf16.msra.mxu1 %v5093_v7  ;;  %v5152_v7 = vld [vmem:[%s7114_s1 + $0x344] ss:$8 sps:$4 sm:$0xff]   ;;  %v1334_v8 = vor.u32 %v1333_v0, %v1330_v63 }
  0x63   : > { %1221 = vmatprep.subr.bf16.mxu1 %v5101_v10  ;;  %v5147_v10 = vld [vmem:[%s7114_s1 + $0x3d0] ss:$8 sps:$4 sm:$0xff]  }
  0x65   : > { %1171 = vmatpush1.bf16.msra.mxu0 %v5096_v9  ;;  %v1342_v9 = vor.u32 %v1341_v4, %v1338_v1 }
  0x66   : > { %1172 = vmatprep.subr.bf16.mxu0 %v5104_v13  ;;  %1222 = vmatpush1.bf16.msra.mxu1 %v5099_v14  ;;  %v5155_v13 = vld [vmem:[%s7114_s1 + $0x3c4] ss:$8 sps:$4 sm:$0xff]   ;;  %v5158_v14 = vld [vmem:[%s7114_s1 + $0x334] ss:$8 sps:$4 sm:$0xff]  }
  0x67   : > { %1223 = vmatprep.subr.bf16.mxu1 %v5107_v19  ;;  %v1343_v12 = vsel %vm1309_vm3, %v1334_v8, %v1342_v9  ;;  %v5164_v19 = vld [vmem:[%s7114_s1 + $0x324] ss:$8 sps:$4 sm:$0xff]   ;;  %v5192_v8 = vld [vmem:[%s7114_s1 + $0x450] ss:$8 sps:$4 sm:$0xff]  }
  0x68   : > { %v5200_v9 = vld [vmem:[%s7114_s1 + $0x444] ss:$8 sps:$4 sm:$0xff]  }
  0x69   : > { %1173 = vmatpush1.bf16.msra.mxu0 %v5102_v18  ;;  %v5161_v18 = vld [vmem:[%s7114_s1 + $0x4b4] ss:$8 sps:$4 sm:$0xff]  }
  0x6a   : > { %1174 = vmatprep.subr.bf16.mxu0 %v5110_v20  ;;  %1224 = vmatpush1.bf16.msra.mxu1 %v5105_v17  ;;  %v5159_v20 = vld [vmem:[%s7114_s1 + $0x4b0] ss:$8 sps:$4 sm:$0xff]   ;;  %v5162_v17 = vld [vmem:[%s7114_s1 + $0x320] ss:$8 sps:$4 sm:$0xff]  }
  0x6b   : > { %1566 = vmatprep.subr.bf16.mxu1 %v5113_v24  ;;  %v895_v24 = vld [vmem:[%s5654_s18 + $0x30] sm:$0x3] }
  0x6d   : > { %1175 = vmatpush1.bf16.msra.mxu0 %v5108_v23  ;;  %4374 = vmatmul.mubr.msk.bf16.vlgmr.msra.gmra.mxu1 %vm513_vm1, %v960_v26  ;;  %v892_v23 = vld [vmem:[%s5654_s18] sm:$0xfc]  ;;  %v5168_v26 = vld [vmem:[%s7114_s1 + $0x310] ss:$8 sps:$4 sm:$0xff]  }
  0x6e   : > { %1176 = vmatprep.subr.bf16.mxu0 %v5116_v25  ;;  %1567 = vmatpush1.bf16.msra.mxu1 %v5111_v27  ;;  %v5165_v25 = vld [vmem:[%s7114_s1 + $0x4a0] ss:$8 sps:$4 sm:$0xff]   ;;  %v5173_v27 = vld [vmem:[%s7114_s1 + $0x494] ss:$8 sps:$4 sm:$0xff]  }
  0x6f   : > { %1568 = vmatprep.subr.bf16.mxu1 %v5119_v29  ;;  %1598 = vmatprep.mubr.bf16.mxu1 %v1343_v12  ;;  %v901_v29 = vpack.c.bf16 %v895_v24, %v895_v24  ;;  %v5212_v24 = vld [vmem:[%s7114_s1 + $0x564] ss:$8 sps:$4 sm:$0xff]  }
  0x71   : > { %1177 = vmatpush1.bf16.msra.mxu0 %v5114_v28  ;;  %v898_v28 = vpack.c.bf16 %v5776_v3, %v892_v23  ;;  %v953_v35 = vrot.slane %v901_v29, 1  ;;  %v5209_v23 = vld [vmem:[%s7114_s1 + $0x634] ss:$8 sps:$4 sm:$0xff]   ;;  %v1660_v29 = vld [vmem:[%s5654_s18 + $0x38] sm:$0xf] }
  0x72   : > { %1178 = vmatprep.subr.bf16.mxu0 %v5122_v30  ;;  %1569 = vmatpush1.bf16.msra.mxu1 %v5117_v33  ;;  %v5176_v30 = vld [vmem:[%s7114_s1 + $0x304] ss:$8 sps:$4 sm:$0xff]  }
  0x73   : > { %1570 = vmatprep.subr.bf16.mxu1 %v5125_v37  ;;  %v5179_v33 = vld [vmem:[%s7114_s1 + $0x484] ss:$8 sps:$4 sm:$0xff]   ;;  %v952_v34 = vrot.slane %v898_v28, 1  ;;  %v5177_v37 = vld [vmem:[%s7114_s1 + $0x480] ss:$8 sps:$4 sm:$0xff]  }
  0x74   : > { %v1657_v28 = vld [vmem:[%s5654_s18 + $0x8] sm:$0xf0] }
  0x75   : > { %1179 = vmatpush1.bf16.msra.mxu0 %v5120_v36  ;;  %v5185_v36 = vld [vmem:[%s7114_s1 + $0x4f4] ss:$8 sps:$4 sm:$0xff]  }
  0x76   : > { %1180 = vmatprep.subr.bf16.mxu0 %v5128_v38  ;;  %1571 = vmatpush1.bf16.msra.mxu1 %v5123_v41  ;;  %v1258_v38 = vld [vmem:[%s5654_s18 + $0x10] sm:$0xf8] }
  0x77   : > { %1572 = vmatprep.subr.bf16.mxu1 %v5131_v44  ;;  %v5183_v41 = vld [vmem:[%s7114_s1 + $0x4f0] ss:$8 sps:$4 sm:$0xff]  }
  0x78   : > { %v1259_v44 = vld [vmem:[%s5654_s18 + $0x30] sm:$0x7] }
  0x79   : > { %1181 = vmatpush1.bf16.msra.mxu0 %v5126_v43  ;;  %v954_v43 = vsel %vm951_vm2, %v952_v34, %v953_v35  ;;  %v5213_v34 = vld [vmem:[%s7114_s1 + $0x620] ss:$8 sps:$4 sm:$0xff]   ;;  %v5218_v35 = vld [vmem:[%s7114_s1 + $0x554] ss:$8 sps:$4 sm:$0xff]  }
  0x7a   : > { %1182 = vmatprep.subr.bf16.mxu0 %v5134_v45  ;;  %1573 = vmatpush1.bf16.msra.mxu1 %v5129_v46  ;;  %v6111_v45 = vld [vmem:[%s5654_s18 + $0x28] sm:$0xff] }
  0x7b   : > { %1574 = vmatprep.subr.bf16.mxu1 %v5137_v48  ;;  %v1264_v46 = vpack.c.bf16 %v6111_v45, %v1258_v38  ;;  %v5191_v48 = vld [vmem:[%s7114_s1 + $0x4e4] ss:$8 sps:$4 sm:$0xff]  }
  0x7d   : > { %1183 = vmatpush2.bf16.msra.mxu0 %v5132_v47  ;;  %v1267_v47 = vpack.c.bf16 %v1261_v39, %v1261_v39  ;;  %v1345_v54 = vshrl.u32 %v1264_v46, 16  ;;  %v1348_v55 = vshll.u32 %v1264_v46, 16  ;;  %v5221_v39 = vld [vmem:[%s7114_s1 + $0x614] ss:$8 sps:$4 sm:$0xff]  }
  0x7e   : > { %1184 = vmatprep.subr.bf16.mxu0 %v5140_v49  ;;  %1575 = vmatpush1.bf16.msra.mxu1 %v5135_v52  ;;  %v5180_v49 = vld [vmem:[%s7114_s1 + $0x470] ss:$8 sps:$4 sm:$0xff]   ;;  %v1262_v52 = vpack.c.bf16 %v5776_v3, %v1256_v42  ;;  %v5194_v3 = vld [vmem:[%s7114_s1 + $0x454] ss:$8 sps:$4 sm:$0xff]  }
  0x7f   : > { %1576 = vmatprep.subr.bf16.mxu1 %v5143_v56  ;;  %v1353_v56 = vshrl.u32 %v1267_v47, 16  ;;  %v1347_v1 = vrot.slane %v1345_v54, 1  ;;  %v1350_v4 = vrot.slane %v1348_v55, 2  ;;  %v2075_v54 = vld [vmem:[%s5654_s18 + $0x8] sm:$0xfe] }
  0x80   : > { %v1311_v62 = vshrl.u32 %v1262_v52, 16  ;;  %v5228_v55 = vld [vmem:[%s7114_s1 + $0x530] ss:$8 sps:$4 sm:$0xff]  }
  0x81   : > { %1185 = vmatpush2.bf16.msra.mxu0 %v5138_v53  ;;  %v1265_v53 = vpack.c.bf16 %v1259_v44, %v1259_v44  ;;  %v5219_v44 = vld [vmem:[%s7114_s1 + $0x610] ss:$8 sps:$4 sm:$0xff]  }
  0x82   : > { %1186 = vmatprep.subr.bf16.mxu0 %v5146_v57  ;;  %1577 = vmatpush1.bf16.msra.mxu1 %v5141_v60  ;;  %v1356_v57 = vshll.u32 %v1267_v47, 16  ;;  %v1314_v60 = vshll.u32 %v1262_v52, 16 }
  0x83   : > { %1578 = vmatprep.subr.bf16.mxu1 %v5149_v6  ;;  %v1319_v63 = vshrl.u32 %v1265_v53, 16  ;;  %v1322_v0 = vshll.u32 %v1265_v53, 16  ;;  %v6218_v53 = vld [vmem:[%s5654_s18 + $0x20] sm:$0xff] }
  0x84   : > { %v1358_v6 = vrot.slane %v1356_v57, 2  ;;  %v2078_v57 = vld [vmem:[%s5654_s18 + $0x38] sm:$0x1] }
  0x85   : > { %1187 = vmatpush2.bf16.msra.mxu0 %v5144_v5  ;;  %v1355_v5 = vrot.slane %v1353_v56, 1  ;;  %v1321_v12 = vrot.slane %v1319_v63, 1  ;;  %v5233_v56 = vld [vmem:[%s7114_s1 + $0x7f4] ss:$8 sps:$4 sm:$0xff]   ;;  %v5231_v63 = vld [vmem:[%s7114_s1 + $0x7f0] ss:$8 sps:$4 sm:$0xff]  }
  0x86   : > { %1188 = vmatprep.subr.bf16.mxu0 %v5152_v7  ;;  %1579 = vmatpush1.bf16.msra.mxu1 %v5147_v10  ;;  %v5203_v7 = vld [vmem:[%s7114_s1 + $0x4c4] ss:$8 sps:$4 sm:$0xff]   ;;  %v1313_v10 = vrot.slane %v1311_v62, 1 }
  0x87   : > { %1580 = vmatprep.subr.bf16.mxu1 %v5155_v13  ;;  %v1324_v13 = vrot.slane %v1322_v0, 2 }
  0x89   : > { %1189 = vmatpush2.bf16.msra.mxu0 %v5150_v11  ;;  %v1316_v11 = vrot.slane %v1314_v60, 2 }
  0x8a   : > { %1190 = vmatprep.subr.bf16.mxu0 %v5158_v14  ;;  %1581 = vmatpush1.bf16.msra.mxu1 %v5153_v15  ;;  %v5201_v14 = vld [vmem:[%s7114_s1 + $0x4c0] ss:$8 sps:$4 sm:$0xff]   ;;  %v1351_v15 = vor.u32 %v1350_v4, %v1347_v1  ;;  %v5239_v4 = vld [vmem:[%s7114_s1 + $0x7e4] ss:$8 sps:$4 sm:$0xff]  }
  0x8b   : > { %1582 = vmatprep.subr.bf16.mxu1 %v5161_v18  ;;  %v5206_v18 = vld [vmem:[%s7114_s1 + $0x574] ss:$8 sps:$4 sm:$0xff]   ;;  %v5234_v1 = vld [vmem:[%s7114_s1 + $0x520] ss:$8 sps:$4 sm:$0xff]  }
  0x8d   : > { %1191 = vmatpush2.bf16.msra.mxu0 %v5156_v16  ;;  %v1359_v16 = vor.u32 %v1358_v6, %v1355_v5  ;;  %v5242_v6 = vld [vmem:[%s7114_s1 + $0x514] ss:$8 sps:$4 sm:$0xff]  }
  0x8e   : > { %1192 = vmatprep.subr.bf16.mxu0 %v5164_v19  ;;  %1583 = vmatpush2.bf16.msra.mxu1 %v5159_v20  ;;  %v5198_v19 = vld [vmem:[%s7114_s1 + $0x440] ss:$8 sps:$4 sm:$0xff]   ;;  %v1317_v20 = vor.u32 %v1316_v11, %v1313_v10  ;;  %v5240_v10 = vld [vmem:[%s7114_s1 + $0x510] ss:$8 sps:$4 sm:$0xff]   ;;  %v5245_v11 = vld [vmem:[%s7114_s1 + $0x7d4] ss:$8 sps:$4 sm:$0xff]  }
  0x8f   : > { %1584 = vmatprep.subr.bf16.mxu1 %v5167_v21  ;;  %v5204_v21 = vld [vmem:[%s7114_s1 + $0x570] ss:$8 sps:$4 sm:$0xff]  }
  0x91   : > { %1193 = vmatpush2.bf16.msra.mxu0 %v5162_v17  ;;  %v1325_v17 = vor.u32 %v1324_v13, %v1321_v12  ;;  %v5248_v13 = vld [vmem:[%s7114_s1 + $0x504] ss:$8 sps:$4 sm:$0xff]  }
  0x92   : > { %1194 = vmatprep.subr.bf16.mxu0 %v5170_v22  ;;  %1585 = vmatpush2.bf16.msra.mxu1 %v5165_v25  ;;  %v1360_v22 = vsel %vm1309_vm3, %v1351_v15, %v1359_v16  ;;  %v5207_v25 = vld [vmem:[%s7114_s1 + $0x630] ss:$8 sps:$4 sm:$0xff]   ;;  %v5246_v15 = vld [vmem:[%s7114_s1 + $0x500] ss:$8 sps:$4 sm:$0xff]   ;;  %v5251_v16 = vld [vmem:[%s7114_s1 + $0x7c4] ss:$8 sps:$4 sm:$0xff]  }
  0x93   : > { %1586 = vmatprep.subr.bf16.mxu1 %v5173_v27  ;;  %v5210_v27 = vld [vmem:[%s7114_s1 + $0x560] ss:$8 sps:$4 sm:$0xff]  }
  0x95   : > { %1195 = vmatpush2.bf16.msra.mxu0 %v5168_v26  ;;  %v1326_v26 = vsel %vm1309_vm3, %v1317_v20, %v1325_v17  ;;  %v5252_v20 = vld [vmem:[%s7114_s1 + $0x5f0] ss:$8 sps:$4 sm:$0xff]   ;;  %v5257_v17 = vld [vmem:[%s7114_s1 + $0x7b4] ss:$8 sps:$4 sm:$0xff]  }
  0x96   : > { %1196 = vmatprep.subr.bf16.mxu0 %v5176_v30  ;;  %1587 = vmatpush2.bf16.msra.mxu1 %v5171_v31  ;;  %v5215_v30 = vld [vmem:[%s7114_s1 + $0x624] ss:$8 sps:$4 sm:$0xff]  }
  0x97   : > { %1588 = vmatprep.subr.bf16.mxu1 %v5179_v33  ;;  %v5565_v31 = vld [vmem:[%s5654_s18 + $0x20] sm:$0xff]  ;;  %v1666_v33 = vpack.c.bf16 %v1660_v29, %v1660_v29 }
  0x98   : > { %v5272_v29 = vld [vmem:[%s7114_s1 + $0x5c4] ss:$8 sps:$4 sm:$0xff]  }
  0x99   : > { %1197 = vmatpush2.bf16.msra.mxu0 %v5174_v32  ;;  %v1663_v32 = vpack.c.bf16 %v5565_v31, %v1657_v28  ;;  %v1720_v38 = vrot.slane %v1666_v33, 2  ;;  %v5269_v28 = vld [vmem:[%s7114_s1 + $0x794] ss:$8 sps:$4 sm:$0xff]   ;;  %v5270_v31 = vld [vmem:[%s7114_s1 + $0x5c0] ss:$8 sps:$4 sm:$0xff]  }
  0x9a   : > { %1617 = vmatprep.subr.bf16.mxu0 %v5185_v36  ;;  %1589 = vmatpush2.bf16.msra.mxu1 %v5177_v37  ;;  %v5216_v36 = vld [vmem:[%s7114_s1 + $0x550] ss:$8 sps:$4 sm:$0xff]   ;;  %v5278_v33 = vld [vmem:[%s7114_s1 + $0x5b4] ss:$8 sps:$4 sm:$0xff]  }
  0x9b   : > { %1590 = vmatprep.subr.bf16.mxu1 %v5182_v40  ;;  %v1719_v37 = vrot.slane %v1663_v32, 2  ;;  %v1658_v40 = vld [vmem:[%s5654_s18 + $0x10] sm:$0xf0]  ;;  %v5275_v32 = vld [vmem:[%s7114_s1 + $0x784] ss:$8 sps:$4 sm:$0xff]  }
  0x9c   : > { %1199 = vmatmul.mubr.bf16.vlgmr.msra.gmra.mxu0 %v954_v43  ;;  %v5224_v43 = vld [vmem:[%s7114_s1 + $0x544] ss:$8 sps:$4 sm:$0xff]   ;;  %v1664_v46 = vpack.c.bf16 %v6111_v45, %v1658_v40  ;;  %v5225_v45 = vld [vmem:[%s7114_s1 + $0x600] ss:$8 sps:$4 sm:$0xff]  }
  0x9d   : > { %1618 = vmatpush1.bf16.msra.mxu0 %v5183_v41  ;;  %1641 = vmatprep.mubr.bf16.mxu0 %v5578_v2  ;;  %v1661_v41 = vld [vmem:[%s5654_s18 + $0x40] sm:$0xf]  ;;  %v1721_v42 = vsel %vm1715_vm4, %v1719_v37, %v1720_v38  ;;  %v5284_v37 = vld [vmem:[%s7114_s1 + $0x5a4] ss:$8 sps:$4 sm:$0xff]   ;;  %v5279_v38 = vld [vmem:[%s7114_s1 + $0x870] ss:$8 sps:$4 sm:$0xff]  }
  0x9e   : > { %1619 = vmatprep.subr.bf16.mxu0 %v5191_v48  ;;  %1591 = vmatpush2.bf16.msra.mxu1 %v5180_v49  ;;  %v1667_v47 = vpack.c.bf16 %v1661_v41, %v1661_v41  ;;  %v5222_v48 = vld [vmem:[%s7114_s1 + $0x540] ss:$8 sps:$4 sm:$0xff]   ;;  %v5227_v49 = vld [vmem:[%s7114_s1 + $0x604] ss:$8 sps:$4 sm:$0xff]   ;;  %v5290_v41 = vld [vmem:[%s7114_s1 + $0x594] ss:$8 sps:$4 sm:$0xff]  }
  0x9f   : > { %1592 = vmatprep.subr.bf16.mxu1 %v5188_v50  ;;  %v5230_v50 = vld [vmem:[%s7114_s1 + $0x534] ss:$8 sps:$4 sm:$0xff]   ;;  %v5287_v40 = vld [vmem:[%s7114_s1 + $0x864] ss:$8 sps:$4 sm:$0xff]  }
  0xa0   : > { %v1723_v52 = vrot.slane %v1667_v47, 2  ;;  %v5293_v47 = vld [vmem:[%s7114_s1 + $0x854] ss:$8 sps:$4 sm:$0xff]  }
  0xa1   : > { %1620 = vmatpush1.bf16.msra.mxu0 %v5189_v51  ;;  %v1722_v51 = vrot.slane %v1664_v46, 2  ;;  %v5288_v46 = vld [vmem:[%s7114_s1 + $0x590] ss:$8 sps:$4 sm:$0xff]  }
  0xa2   : > { %1621 = vmatprep.subr.bf16.mxu0 %v5197_v59  ;;  %1593 = vmatpush2.bf16.msra.mxu1 %v5186_v58  ;;  %v2081_v58 = vpack.c.bf16 %v6218_v53, %v2075_v54  ;;  %v5236_v59 = vld [vmem:[%s7114_s1 + $0x524] ss:$8 sps:$4 sm:$0xff]  }
  0xa3   : > { %1594 = vmatprep.subr.bf16.mxu1 %v5194_v3  ;;  %v2084_v3 = vpack.c.bf16 %v2078_v57, %v2078_v57  ;;  %v1724_v60 = vsel %vm1715_vm4, %v1722_v51, %v1723_v52  ;;  %v5291_v51 = vld [vmem:[%s7114_s1 + $0x850] ss:$8 sps:$4 sm:$0xff]   ;;  %v5294_v52 = vld [vmem:[%s7114_s1 + $0x580] ss:$8 sps:$4 sm:$0xff]   ;;  %v5299_v54 = vld [vmem:[%s7114_s1 + $0x844] ss:$8 sps:$4 sm:$0xff]  }
  0xa4   : > { %v2142_v62 = vshll.u32 %v2081_v58, 16 }
  0xa5   : > { %1622 = vmatpush1.bf16.msra.mxu0 %v5195_v61  ;;  %v2140_v61 = vshrl.u32 %v2081_v58, 16  ;;  %v2147_v0 = vshll.u32 %v2084_v3, 16  ;;  %v6371_v58 = vld [vmem:[%s5654_s18 + $0x28] sm:$0xff] }
  0xa6   : > { %1623 = vmatprep.subr.bf16.mxu0 %v5203_v7  ;;  %1595 = vmatpush2.bf16.msra.mxu1 %v5192_v8  ;;  %v2144_v5 = vrot.slane %v2142_v62, 1  ;;  %v5297_v3 = vld [vmem:[%s7114_s1 + $0x840] ss:$8 sps:$4 sm:$0xff]   ;;  %v5303_v62 = vld [vmem:[%s7114_s1 + $0x8b0] ss:$8 sps:$4 sm:$0xff]  }
  0xa7   : > { %1596 = vmatprep.subr.bf16.mxu1 %v5200_v9  ;;  %v2149_v7 = vrot.slane %v2147_v0, 1  ;;  %v5237_v9 = vld [vmem:[%s7114_s1 + $0x7e0] ss:$8 sps:$4 sm:$0xff]  }
  0xa8   : > { %v2145_v8 = vor.u32 %v2144_v5, %v2140_v61  ;;  %v5302_v61 = vld [vmem:[%s7114_s1 + $0x834] ss:$8 sps:$4 sm:$0xff]   ;;  %v2074_v0 = vld [vmem:[%s5654_s18] sm:$0xfe]  ;;  %v2079_v5 = vld [vmem:[%s5654_s18 + $0x40] sm:$0x1] }
  0xa9   : > { %1624 = vmatpush1.bf16.msra.mxu0 %v5201_v14  ;;  %v5243_v14 = vld [vmem:[%s7114_s1 + $0x7d0] ss:$8 sps:$4 sm:$0xff]  }
  0xaa   : > { %1930 = vmatprep.subr.bf16.mxu0 %v5206_v18  ;;  %1597 = vmatpush2.bf16.msra.mxu1 %v5198_v19  ;;  %v2150_v12 = vsel %vm274_vm0, %v2145_v8, %v2149_v7  ;;  %v5254_v18 = vld [vmem:[%s7114_s1 + $0x5f4] ss:$8 sps:$4 sm:$0xff]   ;;  %v5249_v19 = vld [vmem:[%s7114_s1 + $0x7c0] ss:$8 sps:$4 sm:$0xff]   ;;  %v5308_v7 = vld [vmem:[%s7114_s1 + $0x824] ss:$8 sps:$4 sm:$0xff]  }
  0xab   : > { %1981 = vmatprep.subr.bf16.mxu1 %v5209_v23  ;;  %v5258_v23 = vld [vmem:[%s7114_s1 + $0x5e0] ss:$8 sps:$4 sm:$0xff]  }
  0xac   : > { %4455 = vmatmul.mubr.msk.bf16.vlgmr.msra.gmra.mxu0 %vm513_vm1, %v1360_v22  ;;  %v5255_v22 = vld [vmem:[%s7114_s1 + $0x7b0] ss:$8 sps:$4 sm:$0xff]  }
  0xad   : > { %1931 = vmatpush1.bf16.msra.mxu0 %v5204_v21  ;;  %1599 = vmatmul.mubr.bf16.vlgmr.msra.gmra.mxu1 %v1326_v26  ;;  %v5260_v21 = vld [vmem:[%s7114_s1 + $0x5e4] ss:$8 sps:$4 sm:$0xff]   ;;  %v5261_v26 = vld [vmem:[%s7114_s1 + $0x7a0] ss:$8 sps:$4 sm:$0xff]  }
  0xae   : > { %1932 = vmatprep.subr.bf16.mxu0 %v5212_v24  ;;  %1982 = vmatpush1.bf16.msra.mxu1 %v5207_v25  ;;  %v5263_v24 = vld [vmem:[%s7114_s1 + $0x7a4] ss:$8 sps:$4 sm:$0xff]   ;;  %v5266_v25 = vld [vmem:[%s7114_s1 + $0x5d4] ss:$8 sps:$4 sm:$0xff]  }
  0xaf   : > { %2005 = vmatprep.mubr.bf16.mxu1 %v5578_v2  ;;  %1983 = vmatprep.subr.bf16.mxu1 %v5215_v30  ;;  %v5267_v30 = vld [vmem:[%s7114_s1 + $0x790] ss:$8 sps:$4 sm:$0xff]  }
  0xb0   : > { %1962 = vmatprep.mubr.bf16.mxu0 %v1721_v42  ;;  %v1656_v42 = vld [vmem:[%s5654_s18] sm:$0xf0] }
  0xb1   : > { %1933 = vmatpush1.bf16.msra.mxu0 %v5210_v27  ;;  %v5264_v27 = vld [vmem:[%s7114_s1 + $0x5d0] ss:$8 sps:$4 sm:$0xff]  }
  0xb2   : > { %1934 = vmatprep.subr.bf16.mxu0 %v5218_v35  ;;  %1984 = vmatpush1.bf16.msra.mxu1 %v5213_v34  ;;  %v5273_v34 = vld [vmem:[%s7114_s1 + $0x780] ss:$8 sps:$4 sm:$0xff]   ;;  %v5276_v35 = vld [vmem:[%s7114_s1 + $0x5b0] ss:$8 sps:$4 sm:$0xff]  }
  0xb3   : > { %1985 = vmatprep.subr.bf16.mxu1 %v5221_v39  ;;  %v5282_v39 = vld [vmem:[%s7114_s1 + $0x5a0] ss:$8 sps:$4 sm:$0xff]  }
  0xb5   : > { %1935 = vmatpush1.bf16.msra.mxu0 %v5216_v36  ;;  %v5281_v36 = vld [vmem:[%s7114_s1 + $0x874] ss:$8 sps:$4 sm:$0xff]  }
  0xb6   : > { %1936 = vmatprep.subr.bf16.mxu0 %v5224_v43  ;;  %1986 = vmatpush1.bf16.msra.mxu1 %v5219_v44  ;;  %v1659_v43 = vld [vmem:[%s5654_s18 + $0x30] sm:$0xf]  ;;  %v5285_v44 = vld [vmem:[%s7114_s1 + $0x860] ss:$8 sps:$4 sm:$0xff]  }
  0xb7   : > { %1987 = vmatprep.subr.bf16.mxu1 %v5227_v49 }
  0xb9   : > { %1937 = vmatpush1.bf16.msra.mxu0 %v5222_v48  ;;  %v5566_v48 = vld [vmem:[%s5654_s18 + $0x18] sm:$0xff] }
  0xba   : > { %1938 = vmatprep.subr.bf16.mxu0 %v5230_v50  ;;  %1988 = vmatpush1.bf16.msra.mxu1 %v5225_v45  ;;  %v1662_v49 = vpack.c.bf16 %v5566_v48, %v1656_v42  ;;  %v1665_v50 = vpack.c.bf16 %v1659_v43, %v1659_v43  ;;  %v5296_v45 = vld [vmem:[%s7114_s1 + $0x584] ss:$8 sps:$4 sm:$0xff]   ;;  %v5327_v42 = vld [vmem:[%s7114_s1 + $0x770] ss:$8 sps:$4 sm:$0xff]   ;;  %v5330_v43 = vld [vmem:[%s7114_s1 + $0x6a0] ss:$8 sps:$4 sm:$0xff]  }
  0xbb   : > { %2368 = vmatprep.subr.bf16.mxu1 %v5233_v56  ;;  %v5336_v48 = vld [vmem:[%s7114_s1 + $0x690] ss:$8 sps:$4 sm:$0xff]  }
  0xbc   : > { %v1716_v56 = vrot.slane %v1662_v49, 2  ;;  %v1717_v57 = vrot.slane %v1665_v50, 2  ;;  %v5341_v49 = vld [vmem:[%s7114_s1 + $0x754] ss:$8 sps:$4 sm:$0xff]   ;;  %v5344_v50 = vld [vmem:[%s7114_s1 + $0x684] ss:$8 sps:$4 sm:$0xff]  }
  0xbd   : > { %1939 = vmatpush1.bf16.msra.mxu0 %v5228_v55  ;;  %4536 = vmatmul.mubr.msk.bf16.vlgmr.msra.gmra.mxu1 %vm513_vm1, %v1724_v60  ;;  %v5305_v55 = vld [vmem:[%s7114_s1 + $0x8b4] ss:$8 sps:$4 sm:$0xff]  }
  0xbe   : > { %1940 = vmatprep.subr.bf16.mxu0 %v5236_v59  ;;  %2369 = vmatpush1.bf16.msra.mxu1 %v5231_v63  ;;  %v2076_v59 = vld [vmem:[%s5654_s18 + $0x10] sm:$0xfe]  ;;  %v1718_v60 = vsel %vm1715_vm4, %v1716_v56, %v1717_v57  ;;  %v6385_v63 = vld [vmem:[%s5654_s18 + $0x18] sm:$0xff] }
  0xbf   : > { %2370 = vmatprep.subr.bf16.mxu1 %v5239_v4  ;;  %2400 = vmatprep.mubr.bf16.mxu1 %v2150_v12  ;;  %v5311_v4 = vld [vmem:[%s7114_s1 + $0x8a4] ss:$8 sps:$4 sm:$0xff]   ;;  %v2080_v8 = vpack.c.bf16 %v6385_v63, %v2074_v0  ;;  %v5353_v0 = vld [vmem:[%s7114_s1 + $0x934] ss:$8 sps:$4 sm:$0xff]  }
  0xc1   : > { %1941 = vmatpush1.bf16.msra.mxu0 %v5234_v1  ;;  %v2082_v1 = vpack.c.bf16 %v6371_v58, %v2076_v59 }
  0xc2   : > { %1942 = vmatprep.subr.bf16.mxu0 %v5242_v6  ;;  %2371 = vmatpush1.bf16.msra.mxu1 %v5237_v9  ;;  %v5300_v6 = vld [vmem:[%s7114_s1 + $0x830] ss:$8 sps:$4 sm:$0xff]   ;;  %v5309_v9 = vld [vmem:[%s7114_s1 + $0x8a0] ss:$8 sps:$4 sm:$0xff]  }
  0xc3   : > { %2372 = vmatprep.subr.bf16.mxu1 %v5245_v11  ;;  %v2085_v11 = vpack.c.bf16 %v2079_v5, %v2079_v5  ;;  %v2154_v12 = vshll.u32 %v2082_v1, 16 }
  0xc5   : > { %1943 = vmatpush1.bf16.msra.mxu0 %v5240_v10  ;;  %v2077_v10 = vld [vmem:[%s5654_s18 + $0x30] sm:$0x1] }
  0xc6   : > { %1944 = vmatprep.subr.bf16.mxu0 %v5248_v13  ;;  %2373 = vmatpush1.bf16.msra.mxu1 %v5243_v14  ;;  %v5317_v13 = vld [vmem:[%s7114_s1 + $0x894] ss:$8 sps:$4 sm:$0xff]   ;;  %v5306_v14 = vld [vmem:[%s7114_s1 + $0x820] ss:$8 sps:$4 sm:$0xff]  }
  0xc7   : > { %2374 = vmatprep.subr.bf16.mxu1 %v5251_v16  ;;  %v2083_v16 = vpack.c.bf16 %v2077_v10, %v2077_v10  ;;  %v5354_v10 = vld [vmem:[%s7114_s1 + $0x660] ss:$8 sps:$4 sm:$0xff]  }
  0xc9   : > { %1945 = vmatpush1.bf16.msra.mxu0 %v5246_v15  ;;  %v5314_v15 = vld [vmem:[%s7114_s1 + $0x814] ss:$8 sps:$4 sm:$0xff]  }
  0xca   : > { %1946 = vmatprep.subr.bf16.mxu0 %v5254_v18  ;;  %2375 = vmatpush1.bf16.msra.mxu1 %v5249_v19  ;;  %v2130_v18 = vshll.u32 %v2080_v8, 16  ;;  %v5315_v19 = vld [vmem:[%s7114_s1 + $0x890] ss:$8 sps:$4 sm:$0xff]  }
  0xcb   : > { %2376 = vmatprep.subr.bf16.mxu1 %v5257_v17  ;;  %v2156_v17 = vrot.slane %v2154_v12, 1  ;;  %v5359_v12 = vld [vmem:[%s7114_s1 + $0x924] ss:$8 sps:$4 sm:$0xff]  }
  0xcd   : > { %1947 = vmatpush2.bf16.msra.mxu0 %v5252_v20  ;;  %v2152_v20 = vshrl.u32 %v2082_v1, 16 }
  0xce   : > { %1948 = vmatprep.subr.bf16.mxu0 %v5260_v21  ;;  %2377 = vmatpush1.bf16.msra.mxu1 %v5255_v22  ;;  %v2159_v21 = vshll.u32 %v2085_v11, 16  ;;  %v5323_v22 = vld [vmem:[%s7114_s1 + $0x884] ss:$8 sps:$4 sm:$0xff]  }
  0xcf   : > { %2378 = vmatprep.subr.bf16.mxu1 %v5263_v24  ;;  %v5320_v24 = vld [vmem:[%s7114_s1 + $0x804] ss:$8 sps:$4 sm:$0xff]  }
  0xd1   : > { %1949 = vmatpush2.bf16.msra.mxu0 %v5258_v23  ;;  %v5312_v23 = vld [vmem:[%s7114_s1 + $0x810] ss:$8 sps:$4 sm:$0xff]  }
  0xd2   : > { %1950 = vmatprep.subr.bf16.mxu0 %v5266_v25  ;;  %2379 = vmatpush1.bf16.msra.mxu1 %v5261_v26  ;;  %v2128_v25 = vshrl.u32 %v2080_v8, 16  ;;  %v2132_v26 = vrot.slane %v2130_v18, 1  ;;  %v5351_v8 = vld [vmem:[%s7114_s1 + $0x930] ss:$8 sps:$4 sm:$0xff]  }
  0xd3   : > { %2380 = vmatprep.subr.bf16.mxu1 %v5269_v28  ;;  %v5321_v28 = vld [vmem:[%s7114_s1 + $0x880] ss:$8 sps:$4 sm:$0xff]  }
  0xd5   : > { %1951 = vmatpush2.bf16.msra.mxu0 %v5264_v27  ;;  %v2135_v27 = vshll.u32 %v2083_v16, 16  ;;  %v5362_v16 = vld [vmem:[%s7114_s1 + $0x654] ss:$8 sps:$4 sm:$0xff]  }
  0xd6   : > { %1952 = vmatprep.subr.bf16.mxu0 %v5272_v29  ;;  %2381 = vmatpush1.bf16.msra.mxu1 %v5267_v30  ;;  %v2157_v29 = vor.u32 %v2156_v17, %v2152_v20  ;;  %v2161_v30 = vrot.slane %v2159_v21, 1  ;;  %v5360_v17 = vld [vmem:[%s7114_s1 + $0x650] ss:$8 sps:$4 sm:$0xff]  }
  0xd7   : > { %2382 = vmatprep.subr.bf16.mxu1 %v5275_v32  ;;  %v2025_v32 = vld [vmem:[%s5654_s18 + $0x8] sm:$0xff] }
  0xd9   : > { %1953 = vmatpush2.bf16.msra.mxu0 %v5270_v31  ;;  %v5326_v31 = vld [vmem:[%s7114_s1 + $0x6b4] ss:$8 sps:$4 sm:$0xff]  }
  0xda   : > { %1954 = vmatprep.subr.bf16.mxu0 %v5278_v33  ;;  %2383 = vmatpush1.bf16.msra.mxu1 %v5273_v34  ;;  %v5318_v33 = vld [vmem:[%s7114_s1 + $0x800] ss:$8 sps:$4 sm:$0xff]   ;;  %v2133_v34 = vor.u32 %v2132_v26, %v2128_v25  ;;  %v5368_v25 = vld [vmem:[%s7114_s1 + $0x644] ss:$8 sps:$4 sm:$0xff]  }
  0xdb   : > { %2384 = vmatprep.subr.bf16.mxu1 %v5281_v36  ;;  %v2162_v36 = vsel %vm274_vm0, %v2157_v29, %v2161_v30  ;;  %v5371_v29 = vld [vmem:[%s7114_s1 + $0x904] ss:$8 sps:$4 sm:$0xff]   ;;  %v5374_v30 = vld [vmem:[%s7114_s1 + $0x734] ss:$8 sps:$4 sm:$0xff]  }
  0xdd   : > { %1955 = vmatpush2.bf16.msra.mxu0 %v5276_v35  ;;  %v2137_v35 = vrot.slane %v2135_v27, 1  ;;  %v594_v59 = vpop.f32.mrf.mxu1  ;;  %v5363_v27 = vld [vmem:[%s7114_s1 + $0x910] ss:$8 sps:$4 sm:$0xff]  }
  0xde   : > { %1956 = vmatprep.subr.bf16.mxu0 %v5284_v37  ;;  %2385 = vmatpush2.bf16.msra.mxu1 %v5279_v38  ;;  %v5324_v37 = vld [vmem:[%s7114_s1 + $0x6b0] ss:$8 sps:$4 sm:$0xff]   ;;  %v5329_v38 = vld [vmem:[%s7114_s1 + $0x774] ss:$8 sps:$4 sm:$0xff]  }
  0xdf   : > { %2386 = vmatprep.subr.bf16.mxu1 %v5287_v40  ;;  %v2031_v40 = vpack.c.bf16 %v6218_v53, %v2025_v32  ;;  %v596_v5 = vpop.f32.mrf.mxu1  ;;  %v5372_v32 = vld [vmem:[%s7114_s1 + $0x730] ss:$8 sps:$4 sm:$0xff]  }
  0xe1   : > { %1957 = vmatpush2.bf16.msra.mxu0 %v5282_v39  ;;  %v5332_v39 = vld [vmem:[%s7114_s1 + $0x6a4] ss:$8 sps:$4 sm:$0xff]  }
  0xe2   : > { %1958 = vmatprep.subr.bf16.mxu0 %v5290_v41  ;;  %2387 = vmatpush2.bf16.msra.mxu1 %v5285_v44  ;;  %v2138_v41 = vsel %vm274_vm0, %v2133_v34, %v2137_v35  ;;  %v5335_v44 = vld [vmem:[%s7114_s1 + $0x764] ss:$8 sps:$4 sm:$0xff]   ;;  %v5375_v35 = vld [vmem:[%s7114_s1 + $0x8f0] ss:$8 sps:$4 sm:$0xff]  }
  0xe3   : > { %2388 = vmatprep.subr.bf16.mxu1 %v5293_v47  ;;  %v5333_v47 = vld [vmem:[%s7114_s1 + $0x760] ss:$8 sps:$4 sm:$0xff]   ;;  %v5380_v34 = vld [vmem:[%s7114_s1 + $0x724] ss:$8 sps:$4 sm:$0xff]  }
  0xe5   : > { %1959 = vmatpush2.bf16.msra.mxu0 %v5288_v46  ;;  %v5338_v46 = vld [vmem:[%s7114_s1 + $0x694] ss:$8 sps:$4 sm:$0xff]  }
  0xe6   : > { %1960 = vmatprep.subr.bf16.mxu0 %v5296_v45  ;;  %2389 = vmatpush2.bf16.msra.mxu1 %v5291_v51  ;;  %v2744_v45 = vld [vmem:[%s5654_s18 + $0x8] sm:$0xfc]  ;;  %v2747_v51 = vld [vmem:[%s5654_s18 + $0x38] sm:$0x3] }
  0xe7   : > { %2390 = vmatprep.subr.bf16.mxu1 %v5299_v54  ;;  %v5342_v54 = vld [vmem:[%s7114_s1 + $0x680] ss:$8 sps:$4 sm:$0xff]   ;;  %v2750_v56 = vpack.c.bf16 %v6218_v53, %v2744_v45  ;;  %v2753_v57 = vpack.c.bf16 %v2747_v51, %v2747_v51  ;;  %v5404_v45 = vld [vmem:[%s7114_s1 + $0x6e4] ss:$8 sps:$4 sm:$0xff]   ;;  %v5399_v51 = vld [vmem:[%s7114_s1 + $0x9b0] ss:$8 sps:$4 sm:$0xff]  }
  0xe9   : > { %1961 = vmatpush2.bf16.msra.mxu0 %v5294_v52  ;;  %v5339_v52 = vld [vmem:[%s7114_s1 + $0x750] ss:$8 sps:$4 sm:$0xff]   ;;  %v2805_v1 = vrot.slane %v2750_v56, 1  ;;  %v5405_v56 = vld [vmem:[%s7114_s1 + $0x9a0] ss:$8 sps:$4 sm:$0xff]  }
  0xea   : > { %2419 = vmatprep.subr.bf16.mxu0 %v5305_v55  ;;  %2391 = vmatpush2.bf16.msra.mxu1 %v5297_v3  ;;  %v5347_v55 = vld [vmem:[%s7114_s1 + $0x744] ss:$8 sps:$4 sm:$0xff]   ;;  %v5350_v3 = vld [vmem:[%s7114_s1 + $0x674] ss:$8 sps:$4 sm:$0xff]  }
  0xeb   : > { %2392 = vmatprep.subr.bf16.mxu1 %v5302_v61  ;;  %v5345_v61 = vld [vmem:[%s7114_s1 + $0x740] ss:$8 sps:$4 sm:$0xff]  }
  0xec   : > { %1963 = vmatmul.mubr.bf16.vlgmr.msra.gmra.mxu0 %v1718_v60  ;;  %v2026_v60 = vld [vmem:[%s5654_s18 + $0x10] sm:$0xff] }
  0xed   : > { %2420 = vmatpush1.bf16.msra.mxu0 %v5303_v62  ;;  %2443 = vmatprep.mubr.bf16.mxu0 %v5578_v2  ;;  %v5348_v62 = vld [vmem:[%s7114_s1 + $0x670] ss:$8 sps:$4 sm:$0xff]  }
  0xee   : > { %2421 = vmatprep.subr.bf16.mxu0 %v5311_v4  ;;  %2393 = vmatpush2.bf16.msra.mxu1 %v5300_v6  ;;  %v2806_v4 = vrot.slane %v2753_v57, 1  ;;  %v5356_v6 = vld [vmem:[%s7114_s1 + $0x664] ss:$8 sps:$4 sm:$0xff]   ;;  %v5408_v57 = vld [vmem:[%s7114_s1 + $0x6d0] ss:$8 sps:$4 sm:$0xff]  }
  0xef   : > { %2394 = vmatprep.subr.bf16.mxu1 %v5308_v7  ;;  %v2032_v7 = vpack.c.bf16 %v6371_v58, %v2026_v60  ;;  %v5419_v60 = vld [vmem:[%s7114_s1 + $0x984] ss:$8 sps:$4 sm:$0xff]  }
  0xf1   : > { %2422 = vmatpush1.bf16.msra.mxu0 %v5309_v9 }
  0xf2   : > { %2423 = vmatprep.subr.bf16.mxu0 %v5317_v13  ;;  %2395 = vmatpush2.bf16.msra.mxu1 %v5306_v14  ;;  %v2807_v13 = vsel %vm951_vm2, %v2805_v1, %v2806_v4  ;;  %v598_v14 = vpop.f32.mrf.mxu1  ;;  %v5425_v1 = vld [vmem:[%s7114_s1 + $0x9f4] ss:$8 sps:$4 sm:$0xff]   ;;  %v5417_v4 = vld [vmem:[%s7114_s1 + $0x980] ss:$8 sps:$4 sm:$0xff]  }
  0xf3   : > { %2396 = vmatprep.subr.bf16.mxu1 %v5314_v15 }
  0xf5   : > { %2424 = vmatpush1.bf16.msra.mxu0 %v5315_v19  ;;  %v5357_v19 = vld [vmem:[%s7114_s1 + $0x920] ss:$8 sps:$4 sm:$0xff]  }
  0xf6   : > { %2425 = vmatprep.subr.bf16.mxu0 %v5323_v22  ;;  %2397 = vmatpush2.bf16.msra.mxu1 %v5312_v23  ;;  %v5365_v22 = vld [vmem:[%s7114_s1 + $0x914] ss:$8 sps:$4 sm:$0xff]   ;;  %v600_v23 = vpop.f32.mrf.mxu1 }
  0xf7   : > { %2398 = vmatprep.subr.bf16.mxu1 %v5320_v24 }
  0xf9   : > { %2426 = vmatpush1.bf16.msra.mxu0 %v5321_v28  ;;  %v5366_v28 = vld [vmem:[%s7114_s1 + $0x640] ss:$8 sps:$4 sm:$0xff]  }
  0xfa   : > { %2657 = vmatprep.subr.bf16.mxu0 %v5326_v31  ;;  %2399 = vmatpush2.bf16.msra.mxu1 %v5318_v33  ;;  %v5369_v31 = vld [vmem:[%s7114_s1 + $0x900] ss:$8 sps:$4 sm:$0xff]   ;;  %v5377_v33 = vld [vmem:[%s7114_s1 + $0x8f4] ss:$8 sps:$4 sm:$0xff]  }
  0xfb   : > { %2708 = vmatprep.subr.bf16.mxu1 %v5329_v38  ;;  %v5386_v38 = vld [vmem:[%s7114_s1 + $0x714] ss:$8 sps:$4 sm:$0xff]  }
  0xfc   : > { %4657 = vmatmul.mubr.msk.bf16.vlgmr.msra.gmra.mxu0 %vm513_vm1, %v2162_v36  ;;  %v5378_v36 = vld [vmem:[%s7114_s1 + $0x720] ss:$8 sps:$4 sm:$0xff]  }
  0xfd   : > { %2658 = vmatpush1.bf16.msra.mxu0 %v5324_v37  ;;  %2689 = vmatprep.mubr.bf16.mxu0 %v2031_v40  ;;  %v5383_v37 = vld [vmem:[%s7114_s1 + $0x8e4] ss:$8 sps:$4 sm:$0xff]   ;;  %v5384_v40 = vld [vmem:[%s7114_s1 + $0x710] ss:$8 sps:$4 sm:$0xff]  }
  0xfe   : > { %2659 = vmatprep.subr.bf16.mxu0 %v5332_v39  ;;  %2401 = vmatmul.mubr.bf16.vlgmr.msra.gmra.mxu1 %v2138_v41  ;;  %v5381_v39 = vld [vmem:[%s7114_s1 + $0x8e0] ss:$8 sps:$4 sm:$0xff]   ;;  %v5389_v41 = vld [vmem:[%s7114_s1 + $0x8d4] ss:$8 sps:$4 sm:$0xff]  }
  0xff   : > { %2709 = vmatpush1.bf16.msra.mxu1 %v5327_v42  ;;  %2732 = vmatprep.mubr.bf16.mxu1 %v5578_v2  ;;  %v5392_v42 = vld [vmem:[%s7114_s1 + $0x704] ss:$8 sps:$4 sm:$0xff]  }
 0x100   : > { %2710 = vmatprep.subr.bf16.mxu1 %v5335_v44  ;;  %v5390_v44 = vld [vmem:[%s7114_s1 + $0x700] ss:$8 sps:$4 sm:$0xff]  }
 0x101   : > { %2660 = vmatpush1.bf16.msra.mxu0 %v5330_v43  ;;  %v5387_v43 = vld [vmem:[%s7114_s1 + $0x8d0] ss:$8 sps:$4 sm:$0xff]  }
 0x102   : > { %2661 = vmatprep.subr.bf16.mxu0 %v5338_v46  ;;  %v5395_v46 = vld [vmem:[%s7114_s1 + $0x8c4] ss:$8 sps:$4 sm:$0xff]  }
 0x103   : > { %2711 = vmatpush1.bf16.msra.mxu1 %v5333_v47  ;;  %v5398_v47 = vld [vmem:[%s7114_s1 + $0x6f4] ss:$8 sps:$4 sm:$0xff]  }
 0x104   : > { %2712 = vmatprep.subr.bf16.mxu1 %v5341_v49  ;;  %v5396_v49 = vld [vmem:[%s7114_s1 + $0x6f0] ss:$8 sps:$4 sm:$0xff]  }
 0x105   : > { %2662 = vmatpush1.bf16.msra.mxu0 %v5336_v48  ;;  %v5393_v48 = vld [vmem:[%s7114_s1 + $0x8c0] ss:$8 sps:$4 sm:$0xff]  }
 0x106   : > { %2663 = vmatprep.subr.bf16.mxu0 %v5344_v50  ;;  %v5401_v50 = vld [vmem:[%s7114_s1 + $0x9b4] ss:$8 sps:$4 sm:$0xff]  }
 0x107   : > { %2713 = vmatpush1.bf16.msra.mxu1 %v5339_v52  ;;  %v5402_v52 = vld [vmem:[%s7114_s1 + $0x6e0] ss:$8 sps:$4 sm:$0xff]  }
 0x108   : > { %2714 = vmatprep.subr.bf16.mxu1 %v5347_v55  ;;  %v5410_v55 = vld [vmem:[%s7114_s1 + $0x6d4] ss:$8 sps:$4 sm:$0xff]  }
 0x109   : > { %2664 = vmatpush1.bf16.msra.mxu0 %v5342_v54  ;;  %v5407_v54 = vld [vmem:[%s7114_s1 + $0x9a4] ss:$8 sps:$4 sm:$0xff]  }
 0x10a   : > { %2665 = vmatprep.subr.bf16.mxu0 %v5350_v3  ;;  %v5416_v3 = vld [vmem:[%s7114_s1 + $0x6c4] ss:$8 sps:$4 sm:$0xff]  }
 0x10b   : > { %2715 = vmatpush1.bf16.msra.mxu1 %v5345_v61  ;;  %v5411_v61 = vld [vmem:[%s7114_s1 + $0x990] ss:$8 sps:$4 sm:$0xff]  }
 0x10c   : > { %v551_v9 = vpop.f32.mrf.mxu0  ;;  %3016 = vmatprep.subr.bf16.mxu1 %v5353_v0  ;;  %v2024_v0 = vld [vmem:[%s5654_s18] sm:$0xff] }
 0x10d   : > { %v6509_v11 = vadd.f32 %v594_v59, %v551_v9  ;;  %2666 = vmatpush1.bf16.msra.mxu0 %v5348_v62  ;;  %v5413_v59 = vld [vmem:[%s7114_s1 + $0x994] ss:$8 sps:$4 sm:$0xff]   ;;  %v5414_v62 = vld [vmem:[%s7114_s1 + $0x6c0] ss:$8 sps:$4 sm:$0xff]   ;;  %v5423_v9 = vld [vmem:[%s7114_s1 + $0x9f0] ss:$8 sps:$4 sm:$0xff]  }
 0x10e   : > { %v553_v15 = vpop.f32.mrf.mxu0  ;;  %2667 = vmatprep.subr.bf16.mxu0 %v5356_v6  ;;  %4698 = vmatmul.mubr.msk.bf16.vlgmr.msra.gmra.mxu1 %vm513_vm1, %v2032_v7  ;;  %v3107_v6 = vld [vmem:[%s5654_s18 + $0x8] sm:$0xf8]  ;;  %v3110_v7 = vld [vmem:[%s5654_s18 + $0x38] sm:$0x7] }
 0x10f   : > { %v6519_v18 = vadd.f32 %v596_v5, %v553_v15  ;;  %3017 = vmatpush1.bf16.msra.mxu1 %v5351_v8  ;;  %3048 = vmatprep.mubr.bf16.mxu1 %v2807_v13  ;;  %v2030_v5 = vpack.c.bf16 %v6385_v63, %v2024_v0  ;;  %v5422_v8 = vld [vmem:[%s7114_s1 + $0x974] ss:$8 sps:$4 sm:$0xff]   ;;  %v3116_v13 = vpack.c.bf16 %v3110_v7, %v3110_v7  ;;  %v5428_v15 = vld [vmem:[%s7114_s1 + $0x964] ss:$8 sps:$4 sm:$0xff]   ;;  %v5450_v0 = vld [vmem:[%s7114_s1 + $0xa60] ss:$8 sps:$4 sm:$0xff]  }
 0x110   : > { %v555_v20 = vpop.f32.mrf.mxu0  ;;  %3018 = vmatprep.subr.bf16.mxu1 %v5359_v12  ;;  %v3113_v12 = vpack.c.bf16 %v6218_v53, %v3107_v6  ;;  %v5437_v53 = vld [vmem:[%s7114_s1 + $0x9d4] ss:$8 sps:$4 sm:$0xff]  }
 0x111   : > { %v6527_v21 = vadd.f32 %v598_v14, %v555_v20  ;;  %2668 = vmatpush1.bf16.msra.mxu0 %v5354_v10  ;;  %v5431_v10 = vld [vmem:[%s7114_s1 + $0x9e4] ss:$8 sps:$4 sm:$0xff]   ;;  %v5420_v14 = vld [vmem:[%s7114_s1 + $0x970] ss:$8 sps:$4 sm:$0xff]   ;;  %v2748_v20 = vld [vmem:[%s5654_s18 + $0x40] sm:$0x3] }
 0x112   : > { %v557_v24 = vpop.f32.mrf.mxu0  ;;  %2669 = vmatprep.subr.bf16.mxu0 %v5362_v16  ;;  %v5429_v16 = vld [vmem:[%s7114_s1 + $0x9e0] ss:$8 sps:$4 sm:$0xff]  }
 0x113   : > { %v6535_v26 = vadd.f32 %v600_v23, %v557_v24  ;;  %3019 = vmatpush1.bf16.msra.mxu1 %v5357_v19  ;;  %v2745_v19 = vld [vmem:[%s5654_s18 + $0x10] sm:$0xfc]  ;;  %v3185_v23 = vshrl.u32 %v3116_v13, 16  ;;  %v3188_v24 = vshll.u32 %v3116_v13, 16  ;;  %v3506_v13 = vld [vmem:[%s5654_s18 + $0x8] sm:$0xf0] }
 0x114   : > { %3020 = vmatprep.subr.bf16.mxu1 %v5365_v22  ;;  %v3180_v22 = vshll.u32 %v3113_v12, 16 }
 0x115   : > { %2670 = vmatpush1.bf16.msra.mxu0 %v5360_v17  ;;  %v3177_v17 = vshrl.u32 %v3113_v12, 16  ;;  %v5464_v12 = vld [vmem:[%s7114_s1 + $0xa44] ss:$8 sps:$4 sm:$0xff]  }
 0x116   : > { %2671 = vmatprep.subr.bf16.mxu0 %v5368_v25  ;;  %v5426_v25 = vld [vmem:[%s7114_s1 + $0x960] ss:$8 sps:$4 sm:$0xff]  }
 0x117   : > { %3021 = vmatpush1.bf16.msra.mxu1 %v5363_v27  ;;  %v5434_v27 = vld [vmem:[%s7114_s1 + $0x954] ss:$8 sps:$4 sm:$0xff]  }
 0x118   : > { %3022 = vmatprep.subr.bf16.mxu1 %v5371_v29  ;;  %v2743_v29 = vld [vmem:[%s5654_s18] sm:$0xfc] }
 0x119   : > { %2672 = vmatpush1.bf16.msra.mxu0 %v5366_v28  ;;  %v5435_v28 = vld [vmem:[%s7114_s1 + $0x9d0] ss:$8 sps:$4 sm:$0xff]  }
 0x11a   : > { %2673 = vmatprep.subr.bf16.mxu0 %v5374_v30  ;;  %v2746_v30 = vld [vmem:[%s5654_s18 + $0x30] sm:$0x3] }
 0x11b   : > { %3023 = vmatpush1.bf16.msra.mxu1 %v5369_v31  ;;  %v2751_v31 = vpack.c.bf16 %v6371_v58, %v2745_v19 }
 0x11c   : > { %3024 = vmatprep.subr.bf16.mxu1 %v5377_v33  ;;  %v5443_v33 = vld [vmem:[%s7114_s1 + $0x9c4] ss:$8 sps:$4 sm:$0xff]  }
 0x11d   : > { %2674 = vmatpush2.bf16.msra.mxu0 %v5372_v32  ;;  %v2754_v32 = vpack.c.bf16 %v2748_v20, %v2748_v20 }
 0x11e   : > { %2675 = vmatprep.subr.bf16.mxu0 %v5380_v34  ;;  %v3179_v34 = vrot.slane %v3177_v17, 1  ;;  %v5462_v17 = vld [vmem:[%s7114_s1 + $0xa40] ss:$8 sps:$4 sm:$0xff]  }
 0x11f   : > { %3025 = vmatpush1.bf16.msra.mxu1 %v5375_v35  ;;  %v3182_v35 = vrot.slane %v3180_v22, 2  ;;  %v5467_v22 = vld [vmem:[%s7114_s1 + $0xb04] ss:$8 sps:$4 sm:$0xff]  }
 0x120   : > { %3026 = vmatprep.subr.bf16.mxu1 %v5383_v37  ;;  %v3190_v37 = vrot.slane %v3188_v24, 2 }
 0x121   : > { %2676 = vmatpush2.bf16.msra.mxu0 %v5378_v36  ;;  %v3187_v36 = vrot.slane %v3185_v23, 1  ;;  %v5567_v23 = vld [vmem:[%s5654_s18 + $0x20] sm:$0xff] }
 0x122   : > { %2677 = vmatprep.subr.bf16.mxu0 %v5386_v38  ;;  %v5432_v38 = vld [vmem:[%s7114_s1 + $0x950] ss:$8 sps:$4 sm:$0xff]   ;;  %v3512_v24 = vpack.c.bf16 %v5567_v23, %v3506_v13  ;;  %v5524_v13 = vld [vmem:[%s7114_s1 + $0xaa4] ss:$8 sps:$4 sm:$0xff]  }
 0x123   : > { %3027 = vmatpush1.bf16.msra.mxu1 %v5381_v39  ;;  %v2749_v39 = vpack.c.bf16 %v6385_v63, %v2743_v29  ;;  %v5528_v23 = vld [vmem:[%s7114_s1 + $0xa90] ss:$8 sps:$4 sm:$0xff]  }
 0x124   : > { %3028 = vmatprep.subr.bf16.mxu1 %v5389_v41  ;;  %v5440_v41 = vld [vmem:[%s7114_s1 + $0x944] ss:$8 sps:$4 sm:$0xff]  }
 0x125   : > { %2678 = vmatpush2.bf16.msra.mxu0 %v5384_v40  ;;  %v2752_v40 = vpack.c.bf16 %v2746_v30, %v2746_v30 }
 0x126   : > { %2679 = vmatprep.subr.bf16.mxu0 %v5392_v42  ;;  %v5441_v42 = vld [vmem:[%s7114_s1 + $0x9c0] ss:$8 sps:$4 sm:$0xff]  }
 0x127   : > { %3029 = vmatpush1.bf16.msra.mxu1 %v5387_v43  ;;  %v2808_v43 = vrot.slane %v2751_v31, 1  ;;  %v5468_v31 = vld [vmem:[%s7114_s1 + $0xa30] ss:$8 sps:$4 sm:$0xff]  }
 0x128   : > { %3030 = vmatprep.subr.bf16.mxu1 %v5395_v46  ;;  %v5446_v46 = vld [vmem:[%s7114_s1 + $0xa74] ss:$8 sps:$4 sm:$0xff]  }
 0x129   : > { %2680 = vmatpush2.bf16.msra.mxu0 %v5390_v44  ;;  %v2809_v44 = vrot.slane %v2754_v32, 1  ;;  %v5473_v32 = vld [vmem:[%s7114_s1 + $0xbb4] ss:$8 sps:$4 sm:$0xff]  }
 0x12a   : > { %2681 = vmatprep.subr.bf16.mxu0 %v5398_v47  ;;  %v3183_v47 = vor.u32 %v3182_v35, %v3179_v34  ;;  %v5476_v35 = vld [vmem:[%s7114_s1 + $0xa24] ss:$8 sps:$4 sm:$0xff]  }
 0x12b   : > { %3031 = vmatpush1.bf16.msra.mxu1 %v5393_v48  ;;  %v3191_v48 = vor.u32 %v3190_v37, %v3187_v36  ;;  %v5471_v37 = vld [vmem:[%s7114_s1 + $0xbb0] ss:$8 sps:$4 sm:$0xff]  }
 0x12c   : > { %3032 = vmatprep.subr.bf16.mxu1 %v5401_v50  ;;  %v2802_v50 = vrot.slane %v2749_v39, 1  ;;  %v5479_v39 = vld [vmem:[%s7114_s1 + $0xba4] ss:$8 sps:$4 sm:$0xff]  }
 0x12d   : > { %2682 = vmatpush2.bf16.msra.mxu0 %v5396_v49  ;;  %v5438_v49 = vld [vmem:[%s7114_s1 + $0x940] ss:$8 sps:$4 sm:$0xff]  }
 0x12e   : > { %2683 = vmatprep.subr.bf16.mxu0 %v5404_v45  ;;  %v2803_v45 = vrot.slane %v2752_v40, 1 }
 0x12f   : > { %3033 = vmatpush2.bf16.msra.mxu1 %v5399_v51  ;;  %v5444_v51 = vld [vmem:[%s7114_s1 + $0xa70] ss:$8 sps:$4 sm:$0xff]  }
 0x130   : > { %3034 = vmatprep.subr.bf16.mxu1 %v5407_v54  ;;  %v5449_v54 = vld [vmem:[%s7114_s1 + $0xb34] ss:$8 sps:$4 sm:$0xff]  }
 0x131   : > { %2684 = vmatpush2.bf16.msra.mxu0 %v5402_v52  ;;  %v2810_v52 = vsel %vm951_vm2, %v2808_v43, %v2809_v44  ;;  %v5480_v43 = vld [vmem:[%s7114_s1 + $0xa10] ss:$8 sps:$4 sm:$0xff]   ;;  %v5485_v44 = vld [vmem:[%s7114_s1 + $0xb94] ss:$8 sps:$4 sm:$0xff]  }
 0x132   : > { %2685 = vmatprep.subr.bf16.mxu0 %v5410_v55  ;;  %v3108_v55 = vld [vmem:[%s5654_s18 + $0x10] sm:$0xf8] }
 0x133   : > { %3035 = vmatpush2.bf16.msra.mxu1 %v5405_v56  ;;  %v3111_v56 = vld [vmem:[%s5654_s18 + $0x40] sm:$0x7] }
 0x134   : > { %3036 = vmatprep.subr.bf16.mxu1 %v5413_v59  ;;  %v3192_v59 = vsel %vm1309_vm3, %v3183_v47, %v3191_v48  ;;  %v5483_v47 = vld [vmem:[%s7114_s1 + $0xb90] ss:$8 sps:$4 sm:$0xff]   ;;  %v5486_v48 = vld [vmem:[%s7114_s1 + $0xa00] ss:$8 sps:$4 sm:$0xff]  }
 0x135   : > { %2686 = vmatpush2.bf16.msra.mxu0 %v5408_v57  ;;  %v5452_v57 = vld [vmem:[%s7114_s1 + $0xa64] ss:$8 sps:$4 sm:$0xff]  }
 0x136   : > { %2687 = vmatprep.subr.bf16.mxu0 %v5416_v3  ;;  %v2804_v3 = vsel %vm951_vm2, %v2802_v50, %v2803_v45  ;;  %v5494_v50 = vld [vmem:[%s7114_s1 + $0xaf4] ss:$8 sps:$4 sm:$0xff]   ;;  %v5489_v45 = vld [vmem:[%s7114_s1 + $0xb80] ss:$8 sps:$4 sm:$0xff]  }
 0x137   : > { %3037 = vmatpush2.bf16.msra.mxu1 %v5411_v61  ;;  %v5447_v61 = vld [vmem:[%s7114_s1 + $0xb30] ss:$8 sps:$4 sm:$0xff]  }
 0x138   : > { %3038 = vmatprep.subr.bf16.mxu1 %v5419_v60  ;;  %v3117_v60 = vpack.c.bf16 %v3111_v56, %v3111_v56  ;;  %v5498_v56 = vld [vmem:[%s7114_s1 + $0xae0] ss:$8 sps:$4 sm:$0xff]  }
 0x139   : > { %2688 = vmatpush2.bf16.msra.mxu0 %v5414_v62  ;;  %v3114_v62 = vpack.c.bf16 %v6371_v58, %v3108_v55  ;;  %v5453_v58 = vld [vmem:[%s7114_s1 + $0xb20] ss:$8 sps:$4 sm:$0xff]   ;;  %v5495_v55 = vld [vmem:[%s7114_s1 + $0xb70] ss:$8 sps:$4 sm:$0xff]  }
 0x13a   : > { %3067 = vmatprep.subr.bf16.mxu0 %v5425_v1  ;;  %v5455_v1 = vld [vmem:[%s7114_s1 + $0xb24] ss:$8 sps:$4 sm:$0xff]   ;;  %v3202_v7 = vshrl.u32 %v3117_v60, 16 }
 0x13b   : > { %3039 = vmatpush2.bf16.msra.mxu1 %v5417_v4  ;;  %v5458_v4 = vld [vmem:[%s7114_s1 + $0xa54] ss:$8 sps:$4 sm:$0xff]   ;;  %v3197_v6 = vshll.u32 %v3114_v62, 16 }
 0x13c   : > { %2690 = vmatmul.mubr.bf16.vlgmr.msra.gmra.mxu0 %v2030_v5  ;;  %3040 = vmatprep.subr.bf16.mxu1 %v5422_v8  ;;  %v3194_v5 = vshrl.u32 %v3114_v62, 16  ;;  %v3205_v8 = vshll.u32 %v3117_v60, 16  ;;  %v3204_v19 = vrot.slane %v3202_v7, 1  ;;  %v5509_v62 = vld [vmem:[%s7114_s1 + $0xb54] ss:$8 sps:$4 sm:$0xff]  }
 0x13d   : > { %3068 = vmatpush1.bf16.msra.mxu0 %v5423_v9  ;;  %3091 = vmatprep.mubr.bf16.mxu0 %v5578_v2  ;;  %v5456_v9 = vld [vmem:[%s7114_s1 + $0xa50] ss:$8 sps:$4 sm:$0xff]   ;;  %v5512_v60 = vld [vmem:[%s7114_s1 + $0xac4] ss:$8 sps:$4 sm:$0xff]   ;;  %v5513_v7 = vld [vmem:[%s7114_s1 + $0xb40] ss:$8 sps:$4 sm:$0xff]  }
 0x13e   : > { %3069 = vmatprep.subr.bf16.mxu0 %v5431_v10  ;;  %v5461_v10 = vld [vmem:[%s7114_s1 + $0xb14] ss:$8 sps:$4 sm:$0xff]   ;;  %v3207_v20 = vrot.slane %v3205_v8, 2  ;;  %v5516_v8 = vld [vmem:[%s7114_s1 + $0xab0] ss:$8 sps:$4 sm:$0xff]  }
 0x13f   : > { %3041 = vmatpush2.bf16.msra.mxu1 %v5420_v14  ;;  %v3509_v14 = vld [vmem:[%s5654_s18 + $0x38] sm:$0xf] }
 0x140   : > { %3042 = vmatprep.subr.bf16.mxu1 %v5428_v15  ;;  %v5459_v15 = vld [vmem:[%s7114_s1 + $0xb10] ss:$8 sps:$4 sm:$0xff]   ;;  %v3208_v30 = vor.u32 %v3207_v20, %v3204_v19 }
 0x141   : > { %3070 = vmatpush1.bf16.msra.mxu0 %v5429_v16  ;;  %v3196_v16 = vrot.slane %v3194_v5, 1  ;;  %v3106_v5 = vld [vmem:[%s5654_s18] sm:$0xf8] }
 0x142   : > { %3071 = vmatprep.subr.bf16.mxu0 %v5437_v53  ;;  %v3199_v53 = vrot.slane %v3197_v6, 2  ;;  %v3109_v6 = vld [vmem:[%s5654_s18 + $0x30] sm:$0x7] }
 0x143   : > { %3043 = vmatpush2.bf16.msra.mxu1 %v5426_v25  ;;  %v3515_v25 = vpack.c.bf16 %v3509_v14, %v3509_v14  ;;  %v5519_v14 = vld [vmem:[%s7114_s1 + $0xc30] ss:$8 sps:$4 sm:$0xff]  }
 0x144   : > { %3044 = vmatprep.subr.bf16.mxu1 %v5434_v27  ;;  %v5470_v27 = vld [vmem:[%s7114_s1 + $0xa34] ss:$8 sps:$4 sm:$0xff]   ;;  %v3200_v29 = vor.u32 %v3199_v53, %v3196_v16 }
 0x145   : > { %3072 = vmatpush1.bf16.msra.mxu0 %v5435_v28  ;;  %v5465_v28 = vld [vmem:[%s7114_s1 + $0xb00] ss:$8 sps:$4 sm:$0xff]   ;;  %v3568_v34 = vrot.slane %v3515_v25, 2 }
 0x146   : > { %3073 = vmatprep.subr.bf16.mxu0 %v5443_v33  ;;  %v3567_v33 = vrot.slane %v3512_v24, 2  ;;  %v3209_v36 = vsel %vm1309_vm3, %v3200_v29, %v3208_v30  ;;  %v5533_v24 = vld [vmem:[%s7114_s1 + $0xc14] ss:$8 sps:$4 sm:$0xff]   ;;  %v5536_v30 = vld [vmem:[%s7114_s1 + $0xa84] ss:$8 sps:$4 sm:$0xff]  }
 0x147   : > { %3045 = vmatpush2.bf16.msra.mxu1 %v5432_v38  ;;  %v5474_v38 = vld [vmem:[%s7114_s1 + $0xa20] ss:$8 sps:$4 sm:$0xff]  }
 0x148   : > { %3046 = vmatprep.subr.bf16.mxu1 %v5440_v41  ;;  %v3569_v40 = vsel %vm1715_vm4, %v3567_v33, %v3568_v34  ;;  %v5482_v41 = vld [vmem:[%s7114_s1 + $0xa14] ss:$8 sps:$4 sm:$0xff]   ;;  %v5539_v33 = vld [vmem:[%s7114_s1 + $0xc04] ss:$8 sps:$4 sm:$0xff]  }
 0x149   : > { %3074 = vmatpush1.bf16.msra.mxu0 %v5441_v42  ;;  %v5477_v42 = vld [vmem:[%s7114_s1 + $0xba0] ss:$8 sps:$4 sm:$0xff]  }
 0x14a   : > { %3415 = vmatprep.subr.bf16.mxu0 %v5446_v46  ;;  %v5488_v46 = vld [vmem:[%s7114_s1 + $0xa04] ss:$8 sps:$4 sm:$0xff]  }
 0x14b   : > { %3047 = vmatpush2.bf16.msra.mxu1 %v5438_v49  ;;  %v5491_v49 = vld [vmem:[%s7114_s1 + $0xb84] ss:$8 sps:$4 sm:$0xff]  }
 0x14c   : > { %4779 = vmatmul.mubr.msk.bf16.vlgmr.msra.gmra.mxu0 %vm513_vm1, %v2810_v52  ;;  %3466 = vmatprep.subr.bf16.mxu1 %v5449_v54  ;;  %v5497_v52 = vld [vmem:[%s7114_s1 + $0xb74] ss:$8 sps:$4 sm:$0xff]   ;;  %v5500_v54 = vld [vmem:[%s7114_s1 + $0xae4] ss:$8 sps:$4 sm:$0xff]  }
 0x14d   : > { %3416 = vmatpush1.bf16.msra.mxu0 %v5444_v51  ;;  %3447 = vmatprep.mubr.bf16.mxu0 %v3192_v59  ;;  %v5492_v51 = vld [vmem:[%s7114_s1 + $0xaf0] ss:$8 sps:$4 sm:$0xff]   ;;  %v5506_v59 = vld [vmem:[%s7114_s1 + $0xad4] ss:$8 sps:$4 sm:$0xff]  }
 0x14e   : > { %3417 = vmatprep.subr.bf16.mxu0 %v5452_v57  ;;  %3049 = vmatmul.mubr.bf16.vlgmr.msra.gmra.mxu1 %v2804_v3  ;;  %v5503_v57 = vld [vmem:[%s7114_s1 + $0xb64] ss:$8 sps:$4 sm:$0xff]   ;;  %v5501_v3 = vld [vmem:[%s7114_s1 + $0xb60] ss:$8 sps:$4 sm:$0xff]  }
 0x14f   : > { %3467 = vmatpush1.bf16.msra.mxu1 %v5447_v61  ;;  %3490 = vmatprep.mubr.bf16.mxu1 %v5578_v2  ;;  %v5504_v61 = vld [vmem:[%s7114_s1 + $0xad0] ss:$8 sps:$4 sm:$0xff]  }
 0x150   : > { %3468 = vmatprep.subr.bf16.mxu1 %v5455_v1  ;;  %v5510_v1 = vld [vmem:[%s7114_s1 + $0xac0] ss:$8 sps:$4 sm:$0xff]  }
 0x151   : > { %3418 = vmatpush1.bf16.msra.mxu0 %v5450_v0  ;;  %v5507_v0 = vld [vmem:[%s7114_s1 + $0xb50] ss:$8 sps:$4 sm:$0xff]  }
 0x152   : > { %3419 = vmatprep.subr.bf16.mxu0 %v5458_v4  ;;  %v5515_v4 = vld [vmem:[%s7114_s1 + $0xb44] ss:$8 sps:$4 sm:$0xff]  }
 0x153   : > { %3469 = vmatpush1.bf16.msra.mxu1 %v5453_v58  ;;  %v5518_v58 = vld [vmem:[%s7114_s1 + $0xab4] ss:$8 sps:$4 sm:$0xff]  }
 0x154   : > { %3470 = vmatprep.subr.bf16.mxu1 %v5461_v10  ;;  %v3112_v10 = vpack.c.bf16 %v6385_v63, %v3106_v5  ;;  %v5527_v63 = vld [vmem:[%s7114_s1 + $0xc24] ss:$8 sps:$4 sm:$0xff]  }
 0x155   : > { %3420 = vmatpush1.bf16.msra.mxu0 %v5456_v9  ;;  %v5521_v9 = vld [vmem:[%s7114_s1 + $0xc34] ss:$8 sps:$4 sm:$0xff]  }
 0x156   : > { %3421 = vmatprep.subr.bf16.mxu0 %v5464_v12  ;;  %v3115_v12 = vpack.c.bf16 %v3109_v6, %v3109_v6  ;;  %v3160_v16 = vshrl.u32 %v3112_v10, 16  ;;  %v3163_v53 = vshll.u32 %v3112_v10, 16 }
 0x157   : > { %3471 = vmatpush1.bf16.msra.mxu1 %v5459_v15  ;;  %v5522_v15 = vld [vmem:[%s7114_s1 + $0xaa0] ss:$8 sps:$4 sm:$0xff]  }
 0x158   : > { %3472 = vmatprep.subr.bf16.mxu1 %v5467_v22  ;;  %v3168_v19 = vshrl.u32 %v3115_v12, 16  ;;  %v3171_v20 = vshll.u32 %v3115_v12, 16  ;;  %v5525_v22 = vld [vmem:[%s7114_s1 + $0xc20] ss:$8 sps:$4 sm:$0xff]   ;;  %v3162_v25 = vrot.slane %v3160_v16, 1 }
 0x159   : > { %3422 = vmatpush1.bf16.msra.mxu0 %v5462_v17  ;;  %v5530_v17 = vld [vmem:[%s7114_s1 + $0xa94] ss:$8 sps:$4 sm:$0xff]  }
 0x15a   : > { %3423 = vmatprep.subr.bf16.mxu0 %v5470_v27  ;;  %v3165_v27 = vrot.slane %v3163_v53, 2  ;;  %v3173_v29 = vrot.slane %v3171_v20, 2 }
 0x15b   : > { %3473 = vmatpush1.bf16.msra.mxu1 %v5465_v28  ;;  %v3170_v28 = vrot.slane %v3168_v19, 1 }
 0x15c   : > { %3778 = vmatprep.subr.bf16.mxu1 %v5473_v32  ;;  %v5534_v32 = vld [vmem:[%s7114_s1 + $0xa80] ss:$8 sps:$4 sm:$0xff]   ;;  %v3166_v34 = vor.u32 %v3165_v27, %v3162_v25 }
 0x15d   : > { %3424 = vmatpush1.bf16.msra.mxu0 %v5468_v31  ;;  %v5531_v31 = vld [vmem:[%s7114_s1 + $0xc10] ss:$8 sps:$4 sm:$0xff]  }
 0x15e   : > { %3425 = vmatprep.subr.bf16.mxu0 %v5476_v35  ;;  %4860 = vmatmul.mubr.msk.bf16.vlgmr.msra.gmra.mxu1 %vm513_vm1, %v3209_v36  ;;  %v3174_v35 = vor.u32 %v3173_v29, %v3170_v28  ;;  %v5545_v36 = vld [vmem:[%s7114_s1 + $0xc74] ss:$8 sps:$4 sm:$0xff]  }
 0x15f   : > { %3779 = vmatpush1.bf16.msra.mxu1 %v5471_v37  ;;  %3810 = vmatprep.mubr.bf16.mxu1 %v3569_v40  ;;  %v5537_v37 = vld [vmem:[%s7114_s1 + $0xc00] ss:$8 sps:$4 sm:$0xff]   ;;  %v5543_v40 = vld [vmem:[%s7114_s1 + $0xc70] ss:$8 sps:$4 sm:$0xff]  }
 0x160   : > { %3780 = vmatprep.subr.bf16.mxu1 %v5479_v39  ;;  %v5542_v39 = vld [vmem:[%s7114_s1 + $0xbf4] ss:$8 sps:$4 sm:$0xff]  }
 0x161   : > { %3426 = vmatpush1.bf16.msra.mxu0 %v5474_v38  ;;  %v3175_v38 = vsel %vm1309_vm3, %v3166_v34, %v3174_v35 }
 0x162   : > { %3427 = vmatprep.subr.bf16.mxu0 %v5482_v41  ;;  %v5551_v41 = vld [vmem:[%s7114_s1 + $0xc64] ss:$8 sps:$4 sm:$0xff]  }
 0x163   : > { %3781 = vmatpush1.bf16.msra.mxu1 %v5477_v42  ;;  %v5540_v42 = vld [vmem:[%s7114_s1 + $0xbf0] ss:$8 sps:$4 sm:$0xff]  }
 0x164   : > { %3782 = vmatprep.subr.bf16.mxu1 %v5485_v44  ;;  %v5549_v44 = vld [vmem:[%s7114_s1 + $0xc60] ss:$8 sps:$4 sm:$0xff]  }
 0x165   : > { %3428 = vmatpush1.bf16.msra.mxu0 %v5480_v43  ;;  %v5548_v43 = vld [vmem:[%s7114_s1 + $0xbe4] ss:$8 sps:$4 sm:$0xff]  }
 0x166   : > { %3429 = vmatprep.subr.bf16.mxu0 %v5488_v46  ;;  %v5557_v46 = vld [vmem:[%s7114_s1 + $0xc54] ss:$8 sps:$4 sm:$0xff]  }
 0x167   : > { %3783 = vmatpush1.bf16.msra.mxu1 %v5483_v47  ;;  %v3507_v47 = vld [vmem:[%s5654_s18 + $0x10] sm:$0xf0] }
 0x168   : > { %3784 = vmatprep.subr.bf16.mxu1 %v5491_v49  ;;  %v5546_v49 = vld [vmem:[%s7114_s1 + $0xbe0] ss:$8 sps:$4 sm:$0xff]  }
 0x169   : > { %3430 = vmatpush1.bf16.msra.mxu0 %v5486_v48  ;;  %v3510_v48 = vld [vmem:[%s5654_s18 + $0x40] sm:$0xf] }
 0x16a   : > { %3431 = vmatprep.subr.bf16.mxu0 %v5494_v50  ;;  %v5554_v50 = vld [vmem:[%s7114_s1 + $0xbd4] ss:$8 sps:$4 sm:$0xff]  }
 0x16b   : > { %3785 = vmatpush1.bf16.msra.mxu1 %v5489_v45  ;;  %v5555_v45 = vld [vmem:[%s7114_s1 + $0xc50] ss:$8 sps:$4 sm:$0xff]  }
 0x16c   : > { %3786 = vmatprep.subr.bf16.mxu1 %v5497_v52  ;;  %v5568_v52 = vld [vmem:[%s5654_s18 + $0x28] sm:$0xff] }
 0x16d   : > { %3432 = vmatpush2.bf16.msra.mxu0 %v5492_v51  ;;  %v3505_v51 = vld [vmem:[%s5654_s18] sm:$0xf0] }
 0x16e   : > { %3433 = vmatprep.subr.bf16.mxu0 %v5500_v54  ;;  %v3513_v54 = vpack.c.bf16 %v5568_v52, %v3507_v47 }
 0x16f   : > { %3787 = vmatpush1.bf16.msra.mxu1 %v5495_v55  ;;  %v3516_v55 = vpack.c.bf16 %v3510_v48, %v3510_v48 }
 0x170   : > { %3788 = vmatprep.subr.bf16.mxu1 %v5503_v57  ;;  %v5552_v57 = vld [vmem:[%s7114_s1 + $0xbd0] ss:$8 sps:$4 sm:$0xff]  }
 0x171   : > { %3434 = vmatpush2.bf16.msra.mxu0 %v5498_v56  ;;  %v5563_v56 = vld [vmem:[%s7114_s1 + $0xc44] ss:$8 sps:$4 sm:$0xff]  }
 0x172   : > { %3435 = vmatprep.subr.bf16.mxu0 %v5506_v59  ;;  %v5569_v59 = vld [vmem:[%s5654_s18 + $0x18] sm:$0xff] }
 0x173   : > { %3789 = vmatpush1.bf16.msra.mxu1 %v5501_v3  ;;  %v3511_v3 = vpack.c.bf16 %v5569_v59, %v3505_v51 }
 0x174   : > { %3790 = vmatprep.subr.bf16.mxu1 %v5509_v62  ;;  %v5560_v62 = vld [vmem:[%s7114_s1 + $0xbc4] ss:$8 sps:$4 sm:$0xff]  }
 0x175   : > { %3436 = vmatpush2.bf16.msra.mxu0 %v5504_v61 }
 0x176   : > { %3437 = vmatprep.subr.bf16.mxu0 %v5512_v60  ;;  %v5561_v60 = vld [vmem:[%s7114_s1 + $0xc40] ss:$8 sps:$4 sm:$0xff]  }
 0x177   : > { %3791 = vmatpush1.bf16.msra.mxu1 %v5507_v0  ;;  %v3570_v0 = vrot.slane %v3513_v54, 2 }
 0x178   : > { %3792 = vmatprep.subr.bf16.mxu1 %v5515_v4  ;;  %v5558_v4 = vld [vmem:[%s7114_s1 + $0xbc0] ss:$8 sps:$4 sm:$0xff]  }
 0x179   : > { %3438 = vmatpush2.bf16.msra.mxu0 %v5510_v1  ;;  %v3571_v1 = vrot.slane %v3516_v55, 2 }
 0x17a   : > { %3439 = vmatprep.subr.bf16.mxu0 %v5518_v58  ;;  %v3564_v58 = vrot.slane %v3511_v3, 2 }
 0x17b   : > { %3793 = vmatpush1.bf16.msra.mxu1 %v5513_v7  ;;  %v3572_v6 = vsel %vm1715_vm4, %v3570_v0, %v3571_v1 }
 0x17c   : > { %3794 = vmatprep.subr.bf16.mxu1 %v5521_v9  ;;  %v840_v9 = vpop.f32.mrf.mxu1 }
 0x17d   : > { %3440 = vmatpush2.bf16.msra.mxu0 %v5516_v8  ;;  %v6973_v8 = vpop.f32.mrf.mxu0 }
 0x17e   : > { %3441 = vmatprep.subr.bf16.mxu0 %v5524_v13  ;;  %v842_v12 = vpop.f32.mrf.mxu1 }
 0x17f   : > { %3795 = vmatpush2.bf16.msra.mxu1 %v5519_v14  ;;  %v6975_v10 = vpop.f32.mrf.mxu0 }
 0x180   : > { %3796 = vmatprep.subr.bf16.mxu1 %v5527_v63  ;;  %v844_v14 = vpop.f32.mrf.mxu1 }
 0x181   : > { %3442 = vmatpush2.bf16.msra.mxu0 %v5522_v15  ;;  %v6977_v13 = vpop.f32.mrf.mxu0 }
 0x182   : > { %3443 = vmatprep.subr.bf16.mxu0 %v5530_v17  ;;  %v846_v16 = vpop.f32.mrf.mxu1 }
 0x183   : > { %3797 = vmatpush2.bf16.msra.mxu1 %v5525_v22  ;;  %v6979_v15 = vpop.f32.mrf.mxu0 }
 0x184   : > { %3798 = vmatprep.subr.bf16.mxu1 %v5533_v24  ;;  %v1243_v53 = vpop.f32.mrf.mxu1 }
 0x185   : > { %3444 = vmatpush2.bf16.msra.mxu0 %v5528_v23  ;;  %v1200_v63 = vpop.f32.mrf.mxu0 }
 0x186   : > { %3445 = vmatprep.subr.bf16.mxu0 %v5536_v30  ;;  %v1245_v20 = vpop.f32.mrf.mxu1 }
 0x187   : > { %3799 = vmatpush2.bf16.msra.mxu1 %v5531_v31  ;;  %v1202_v19 = vpop.f32.mrf.mxu0 }
 0x188   : > { %3800 = vmatprep.subr.bf16.mxu1 %v5539_v33  ;;  %v1247_v22 = vpop.f32.mrf.mxu1 }
 0x189   : > { %3446 = vmatpush2.bf16.msra.mxu0 %v5534_v32  ;;  %v1204_v17 = vpop.f32.mrf.mxu0 }
 0x18a   : > { %3829 = vmatprep.subr.bf16.mxu0 %v5545_v36  ;;  %v1249_v25 = vpop.f32.mrf.mxu1 }
 0x18b   : > { %3801 = vmatpush2.bf16.msra.mxu1 %v5537_v37  ;;  %v1206_v23 = vpop.f32.mrf.mxu0 }
 0x18c   : > { %3448 = vmatmul.mubr.bf16.vlgmr.msra.gmra.mxu0 %v3175_v38  ;;  %3802 = vmatprep.subr.bf16.mxu1 %v5542_v39  ;;  %v1600_v27 = vpop.f32.mrf.mxu1 }
 0x18d   : > { %3830 = vmatpush1.bf16.msra.mxu0 %v5543_v40  ;;  %3853 = vmatprep.mubr.bf16.mxu0 %v5578_v2  ;;  %v3508_v2 = vld [vmem:[%s5654_s18 + $0x30] sm:$0xf]  ;;  %v1643_v24 = vpop.f32.mrf.mxu0 }
 0x18e   : > { %3831 = vmatprep.subr.bf16.mxu0 %v5551_v41  ;;  %v3514_v61 = vpack.c.bf16 %v3508_v2, %v3508_v2  ;;  %v6983_v29 = vpop.f32.mrf.mxu1 }
 0x18f   : > { %3803 = vmatpush2.bf16.msra.mxu1 %v5540_v42  ;;  %v6981_v28 = vpop.f32.mrf.mxu0 }
 0x190   : > { %3804 = vmatprep.subr.bf16.mxu1 %v5548_v43  ;;  %v3565_v5 = vrot.slane %v3514_v61, 2  ;;  %v6987_v31 = vpop.f32.mrf.mxu1 }
 0x191   : > { %3832 = vmatpush1.bf16.msra.mxu0 %v5549_v44  ;;  %v6985_v30 = vpop.f32.mrf.mxu0 }
 0x192   : > { %3833 = vmatprep.subr.bf16.mxu0 %v5557_v46  ;;  %v3566_v7 = vsel %vm1715_vm4, %v3564_v58, %v3565_v5  ;;  %v6993_v34 = vpop.f32.mrf.mxu1  ;;  %v3885_v5 = vlaneseq }
 0x193   : > { %3805 = vmatpush2.bf16.msra.mxu1 %v5546_v49  ;;  %v6989_v32 = vpop.f32.mrf.mxu0 }
 0x194   : > { %3806 = vmatprep.subr.bf16.mxu1 %v5554_v50  ;;  %v6995_v35 = vpop.f32.mrf.mxu1 }
 0x195   : > { %3834 = vmatpush1.bf16.msra.mxu0 %v5555_v45 }
 0x196   : > { %3835 = vmatprep.subr.bf16.mxu0 %v5563_v56  ;;  %v6999_v37 = vpop.f32.mrf.mxu1 }
 0x197   : > { %3807 = vmatpush2.bf16.msra.mxu1 %v5552_v57  ;;  %7118 = vst [vmem:[#allocation4_spill] sm:$0xff] %v6999_v37  ;;  %v1248_v37 = vadd.f32 %v1247_v22, %v1204_v17 }
 0x198   : > { %3808 = vmatprep.subr.bf16.mxu1 %v5560_v62  ;;  %v7003_v39 = vpop.f32.mrf.mxu1 }
 0x199   : > { %3836 = vmatpush1.bf16.msra.mxu0 %v5561_v60  ;;  %7120 = vst [vmem:[#allocation6_spill] sm:$0xff] %v7003_v39  ;;  %v843_v39 = vadd.f32 %v842_v12, %v6519_v18 }
 0x19a   : > { %v7007_v42 = vpop.f32.mrf.mxu1 }
 0x19b   : > { %3809 = vmatpush2.bf16.msra.mxu1 %v5558_v4  ;;  %7122 = vst [vmem:[#allocation8_spill] sm:$0xff] %v7007_v42 }
 0x19c   : > { %4941 = vmatmul.mubr.msk.bf16.vlgmr.msra.gmra.mxu0 %vm513_vm1, %v3572_v6  ;;  %v841_v6 = vadd.f32 %v840_v9, %v6509_v11  ;;  %v1644_v9 = vadd.f32 %v1643_v24, %v1600_v27 }
 0x19e   : > { %3811 = vmatmul.mubr.bf16.vlgmr.msra.gmra.mxu1 %v3566_v7 }
 0x1ac   : > { %v6991_v33 = vpop.f32.mrf.mxu0 }
 0x1ae   : > { %v6997_v36 = vpop.f32.mrf.mxu0 }
 0x1af   : > { %7117 = vst [vmem:[#allocation3_spill] sm:$0xff] %v6997_v36  ;;  %v1250_v36 = vadd.f32 %v1249_v25, %v1206_v23 }
 0x1b0   : > { %v7001_v38 = vpop.f32.mrf.mxu0 }
 0x1b1   : > { %7119 = vst [vmem:[#allocation5_spill] sm:$0xff] %v7001_v38  ;;  %v845_v38 = vadd.f32 %v844_v14, %v6527_v21  ;;  %v5579_v14 = vmov 1983009808  }
 0x1b2   : > { %v7005_v40 = vpop.f32.mrf.mxu0 }
 0x1b3   : > { %7121 = vst [vmem:[#allocation7_spill] sm:$0xff] %v7005_v40  ;;  %v847_v40 = vadd.f32 %v846_v16, %v6535_v26  ;;  %v888_v11 = vadd.f32 %v6977_v13, %v845_v38  ;;  %v3883_v26 = vunpack.c.l.s4 %v5579_v14  ;;  %v3956_v13 = vld [vmem:[%s7115_s2] sm:$0x3] }
 0x1b5   : > { %v890_v21 = vadd.f32 %v6979_v15, %v847_v40  ;;  %v7040_v17 = vadd.f32 %v1248_v37, %v888_v11  ;;  %v3884_v40 = vunpack.c.0.s8 %v3883_v26  ;;  %v1648_v37 = vadd.f32 %v6985_v30, %v6987_v31 }
 0x1b7   : > { %v1255_v15 = vadd.f32 %v1250_v36, %v890_v21  ;;  %v1650_v36 = vadd.f32 %v6989_v32, %v6993_v34 }
 0x1bc   : > { %v2445_v41 = vpop.f32.mrf.mxu0 }
 0x1be   : > { %v2402_v43 = vpop.f32.mrf.mxu1  ;;  %v2447_v44 = vpop.f32.mrf.mxu0 }
 0x1bf   : > { %v2446_v18 = vadd.f32 %v2445_v41, %v2402_v43 }
 0x1c0   : > { %v2404_v46 = vpop.f32.mrf.mxu1  ;;  %v2449_v47 = vpop.f32.mrf.mxu0 }
 0x1c2   : > { %v2406_v48 = vpop.f32.mrf.mxu1  ;;  %v2451_v49 = vpop.f32.mrf.mxu0 }
 0x1c3   : > { %v2450_v24 = vadd.f32 %v2449_v47, %v2406_v48 }
 0x1c4   : > { %v2408_v45 = vpop.f32.mrf.mxu1 }
 0x1ce   : > { %v2734_v51 = vpop.f32.mrf.mxu1 }
 0x1d0   : > { %v7009_v52 = vpop.f32.mrf.mxu1 }
 0x1d1   : > { %7123 = vst [vmem:[#allocation9_spill] sm:$0xff] %v7009_v52  ;;  %v886_v52 = vadd.f32 %v6975_v10, %v843_v39  ;;  %v2452_v39 = vadd.f32 %v2451_v49, %v2408_v45  ;;  %v2008_v49 = vadd.f32 %v6995_v35, %v6991_v33 }
 0x1d2   : > { %v7011_v55 = vpop.f32.mrf.mxu1 }
 0x1d3   : > { %7124 = vst [vmem:[#allocation10_spill] sm:$0xff] %v7011_v55  ;;  %v1244_v55 = vadd.f32 %v1243_v53, %v1200_v63  ;;  %v1646_v53 = vadd.f32 %v6981_v28, %v6983_v29 }
 0x1d4   : > { %v7013_v59 = vpop.f32.mrf.mxu1 }
 0x1d5   : > { %7125 = vst [vmem:[#allocation11_spill] sm:$0xff] %v7013_v59  ;;  %v7025_v59 = vshrl.u32 %v3885_v5, 7 }
 0x1d7   : > { %v7032_v16 = vsub.s32 0, %v7025_v59  ;;  %v7054_v31 = vsub.s32 %v3884_v40, %v7025_v59 }
 0x1d8   : > { %v7129_v45 = vld [vmem:[#allocation9_spill] sm:$0xff] }
 0x1d9   : > { %v3961_v28 = vrot.slane %v3956_v13, %v7032_v16 }
 0x1fc   : > { %v2691_v50 = vpop.f32.mrf.mxu0 }
 0x1fd   : > { %v2692_v10 = vadd.f32 %v2691_v50, %v2446_v18 }
 0x1fe   : > { %v2693_v2 = vpop.f32.mrf.mxu0 }
 0x1ff   : > { %v2735_v43 = vadd.f32 %v2734_v51, %v2692_v10 }
 0x200   : > { %v2695_v54 = vpop.f32.mrf.mxu0 }
 0x201   : > { %v2696_v47 = vadd.f32 %v2695_v54, %v2450_v24  ;;  %v7138_v24 = vld [vmem:[#allocation8_spill] sm:$0xff] }
 0x202   : > { %v2697_v56 = vpop.f32.mrf.mxu0 }
 0x203   : > { %v2698_v48 = vadd.f32 %v2697_v56, %v2452_v39 }
 0x20c   : > { %v3093_v57 = vpop.f32.mrf.mxu0 }
 0x20e   : > { %v3050_v3 = vpop.f32.mrf.mxu1  ;;  %v3095_v61 = vpop.f32.mrf.mxu0 }
 0x20f   : > { %v3094_v27 = vadd.f32 %v3093_v57, %v3050_v3  ;;  %v7130_v3 = vld [vmem:[#allocation3_spill] sm:$0xff] }
 0x210   : > { %v3052_v62 = vpop.f32.mrf.mxu1  ;;  %v7015_v60 = vpop.f32.mrf.mxu0 }
 0x211   : > { %7126 = vst [vmem:[#allocation12_spill] sm:$0xff] %v7015_v60  ;;  %v884_v60 = vadd.f32 %v6973_v8, %v841_v6  ;;  %v3964_v8 = vsub.s32 1, %v7025_v59  ;;  %v7135_v6 = vld [vmem:[#allocation10_spill] sm:$0xff] }
 0x212   : > { %v3054_v0 = vpop.f32.mrf.mxu1  ;;  %v7017_v1 = vpop.f32.mrf.mxu0 }
 0x213   : > { %7127 = vst [vmem:[#allocation13_spill] sm:$0xff] %v7017_v1  ;;  %v1246_v1 = vadd.f32 %v1245_v20, %v1202_v19  ;;  %v1252_v63 = vadd.f32 %v1244_v55, %v884_v60  ;;  %v2448_v19 = vadd.f32 %v2447_v44, %v2404_v46  ;;  %v3965_v29 = vrot.slane %v3956_v13, %v3964_v8 }
 0x214   : > { %v7019_v58 = vpop.f32.mrf.mxu1  ;;  %v3096_v44 = vadd.f32 %v3095_v61, %v3052_v62  ;;  %v3102_v55 = vadd.f32 %v3094_v27, %v2735_v43  ;;  %v7131_v61 = vld [vmem:[#allocation4_spill] sm:$0xff] }
 0x215   : > { %7128 = vst [vmem:[#allocation14_spill] sm:$0xff] %v7019_v58  ;;  %v1253_v20 = vadd.f32 %v1246_v1, %v886_v52  ;;  %v1652_v23 = vadd.f32 %v1644_v9, %v1252_v63  ;;  %v2694_v25 = vadd.f32 %v2693_v2, %v2448_v19  ;;  %v2010_v62 = vadd.f32 %v7131_v61, %v7130_v3 }
 0x216   : > { %v3966_v32 = vcombine.low %v3961_v28, %v3965_v29  ;;  %v3967_v18 = vcombine.high %v3961_v28, %v3965_v29  ;;  %v7140_v28 = vld [vmem:[#allocation6_spill] sm:$0xff] }
 0x217   : > { %v1653_v41 = vadd.f32 %v1646_v53, %v1253_v20  ;;  %v2737_v52 = vadd.f32 %v7129_v45, %v2694_v25  ;;  %v2016_v8 = vadd.f32 %v2008_v49, %v1652_v23  ;;  %v7137_v20 = vld [vmem:[#allocation7_spill] sm:$0xff] }
 0x218   : > { %v7132_v60 = vld [vmem:[#allocation12_spill] sm:$0xff]  ;;  %v3974_v19 = vrot.slane %v3966_v32, %v7054_v31  ;;  %v2014_v25 = vadd.f32 %v7138_v24, %v7137_v20  ;;  %v7066_v23 = vrot.slane %v3967_v18, %v7054_v31 }
 0x219   : > { %v3098_v1 = vadd.f32 %v7132_v60, %v3054_v0  ;;  %v3103_v34 = vadd.f32 %v3096_v44, %v2737_v52  ;;  %v2017_v63 = vadd.f32 %v2010_v62, %v1653_v41  ;;  %v7074_v60 = vsub.s32 2, %v7025_v59 }
 0x21a   : > { %v7134_v56 = vld [vmem:[#allocation13_spill] sm:$0xff]  ;;  %v3984_v3 = vrot.slane %v3974_v19, 1 }
 0x21c   : > { %v7133_v54 = vld [vmem:[#allocation14_spill] sm:$0xff] }
 0x21e   : > { %v3492_v7 = vpop.f32.mrf.mxu1 }
 0x220   : > { %v3494_v58 = vpop.f32.mrf.mxu1 }
 0x222   : > { %v3496_v22 = vpop.f32.mrf.mxu1 }
 0x224   : > { %v3498_v2 = vpop.f32.mrf.mxu1 }
 0x24c   : > { %v3449_v4 = vpop.f32.mrf.mxu0 }
 0x24d   : > { %v3493_v46 = vadd.f32 %v3492_v7, %v3449_v4  ;;  %v3100_v4 = vadd.f32 %v7134_v56, %v7133_v54 }
 0x24e   : > { %v3451_v42 = vpop.f32.mrf.mxu0 }
 0x24f   : > { %v3495_v57 = vadd.f32 %v3494_v58, %v3451_v42  ;;  %v3501_v33 = vadd.f32 %v3493_v46, %v3102_v55  ;;  %v2739_v42 = vadd.f32 %v7135_v6, %v2696_v47  ;;  %v7136_v58 = vld [vmem:[#allocation11_spill] sm:$0xff]  ;;  %v1654_v47 = vadd.f32 %v1648_v37, %v7040_v17 }
 0x250   : > { %v3453_v12 = vpop.f32.mrf.mxu0  ;;  %v2741_v7 = vadd.f32 %v7136_v58, %v2698_v48  ;;  %v3982_v48 = vcombine.high %v3974_v19, %v3974_v19  ;;  %v3983_v55 = vcombine.high %v7066_v23, %v7066_v23  ;;  %v3986_v37 = vrot.slane %v7066_v23, 1 }
 0x251   : > { %v3497_v11 = vadd.f32 %v3496_v22, %v3453_v12  ;;  %v3502_v0 = vadd.f32 %v3495_v57, %v3103_v34  ;;  %v3104_v53 = vadd.f32 %v3098_v1, %v2739_v42  ;;  %v1655_v12 = vadd.f32 %v1650_v36, %v1255_v15  ;;  %v7139_v22 = vld [vmem:[#allocation5_spill] sm:$0xff] }
 0x252   : > { %v3455_v38 = vpop.f32.mrf.mxu0  ;;  %v3105_v27 = vadd.f32 %v3100_v4, %v2741_v7  ;;  %v2012_v29 = vadd.f32 %v7140_v28, %v7139_v22  ;;  %v3985_v62 = vrot.slane %v3982_v48, 1  ;;  %v3987_v4 = vrot.slane %v3983_v55, 1 }
 0x253   : > { %v3499_v21 = vadd.f32 %v3498_v2, %v3455_v38  ;;  %v3503_v38 = vadd.f32 %v3497_v11, %v3104_v53  ;;  %v2019_v49 = vadd.f32 %v2014_v25, %v1655_v12 }
 0x254   : > { %v2018_v36 = vadd.f32 %v2012_v29, %v1654_v47 }
 0x255   : > { %v3504_v41 = vadd.f32 %v3499_v21, %v3105_v27 }
 0x25c   : > { %v3855_v50 = vpop.f32.mrf.mxu0 }
 0x25e   : > { %v3857_v51 = vpop.f32.mrf.mxu0  ;;  %v3812_v30 = vpop.f32.mrf.mxu1 }
 0x25f   : > { %v3856_v35 = vadd.f32 %v3855_v50, %v3812_v30 }
 0x260   : > { %v3859_v5 = vpop.f32.mrf.mxu0  ;;  %v3814_v9 = vpop.f32.mrf.mxu1 }
 0x261   : > { %v3864_v14 = vadd.f32 %v3856_v35, %v3501_v33  ;;  %v3858_v26 = vadd.f32 %v3857_v51, %v3814_v9 }
 0x262   : > { %v3816_v10 = vpop.f32.mrf.mxu1  ;;  %v3861_v13 = vpop.f32.mrf.mxu0 }
 0x263   : > { %v3865_v39 = vadd.f32 %v3858_v26, %v3502_v0  ;;  %v3860_v40 = vadd.f32 %v3859_v5, %v3816_v10  ;;  %v3872_v44 = vmax.f32 %v2016_v8, %v3864_v14 }
 0x264   : > { %v3818_v43 = vpop.f32.mrf.mxu1 }
 0x265   : > { %v3873_v46 = vmax.f32 %v2017_v63, %v3865_v39  ;;  %v3862_v50 = vadd.f32 %v3861_v13, %v3818_v43  ;;  %v3866_v2 = vadd.f32 %v3860_v40, %v3503_v38 }
 0x267   : > { %v3880_v45 = vcombine.low %v3872_v44, %v3873_v46  ;;  %v3881_v52 = vcombine.high %v3872_v44, %v3873_v46  ;;  %v3867_v15 = vadd.f32 %v3862_v50, %v3504_v41  ;;  %v3874_v17 = vmax.f32 %v2018_v36, %v3866_v2 }
 0x269   : > { %v3888_v57 = vrot.slane %v3880_v45, %v7054_v31  ;;  %v3895_v51 = vrot.slane %v3881_v52, %v7054_v31  ;;  %v3875_v61 = vmax.f32 %v2019_v49, %v3867_v15 }
 0x26b   : > { %v3896_v1 = vcombine.high %v3888_v57, %v3888_v57  ;;  %v3897_v30 = vcombine.high %v3895_v51, %v3895_v51  ;;  %v4942_v32 = vrot.slane %v3888_v57, 9  ;;  %v4944_v34 = vrot.slane %v3895_v51, 9 }
 0x26c   : > { %v3898_v54 = vcombine.low %v3874_v17, %v3875_v61  ;;  %v3899_v56 = vcombine.high %v3874_v17, %v3875_v61 }
 0x26d   : > { %v4943_v33 = vrot.slane %v3896_v1, 9  ;;  %v4945_v35 = vrot.slane %v3897_v30, 9  ;;  %v3948_v5 = vmax.f32 %v3888_v57, %v4942_v32  ;;  %v3950_v6 = vmax.f32 %v3895_v51, %v4944_v34 }
 0x26e   : > { %v3906_v59 = vrot.slane %v3898_v54, %v7054_v31  ;;  %v3913_v42 = vrot.slane %v3899_v56, %v7054_v31 }
 0x26f   : > { %v3949_v58 = vmax.f32 %v3896_v1, %v4943_v33  ;;  %v3951_v7 = vmax.f32 %v3897_v30, %v4945_v35  ;;  %v3996_v11 = vadd.f32 %v3974_v19, %v3948_v5  ;;  %v3998_v9 = vadd.f32 %v3982_v48, %v3950_v6 }
 0x270   : > { %v3914_v18 = vcombine.high %v3906_v59, %v3906_v59  ;;  %v3915_v0 = vcombine.high %v3913_v42, %v3913_v42  ;;  %v4946_v21 = vrot.slane %v3906_v59, 9  ;;  %v4948_v14 = vrot.slane %v3913_v42, 9 }
 0x271   : > { %v3997_v26 = vadd.f32 %v3984_v3, %v3949_v58  ;;  %v3999_v8 = vadd.f32 %v3985_v62, %v3951_v7  ;;  %v4004_v63 = vmax.f32 %v3996_v11, 0.0  ;;  %v4006_v53 = vmax.f32 %v3998_v9, 0.0 }
 0x272   : > { %v4947_v10 = vrot.slane %v3914_v18, 9  ;;  %v4949_v13 = vrot.slane %v3915_v0, 9  ;;  %v3952_v20 = vmax.f32 %v3906_v59, %v4946_v21  ;;  %v3954_v24 = vmax.f32 %v3913_v42, %v4948_v14 }
 0x273   : > { %v4005_v25 = vmax.f32 %v3997_v26, 0.0  ;;  %v4007_v27 = vmax.f32 %v3999_v8, 0.0  ;;  %v4023_v31 = vrot.slane %v4004_v63, %v7032_v16  ;;  %v4027_v19 = vrot.slane %v4004_v63, %v7074_v60 }
 0x274   : > { %v3953_v39 = vmax.f32 %v3914_v18, %v4947_v10  ;;  %v3955_v40 = vmax.f32 %v3915_v0, %v4949_v13  ;;  %v4039_v28 = vrot.slane %v4006_v53, %v7032_v16  ;;  %v4043_v29 = vrot.slane %v4006_v53, %v7074_v60 }
 0x275   : > { %v4031_v12 = vrot.slane %v4005_v25, %v7032_v16  ;;  %v4035_v22 = vrot.slane %v4005_v25, %v7074_v60  ;;  %v4000_v38 = vadd.f32 %v7066_v23, %v3952_v20  ;;  %v4002_v41 = vadd.f32 %v3983_v55, %v3954_v24 }
 0x276   : > { %v4001_v43 = vadd.f32 %v3986_v37, %v3953_v39  ;;  %v4003_v44 = vadd.f32 %v3987_v4, %v3955_v40  ;;  %v4047_v46 = vrot.slane %v4007_v27, %v7032_v16  ;;  %v4051_v50 = vrot.slane %v4007_v27, %v7074_v60 }
 0x277   : > { %v4085_v47 = vsel %vm4084_vm5, %v4031_v12, %v4023_v31  ;;  %v4098_v48 = vsel %vm4084_vm5, %v4035_v22, %v4027_v19  ;;  %v4008_v45 = vmax.f32 %v4000_v38, 0.0  ;;  %v4010_v36 = vmax.f32 %v4002_v41, 0.0 }
 0x278   : > { %v4087_v2 = vsel %vm4086_vm6, %v4039_v28, %v4085_v47  ;;  %v4099_v49 = vsel %vm4086_vm6, %v4043_v29, %v4098_v48  ;;  %v4009_v52 = vmax.f32 %v4001_v43, 0.0  ;;  %v4011_v55 = vmax.f32 %v4003_v44, 0.0 }
 0x279   : > { %v4089_v23 = vsel %vm4088_vm7, %v4047_v46, %v4087_v2  ;;  %v4100_v15 = vsel %vm4088_vm7, %v4051_v50, %v4099_v49  ;;  %v4055_v57 = vrot.slane %v4008_v45, %v7032_v16  ;;  %v4059_v51 = vrot.slane %v4008_v45, %v7074_v60 }
 0x27a   : > { %v4063_v3 = vrot.slane %v4009_v52, %v7032_v16  ;;  %v4067_v61 = vrot.slane %v4009_v52, %v7074_v60  ;;  %v4071_v62 = vrot.slane %v4010_v36, %v7032_v16  ;;  %v4075_v17 = vrot.slane %v4010_v36, %v7074_v60 }
 0x27b   : > { %v4091_v37 = vsel %vm4090_vm8, %v4055_v57, %v4089_v23  ;;  %v4101_v1 = vsel %vm4090_vm8, %v4059_v51, %v4100_v15  ;;  %v4079_v30 = vrot.slane %v4011_v55, %v7032_v16  ;;  %v4083_v32 = vrot.slane %v4011_v55, %v7074_v60 }
 0x27c   : > { %v4093_v34 = vsel %vm4092_vm9, %v4063_v3, %v4091_v37  ;;  %v4102_v54 = vsel %vm4092_vm9, %v4067_v61, %v4101_v1 }
 0x27d   : > { %v4095_v56 = vsel %vm4094_vm10, %v4071_v62, %v4093_v34  ;;  %v4103_v4 = vsel %vm4094_vm10, %v4075_v17, %v4102_v54 }
 0x27e   : > { %v4097_v33 = vsel %vm4096_vm11, %v4079_v30, %v4095_v56  ;;  %v4104_v35 = vsel %vm4096_vm11, %v4083_v32, %v4103_v4 }
 0x27f   : > { %4107 = vst [vmem:[%s170_s28] sm:$0xff] %v4097_v33  ;;  %4108 = vst [vmem:[%s170_s28 + $0x8] sm:$0xff] %v4104_v35 }
 0x280 PF: > { %s13_s12 = sadd.s32 1, %s5576_s12  }
 0x281   : > { %p10_p4 = scmp.ge.s32.totalorder %s13_s12, 4  }
 0x283   :  { %12 = sbr.rel (!%p10_p4) target bundleno = 1 (0x1), region = 71 }

</bundles_post_ra>
